<compile_context>
chip_gen: v7x
topology: tpu7x:2x2x1
jax: 0.10.0
libtpu: 0.0.40
codegen_flags: <defaults>
</compile_context>

<pallas_src>
import jax
import jax.numpy as jnp
from jax.experimental import pallas as pl
from jax.experimental.pallas import tpu as pltpu

# ------------------------- problem sizes (small, deterministic) -------------------
B, S, T = 2, 8, 8          # batch, src length, trg length
E, H = 32, 32              # embedding size, GRU hidden size
H2, H3 = 2 * H, 3 * H
SRC_VOCAB, TRG_VOCAB = 50, 50


def encdec_kernel(
    # inputs
    src_emb_ref, trg_emb_ref, mask_ref, score_bias_ref,
    wih_f_ref, whh_f_ref, bih_f_ref, bhh_f_ref,
    wih_b_ref, whh_b_ref, bih_b_ref, bhh_b_ref,
    w_bridge_ref, b_bridge_ref,
    w_key_ref, w_query_ref, v_energy_ref,
    wih_d_ref, whh_d_ref, bih_d_ref, bhh_d_ref, w_pre_ref,
    # outputs
    dec_states_ref, dec_hidden_ref, pre_out_ref,
):
    f32 = jnp.float32
    src = src_emb_ref[...]            # [S*B, E]   rows in (s, b) order
    trg = trg_emb_ref[...]            # [T*B, E]   rows in (t, b) order
    mask = mask_ref[...]              # [S, B, H]  1 = valid, 0 = pad
    score_bias = score_bias_ref[...]  # [B*S, 1]   0 valid / -1e30 pad, (b, s) order

    whh_f = whh_f_ref[...]; bhh_f = bhh_f_ref[...]     # bhh_* pre-broadcast to [B, 3H]
    whh_b = whh_b_ref[...]; bhh_b = bhh_b_ref[...]
    whh_d = whh_d_ref[...]; bhh_d = bhh_d_ref[...]
    wq = w_query_ref[...]             # [H, H]
    wk = w_key_ref[...]               # [2H, H]
    wih_d = wih_d_ref[...]            # [E+2H, 3H]
    wih_d_ctx = wih_d[E:, :]          # [2H, 3H]  (tile-aligned row slice)
    w_pre = w_pre_ref[...]            # [E+3H, H] = [128, H]

    # ---------- hoisted input-to-hidden GEMMs (off the recurrence critical path) ----
    gx_f_all = jnp.dot(src, wih_f_ref[...], preferred_element_type=f32) + bih_f_ref[...]
    gx_b_all = jnp.dot(src, wih_b_ref[...], preferred_element_type=f32) + bih_b_ref[...]
    gx_d_all = jnp.dot(trg, wih_d[:E, :], preferred_element_type=f32) + bih_d_ref[...]

    # ---------- fused bidirectional encoder (statically unrolled, masked updates) ---
    h_f = jnp.zeros((B, H), f32)
    h_b = jnp.zeros((B, H), f32)
    enc_f = [None] * S
    enc_b = [None] * S
    for i in range(S):
        j = S - 1 - i
        m_f = mask[i]                                   # [B, H]
        m_b = mask[j]
        gh_f = jnp.dot(h_f, whh_f, preferred_element_type=f32) + bhh_f
        gh_b = jnp.dot(h_b, whh_b, preferred_element_type=f32) + bhh_b
        gx_f = gx_f_all[i * B:(i + 1) * B, :]
        gx_b = gx_b_all[j * B:(j + 1) * B, :]
        rz_f = jax.nn.sigmoid(gx_f[:, :H2] + gh_f[:, :H2])
        rz_b = jax.nn.sigmoid(gx_b[:, :H2] + gh_b[:, :H2])
        n_f = jnp.tanh(gx_f[:, H2:] + rz_f[:, :H] * gh_f[:, H2:])
        n_b = jnp.tanh(gx_b[:, H2:] + rz_b[:, :H] * gh_b[:, H2:])
        hn_f = (1.0 - rz_f[:, H:]) * n_f + rz_f[:, H:] * h_f
        hn_b = (1.0 - rz_b[:, H:]) * n_b + rz_b[:, H:] * h_b
        h_f = m_f * hn_f + (1.0 - m_f) * h_f            # freeze hidden at padded steps
        h_b = m_b * hn_b + (1.0 - m_b) * h_b
        enc_f[i] = m_f * h_f                            # zero outputs at padded steps
        enc_b[j] = m_b * h_b

    # ---------- bridge: decoder initial hidden ----------
    hcat = jnp.concatenate([h_f, h_b], axis=-1)         # [B, 2H]
    hid = jnp.tanh(jnp.dot(hcat, w_bridge_ref[...], preferred_element_type=f32)
                   + b_bridge_ref[...])

    # ---------- attention memory: per-batch [S, 2H] blocks + one batched key dot ----
    enc_blocks = []
    for b in range(B):
        f_rows = jnp.concatenate([enc_f[s][b:b + 1, :] for s in range(S)], axis=0)  # [S, H]
        b_rows = jnp.concatenate([enc_b[s][b:b + 1, :] for s in range(S)], axis=0)  # [S, H]
        enc_blocks.append(jnp.concatenate([f_rows, b_rows], axis=-1))               # [S, 2H]
    enc_all = jnp.concatenate(enc_blocks, axis=0)                        # [B*S, 2H]
    pk_all = jnp.dot(enc_all, wk, preferred_element_type=f32)            # [B*S, H]
    pk_blocks = [pk_all[b * S:(b + 1) * S, :] for b in range(B)]
    bias_blocks = [score_bias[b * S:(b + 1) * S, :] for b in range(B)]
    v_bS = jnp.broadcast_to(v_energy_ref[...], (S, H))                   # hoisted broadcast

    # ---------- decoder (statically unrolled); pre_output deferred ----------
    outs = []
    ctxs = []
    for t in range(T):
        # Bahdanau attention (query = previous hidden)
        q = jnp.dot(hid, wq, preferred_element_type=f32)                 # [B, H]
        ctx_rows = []
        for b in range(B):
            e_b = jnp.tanh(jnp.broadcast_to(q[b:b + 1, :], (S, H)) + pk_blocks[b])
            sc = jnp.sum(e_b * v_bS, axis=-1, keepdims=True) + bias_blocks[b]   # [S, 1]
            mx = jnp.max(sc, axis=0, keepdims=True)
            ex = jnp.exp(sc - mx)
            al = ex / jnp.sum(ex, axis=0, keepdims=True)                 # softmax over S
            ctx_rows.append(jnp.sum(al * enc_blocks[b], axis=0, keepdims=True))  # [1, 2H]
        ctx = jnp.concatenate(ctx_rows, axis=0)                          # [B, 2H]

        # conditional GRU step: rnn_input = [emb | ctx_fwd | ctx_bwd]
        gx = gx_d_all[t * B:(t + 1) * B, :] + jnp.dot(ctx, wih_d_ctx,
                                                      preferred_element_type=f32)
        gh = jnp.dot(hid, whh_d, preferred_element_type=f32) + bhh_d
        rz = jax.nn.sigmoid(gx[:, :H2] + gh[:, :H2])
        n = jnp.tanh(gx[:, H2:] + rz[:, :H] * gh[:, H2:])
        hid = (1.0 - rz[:, H:]) * n + rz[:, H:] * hid
        outs.append(hid)
        ctxs.append(ctx)

    out_flat = jnp.concatenate(outs, axis=0)                             # [T*B, H]
    ctx_flat = jnp.concatenate(ctxs, axis=0)                             # [T*B, 2H]
    dec_states_ref[...] = out_flat
    dec_hidden_ref[...] = hid
    # pre_output = Linear([emb | out | ctx])   -- one K=128 batched dot
    pre_in = jnp.concatenate([trg, out_flat, ctx_flat], axis=-1)         # [T*B, E+3H]
    pre_out_ref[...] = jnp.dot(pre_in, w_pre, preferred_element_type=f32)


# ------------------------------- wrapper -------------------------------------------
@jax.jit
def encoder_decoder_forward(params, src, trg, src_lengths):
    # embeddings (glue: gather in plain JAX); dropouts are eval-mode identity
    src_emb = jnp.take(params['src_emb_table'], src, axis=0)             # [B, S, E]
    trg_emb = jnp.take(params['trg_emb_table'], trg, axis=0)             # [B, T, E]
    src_flat = jnp.transpose(src_emb, (1, 0, 2)).reshape(S * B, E).astype(jnp.float32)
    trg_flat = jnp.transpose(trg_emb, (1, 0, 2)).reshape(T * B, E).astype(jnp.float32)

    lenm = (jnp.arange(S)[:, None] < src_lengths[None, :]).astype(jnp.float32)   # [S, B]
    mask_bh = jnp.broadcast_to(lenm[:, :, None], (S, B, H))              # [S, B, H]
    score_bias = jnp.where(jnp.arange(S)[None, :] < src_lengths[:, None], 0.0, -1e30)
    score_bias = score_bias.reshape(B * S, 1).astype(jnp.float32)        # (b, s) order

    def bcast(bias):                                                     # hoist bias broadcast
        return jnp.broadcast_to(bias, (B, 3 * H)).astype(jnp.float32)

    inputs = (
        src_flat, trg_flat, mask_bh, score_bias,
        params['enc_wih_f'], params['enc_whh_f'], params['enc_bih_f'], bcast(params['enc_bhh_f']),
        params['enc_wih_b'], params['enc_whh_b'], params['enc_bih_b'], bcast(params['enc_bhh_b']),
        params['w_bridge'], params['b_bridge'],
        params['w_key'], params['w_query'], params['v_energy'],
        params['dec_wih'], params['dec_whh'], params['dec_bih'], bcast(params['dec_bhh']),
        params['w_pre'],
    )
    vmem = pl.BlockSpec(memory_space=pltpu.MemorySpace.VMEM)
    out_shapes = (
        jax.ShapeDtypeStruct((T * B, H), jnp.float32),   # decoder states, (t, b) flat
        jax.ShapeDtypeStruct((B, H), jnp.float32),       # final decoder hidden
        jax.ShapeDtypeStruct((T * B, H), jnp.float32),   # pre-output vectors, (t, b) flat
    )
    dec_flat, dec_hidden, pre_flat = pl.pallas_call(
        encdec_kernel,
        out_shape=out_shapes,
        in_specs=[vmem] * len(inputs),
        out_specs=(vmem, vmem, vmem),
    )(*inputs)

    decoder_states = dec_flat.reshape(T, B, H).transpose(1, 0, 2)        # [B, T, H]
    pre_output_vectors = pre_flat.reshape(T, B, H).transpose(1, 0, 2)    # [B, T, H]
    hidden = dec_hidden[None]                                            # [1, B, H]
    return decoder_states, hidden, pre_output_vectors


# --------------------------- pure-JAX reference (for checking) ---------------------
def reference_forward(params, src, trg, src_lengths):
    src_emb = jnp.take(params['src_emb_table'], src, axis=0)
    trg_emb = jnp.take(params['trg_emb_table'], trg, axis=0)

    def gru(x, h, wih, whh, bih, bhh):
        gx = x @ wih + bih
        gh = h @ whh + bhh
        r = jax.nn.sigmoid(gx[:, :H] + gh[:, :H])
        z = jax.nn.sigmoid(gx[:, H:2 * H] + gh[:, H:2 * H])
        n = jnp.tanh(gx[:, 2 * H:] + r * gh[:, 2 * H:])
        return (1 - z) * n + z * h

    lenm = (jnp.arange(S)[:, None] < src_lengths[None, :]).astype(jnp.float32)  # [S,B]
    h = jnp.zeros((B, H)); enc_f = []
    for t in range(S):
        hn = gru(src_emb[:, t], h, params['enc_wih_f'], params['enc_whh_f'],
                 params['enc_bih_f'], params['enc_bhh_f'])
        m = lenm[t][:, None]
        h = m * hn + (1 - m) * h
        enc_f.append(m * h)
    h_f = h
    h = jnp.zeros((B, H)); enc_b = [None] * S
    for t in range(S - 1, -1, -1):
        hn = gru(src_emb[:, t], h, params['enc_wih_b'], params['enc_whh_b'],
                 params['enc_bih_b'], params['enc_bhh_b'])
        m = lenm[t][:, None]
        h = m * hn + (1 - m) * h
        enc_b[t] = m * h
    h_b = h
    enc_hidden = jnp.concatenate([jnp.stack(enc_f, 1), jnp.stack(enc_b, 1)], -1)  # [B,S,2H]
    hid = jnp.tanh(jnp.concatenate([h_f, h_b], -1) @ params['w_bridge'] + params['b_bridge'])
    pk = enc_hidden @ params['w_key']                                             # [B,S,H]
    dec_states, pre_outs = [], []
    for i in range(T):
        emb = trg_emb[:, i]
        q = hid @ params['w_query']
        e = jnp.tanh(q[:, None, :] + pk)
        scores = jnp.sum(e * params['v_energy'][0], axis=-1)
        scores = jnp.where(lenm.T > 0, scores, -1e30)
        alphas = jax.nn.softmax(scores, axis=-1)
        ctx = jnp.einsum('bs,bsh->bh', alphas, enc_hidden)
        rnn_in = jnp.concatenate([emb, ctx], -1)
        gx = rnn_in @ params['dec_wih'] + params['dec_bih']
        gh = hid @ params['dec_whh'] + params['dec_bhh']
        r = jax.nn.sigmoid(gx[:, :H] + gh[:, :H])
        z = jax.nn.sigmoid(gx[:, H:2 * H] + gh[:, H:2 * H])
        n = jnp.tanh(gx[:, 2 * H:] + r * gh[:, 2 * H:])
        hid = (1 - z) * n + z * hid
        dec_states.append(hid)
        pre_outs.append(jnp.concatenate([emb, hid, ctx], -1) @ params['w_pre'])
    return jnp.stack(dec_states, 1), hid[None], jnp.stack(pre_outs, 1)


# ------------------------------- params / main -------------------------------------
def init_params(key):
    ks = jax.random.split(key, 20)

    def w(k, shape, scale=0.1):
        return jax.random.normal(k, shape, jnp.float32) * scale

    return {
        'src_emb_table': w(ks[0], (SRC_VOCAB, E), 0.5),
        'trg_emb_table': w(ks[1], (TRG_VOCAB, E), 0.5),
        'enc_wih_f': w(ks[2], (E, 3 * H)), 'enc_whh_f': w(ks[3], (H, 3 * H)),
        'enc_bih_f': w(ks[4], (1, 3 * H)), 'enc_bhh_f': w(ks[5], (1, 3 * H)),
        'enc_wih_b': w(ks[6], (E, 3 * H)), 'enc_whh_b': w(ks[7], (H, 3 * H)),
        'enc_bih_b': w(ks[8], (1, 3 * H)), 'enc_bhh_b': w(ks[9], (1, 3 * H)),
        'w_bridge': w(ks[10], (2 * H, H)), 'b_bridge': w(ks[11], (1, H)),
        'w_key': w(ks[12], (2 * H, H)), 'w_query': w(ks[13], (H, H)),
        'v_energy': w(ks[14], (1, H)),
        'dec_wih': w(ks[15], (E + 2 * H, 3 * H)), 'dec_whh': w(ks[16], (H, 3 * H)),
        'dec_bih': w(ks[17], (1, 3 * H)), 'dec_bhh': w(ks[18], (1, 3 * H)),
        'w_pre': w(ks[19], (E + 3 * H, H)),
    }


if __name__ == "__main__":
    key = jax.random.PRNGKey(0)
    kp, k1, k2 = jax.random.split(key, 3)
    params = init_params(kp)

    src = jax.random.randint(k1, (B, S), 1, SRC_VOCAB)
    trg = jax.random.randint(k2, (B, T), 1, TRG_VOCAB)
    src_lengths = jnp.array([S, 5], dtype=jnp.int32)        # sorted desc, like packed input
    pos = jnp.arange(S)[None, :]
    src = jnp.where(pos < src_lengths[:, None], src, 0)     # pad index 0 past lengths

    dec_states, hidden, pre_out = encoder_decoder_forward(params, src, trg, src_lengths)
    jax.block_until_ready((dec_states, hidden, pre_out))

    ref_states, ref_hidden, ref_pre = reference_forward(params, src, trg, src_lengths)
    assert jnp.allclose(dec_states, ref_states, atol=1e-4), "decoder_states mismatch"
    assert jnp.allclose(hidden, ref_hidden, atol=1e-4), "hidden mismatch"
    assert jnp.allclose(pre_out, ref_pre, atol=1e-4), "pre_output mismatch"

    print("KERNEL_OK")
</pallas_src>

<mosaic_0001>
module attributes {stable_mosaic.version = 11 : i64} {
  func.func @encdec_kernel(%arg0: memref<16x32xf32, #tpu.memory_space<vmem>>, %arg1: memref<16x32xf32, #tpu.memory_space<vmem>>, %arg2: memref<8x2x32xf32, #tpu.memory_space<vmem>>, %arg3: memref<16x1xf32, #tpu.memory_space<vmem>>, %arg4: memref<32x96xf32, #tpu.memory_space<vmem>>, %arg5: memref<32x96xf32, #tpu.memory_space<vmem>>, %arg6: memref<1x96xf32, #tpu.memory_space<vmem>>, %arg7: memref<2x96xf32, #tpu.memory_space<vmem>>, %arg8: memref<32x96xf32, #tpu.memory_space<vmem>>, %arg9: memref<32x96xf32, #tpu.memory_space<vmem>>, %arg10: memref<1x96xf32, #tpu.memory_space<vmem>>, %arg11: memref<2x96xf32, #tpu.memory_space<vmem>>, %arg12: memref<64x32xf32, #tpu.memory_space<vmem>>, %arg13: memref<1x32xf32, #tpu.memory_space<vmem>>, %arg14: memref<64x32xf32, #tpu.memory_space<vmem>>, %arg15: memref<32x32xf32, #tpu.memory_space<vmem>>, %arg16: memref<1x32xf32, #tpu.memory_space<vmem>>, %arg17: memref<96x96xf32, #tpu.memory_space<vmem>>, %arg18: memref<32x96xf32, #tpu.memory_space<vmem>>, %arg19: memref<1x96xf32, #tpu.memory_space<vmem>>, %arg20: memref<2x96xf32, #tpu.memory_space<vmem>>, %arg21: memref<128x32xf32, #tpu.memory_space<vmem>>, %arg22: memref<16x32xf32, #tpu.memory_space<vmem>>, %arg23: memref<2x32xf32, #tpu.memory_space<vmem>>, %arg24: memref<16x32xf32, #tpu.memory_space<vmem>>) attributes {dimension_semantics = [], scalar_prefetch = 0 : i64, scratch_operands = 0 : i64, tpu.core_type = #tpu.core_type<tc>} {
    %c0 = arith.constant 0 : index
    %c0_0 = arith.constant 0 : index
    %0 = vector.load %arg0[%c0, %c0_0] : memref<16x32xf32, #tpu.memory_space<vmem>>, vector<16x32xf32>
    %c0_1 = arith.constant 0 : index
    %c0_2 = arith.constant 0 : index
    %1 = vector.load %arg1[%c0_1, %c0_2] : memref<16x32xf32, #tpu.memory_space<vmem>>, vector<16x32xf32>
    %c0_3 = arith.constant 0 : index
    %c0_4 = arith.constant 0 : index
    %c0_5 = arith.constant 0 : index
    %2 = vector.load %arg2[%c0_3, %c0_4, %c0_5] : memref<8x2x32xf32, #tpu.memory_space<vmem>>, vector<8x2x32xf32>
    %c0_6 = arith.constant 0 : index
    %c0_7 = arith.constant 0 : index
    %3 = vector.load %arg3[%c0_6, %c0_7] : memref<16x1xf32, #tpu.memory_space<vmem>>, vector<16x1xf32>
    %c0_8 = arith.constant 0 : index
    %c0_9 = arith.constant 0 : index
    %4 = vector.load %arg5[%c0_8, %c0_9] : memref<32x96xf32, #tpu.memory_space<vmem>>, vector<32x96xf32>
    %c0_10 = arith.constant 0 : index
    %c0_11 = arith.constant 0 : index
    %5 = vector.load %arg7[%c0_10, %c0_11] : memref<2x96xf32, #tpu.memory_space<vmem>>, vector<2x96xf32>
    %c0_12 = arith.constant 0 : index
    %c0_13 = arith.constant 0 : index
    %6 = vector.load %arg9[%c0_12, %c0_13] : memref<32x96xf32, #tpu.memory_space<vmem>>, vector<32x96xf32>
    %c0_14 = arith.constant 0 : index
    %c0_15 = arith.constant 0 : index
    %7 = vector.load %arg11[%c0_14, %c0_15] : memref<2x96xf32, #tpu.memory_space<vmem>>, vector<2x96xf32>
    %c0_16 = arith.constant 0 : index
    %c0_17 = arith.constant 0 : index
    %8 = vector.load %arg18[%c0_16, %c0_17] : memref<32x96xf32, #tpu.memory_space<vmem>>, vector<32x96xf32>
    %c0_18 = arith.constant 0 : index
    %c0_19 = arith.constant 0 : index
    %9 = vector.load %arg20[%c0_18, %c0_19] : memref<2x96xf32, #tpu.memory_space<vmem>>, vector<2x96xf32>
    %c0_20 = arith.constant 0 : index
    %c0_21 = arith.constant 0 : index
    %10 = vector.load %arg15[%c0_20, %c0_21] : memref<32x32xf32, #tpu.memory_space<vmem>>, vector<32x32xf32>
    %c0_22 = arith.constant 0 : index
    %c0_23 = arith.constant 0 : index
    %11 = vector.load %arg14[%c0_22, %c0_23] : memref<64x32xf32, #tpu.memory_space<vmem>>, vector<64x32xf32>
    %c0_24 = arith.constant 0 : index
    %c0_25 = arith.constant 0 : index
    %12 = vector.load %arg17[%c0_24, %c0_25] : memref<96x96xf32, #tpu.memory_space<vmem>>, vector<96x96xf32>
    %13 = vector.extract_strided_slice %12 {offsets = [32, 0], sizes = [64, 96], strides = [1, 1]} : vector<96x96xf32> to vector<64x96xf32>
    %c0_26 = arith.constant 0 : index
    %c0_27 = arith.constant 0 : index
    %14 = vector.load %arg21[%c0_26, %c0_27] : memref<128x32xf32, #tpu.memory_space<vmem>>, vector<128x32xf32>
    %c0_28 = arith.constant 0 : index
    %c0_29 = arith.constant 0 : index
    %15 = vector.load %arg4[%c0_28, %c0_29] : memref<32x96xf32, #tpu.memory_space<vmem>>, vector<32x96xf32>
    %cst = arith.constant dense<0.000000e+00> : vector<16x96xf32>
    %16 = tpu.matmul %0, %15, %cst {dimension_numbers = #tpu.dot_dimension_numbers<[1], [0], [0], [1], [0, 0, 1, 1], [], []>} : vector<16x32xf32>, vector<32x96xf32>, vector<16x96xf32> -> vector<16x96xf32>
    %c0_30 = arith.constant 0 : index
    %c0_31 = arith.constant 0 : index
    %17 = vector.load %arg6[%c0_30, %c0_31] : memref<1x96xf32, #tpu.memory_space<vmem>>, vector<1x96xf32>
    %18 = vector.broadcast %17 : vector<1x96xf32> to vector<16x96xf32>
    %19 = arith.addf %16, %18 : vector<16x96xf32>
    %c0_32 = arith.constant 0 : index
    %c0_33 = arith.constant 0 : index
    %20 = vector.load %arg8[%c0_32, %c0_33] : memref<32x96xf32, #tpu.memory_space<vmem>>, vector<32x96xf32>
    %cst_34 = arith.constant dense<0.000000e+00> : vector<16x96xf32>
    %21 = tpu.matmul %0, %20, %cst_34 {dimension_numbers = #tpu.dot_dimension_numbers<[1], [0], [0], [1], [0, 0, 1, 1], [], []>} : vector<16x32xf32>, vector<32x96xf32>, vector<16x96xf32> -> vector<16x96xf32>
    %c0_35 = arith.constant 0 : index
    %c0_36 = arith.constant 0 : index
    %22 = vector.load %arg10[%c0_35, %c0_36] : memref<1x96xf32, #tpu.memory_space<vmem>>, vector<1x96xf32>
    %23 = vector.broadcast %22 : vector<1x96xf32> to vector<16x96xf32>
    %24 = arith.addf %21, %23 : vector<16x96xf32>
    %25 = vector.extract_strided_slice %12 {offsets = [0, 0], sizes = [32, 96], strides = [1, 1]} : vector<96x96xf32> to vector<32x96xf32>
    %cst_37 = arith.constant dense<0.000000e+00> : vector<16x96xf32>
    %26 = tpu.matmul %1, %25, %cst_37 {dimension_numbers = #tpu.dot_dimension_numbers<[1], [0], [0], [1], [0, 0, 1, 1], [], []>} : vector<16x32xf32>, vector<32x96xf32>, vector<16x96xf32> -> vector<16x96xf32>
    %c0_38 = arith.constant 0 : index
    %c0_39 = arith.constant 0 : index
    %27 = vector.load %arg19[%c0_38, %c0_39] : memref<1x96xf32, #tpu.memory_space<vmem>>, vector<1x96xf32>
    %28 = vector.broadcast %27 : vector<1x96xf32> to vector<16x96xf32>
    %29 = arith.addf %26, %28 : vector<16x96xf32>
    %cst_40 = arith.constant 0.000000e+00 : f32
    %30 = vector.broadcast %cst_40 : f32 to vector<2x32xf32>
    %cst_41 = arith.constant 0.000000e+00 : f32
    %31 = vector.broadcast %cst_41 : f32 to vector<2x32xf32>
    %32 = vector.extract_strided_slice %2 {offsets = [0, 0, 0], sizes = [1, 2, 32], strides = [1, 1, 1]} : vector<8x2x32xf32> to vector<1x2x32xf32>
    %33 = vector.shape_cast %32 : vector<1x2x32xf32> to vector<2x32xf32>
    %34 = vector.extract_strided_slice %2 {offsets = [7, 0, 0], sizes = [1, 2, 32], strides = [1, 1, 1]} : vector<8x2x32xf32> to vector<1x2x32xf32>
    %35 = vector.shape_cast %34 : vector<1x2x32xf32> to vector<2x32xf32>
    %cst_42 = arith.constant dense<0.000000e+00> : vector<2x96xf32>
    %36 = tpu.matmul %30, %4, %cst_42 {dimension_numbers = #tpu.dot_dimension_numbers<[1], [0], [0], [1], [0, 0, 1, 1], [], []>} : vector<2x32xf32>, vector<32x96xf32>, vector<2x96xf32> -> vector<2x96xf32>
    %37 = arith.addf %36, %5 : vector<2x96xf32>
    %cst_43 = arith.constant dense<0.000000e+00> : vector<2x96xf32>
    %38 = tpu.matmul %31, %6, %cst_43 {dimension_numbers = #tpu.dot_dimension_numbers<[1], [0], [0], [1], [0, 0, 1, 1], [], []>} : vector<2x32xf32>, vector<32x96xf32>, vector<2x96xf32> -> vector<2x96xf32>
    %39 = arith.addf %38, %7 : vector<2x96xf32>
    %40 = vector.extract_strided_slice %19 {offsets = [0, 0], sizes = [2, 96], strides = [1, 1]} : vector<16x96xf32> to vector<2x96xf32>
    %41 = vector.extract_strided_slice %24 {offsets = [14, 0], sizes = [2, 96], strides = [1, 1]} : vector<16x96xf32> to vector<2x96xf32>
    %42 = vector.extract_strided_slice %40 {offsets = [0, 0], sizes = [2, 64], strides = [1, 1]} : vector<2x96xf32> to vector<2x64xf32>
    %43 = vector.extract_strided_slice %37 {offsets = [0, 0], sizes = [2, 64], strides = [1, 1]} : vector<2x96xf32> to vector<2x64xf32>
    %44 = arith.addf %42, %43 : vector<2x64xf32>
    %45 = arith.negf %44 : vector<2x64xf32>
    %46 = math.exp %45 : vector<2x64xf32>
    %cst_44 = arith.constant 1.000000e+00 : f32
    %47 = vector.broadcast %cst_44 : f32 to vector<2x64xf32>
    %48 = arith.addf %47, %46 : vector<2x64xf32>
    %49 = arith.divf %47, %48 : vector<2x64xf32>
    %50 = vector.extract_strided_slice %41 {offsets = [0, 0], sizes = [2, 64], strides = [1, 1]} : vector<2x96xf32> to vector<2x64xf32>
    %51 = vector.extract_strided_slice %39 {offsets = [0, 0], sizes = [2, 64], strides = [1, 1]} : vector<2x96xf32> to vector<2x64xf32>
    %52 = arith.addf %50, %51 : vector<2x64xf32>
    %53 = arith.negf %52 : vector<2x64xf32>
    %54 = math.exp %53 : vector<2x64xf32>
    %cst_45 = arith.constant 1.000000e+00 : f32
    %55 = vector.broadcast %cst_45 : f32 to vector<2x64xf32>
    %56 = arith.addf %55, %54 : vector<2x64xf32>
    %57 = arith.divf %55, %56 : vector<2x64xf32>
    %58 = vector.extract_strided_slice %40 {offsets = [0, 64], sizes = [2, 32], strides = [1, 1]} : vector<2x96xf32> to vector<2x32xf32>
    %59 = vector.extract_strided_slice %49 {offsets = [0, 0], sizes = [2, 32], strides = [1, 1]} : vector<2x64xf32> to vector<2x32xf32>
    %60 = vector.extract_strided_slice %37 {offsets = [0, 64], sizes = [2, 32], strides = [1, 1]} : vector<2x96xf32> to vector<2x32xf32>
    %61 = arith.mulf %59, %60 : vector<2x32xf32>
    %62 = arith.addf %58, %61 : vector<2x32xf32>
    %63 = math.tanh %62 : vector<2x32xf32>
    %64 = vector.extract_strided_slice %41 {offsets = [0, 64], sizes = [2, 32], strides = [1, 1]} : vector<2x96xf32> to vector<2x32xf32>
    %65 = vector.extract_strided_slice %57 {offsets = [0, 0], sizes = [2, 32], strides = [1, 1]} : vector<2x64xf32> to vector<2x32xf32>
    %66 = vector.extract_strided_slice %39 {offsets = [0, 64], sizes = [2, 32], strides = [1, 1]} : vector<2x96xf32> to vector<2x32xf32>
    %67 = arith.mulf %65, %66 : vector<2x32xf32>
    %68 = arith.addf %64, %67 : vector<2x32xf32>
    %69 = math.tanh %68 : vector<2x32xf32>
    %70 = vector.extract_strided_slice %49 {offsets = [0, 32], sizes = [2, 32], strides = [1, 1]} : vector<2x64xf32> to vector<2x32xf32>
    %cst_46 = arith.constant 1.000000e+00 : f32
    %71 = vector.broadcast %cst_46 : f32 to vector<2x32xf32>
    %72 = arith.subf %71, %70 : vector<2x32xf32>
    %73 = arith.mulf %72, %63 : vector<2x32xf32>
    %74 = vector.extract_strided_slice %49 {offsets = [0, 32], sizes = [2, 32], strides = [1, 1]} : vector<2x64xf32> to vector<2x32xf32>
    %75 = arith.mulf %74, %30 : vector<2x32xf32>
    %76 = arith.addf %73, %75 : vector<2x32xf32>
    %77 = vector.extract_strided_slice %57 {offsets = [0, 32], sizes = [2, 32], strides = [1, 1]} : vector<2x64xf32> to vector<2x32xf32>
    %cst_47 = arith.constant 1.000000e+00 : f32
    %78 = vector.broadcast %cst_47 : f32 to vector<2x32xf32>
    %79 = arith.subf %78, %77 : vector<2x32xf32>
    %80 = arith.mulf %79, %69 : vector<2x32xf32>
    %81 = vector.extract_strided_slice %57 {offsets = [0, 32], sizes = [2, 32], strides = [1, 1]} : vector<2x64xf32> to vector<2x32xf32>
    %82 = arith.mulf %81, %31 : vector<2x32xf32>
    %83 = arith.addf %80, %82 : vector<2x32xf32>
    %84 = arith.mulf %33, %76 : vector<2x32xf32>
    %cst_48 = arith.constant 1.000000e+00 : f32
    %85 = vector.broadcast %cst_48 : f32 to vector<2x32xf32>
    %86 = arith.subf %85, %33 : vector<2x32xf32>
    %87 = arith.mulf %86, %30 : vector<2x32xf32>
    %88 = arith.addf %84, %87 : vector<2x32xf32>
    %89 = arith.mulf %35, %83 : vector<2x32xf32>
    %cst_49 = arith.constant 1.000000e+00 : f32
    %90 = vector.broadcast %cst_49 : f32 to vector<2x32xf32>
    %91 = arith.subf %90, %35 : vector<2x32xf32>
    %92 = arith.mulf %91, %31 : vector<2x32xf32>
    %93 = arith.addf %89, %92 : vector<2x32xf32>
    %94 = arith.mulf %33, %88 : vector<2x32xf32>
    %95 = arith.mulf %35, %93 : vector<2x32xf32>
    %96 = vector.extract_strided_slice %2 {offsets = [1, 0, 0], sizes = [1, 2, 32], strides = [1, 1, 1]} : vector<8x2x32xf32> to vector<1x2x32xf32>
    %97 = vector.shape_cast %96 : vector<1x2x32xf32> to vector<2x32xf32>
    %98 = vector.extract_strided_slice %2 {offsets = [6, 0, 0], sizes = [1, 2, 32], strides = [1, 1, 1]} : vector<8x2x32xf32> to vector<1x2x32xf32>
    %99 = vector.shape_cast %98 : vector<1x2x32xf32> to vector<2x32xf32>
    %cst_50 = arith.constant dense<0.000000e+00> : vector<2x96xf32>
    %100 = tpu.matmul %88, %4, %cst_50 {dimension_numbers = #tpu.dot_dimension_numbers<[1], [0], [0], [1], [0, 0, 1, 1], [], []>} : vector<2x32xf32>, vector<32x96xf32>, vector<2x96xf32> -> vector<2x96xf32>
    %101 = arith.addf %100, %5 : vector<2x96xf32>
    %cst_51 = arith.constant dense<0.000000e+00> : vector<2x96xf32>
    %102 = tpu.matmul %93, %6, %cst_51 {dimension_numbers = #tpu.dot_dimension_numbers<[1], [0], [0], [1], [0, 0, 1, 1], [], []>} : vector<2x32xf32>, vector<32x96xf32>, vector<2x96xf32> -> vector<2x96xf32>
    %103 = arith.addf %102, %7 : vector<2x96xf32>
    %104 = vector.extract_strided_slice %19 {offsets = [2, 0], sizes = [2, 96], strides = [1, 1]} : vector<16x96xf32> to vector<2x96xf32>
    %105 = vector.extract_strided_slice %24 {offsets = [12, 0], sizes = [2, 96], strides = [1, 1]} : vector<16x96xf32> to vector<2x96xf32>
    %106 = vector.extract_strided_slice %104 {offsets = [0, 0], sizes = [2, 64], strides = [1, 1]} : vector<2x96xf32> to vector<2x64xf32>
    %107 = vector.extract_strided_slice %101 {offsets = [0, 0], sizes = [2, 64], strides = [1, 1]} : vector<2x96xf32> to vector<2x64xf32>
    %108 = arith.addf %106, %107 : vector<2x64xf32>
    %109 = arith.negf %108 : vector<2x64xf32>
    %110 = math.exp %109 : vector<2x64xf32>
    %cst_52 = arith.constant 1.000000e+00 : f32
    %111 = vector.broadcast %cst_52 : f32 to vector<2x64xf32>
    %112 = arith.addf %111, %110 : vector<2x64xf32>
    %113 = arith.divf %111, %112 : vector<2x64xf32>
    %114 = vector.extract_strided_slice %105 {offsets = [0, 0], sizes = [2, 64], strides = [1, 1]} : vector<2x96xf32> to vector<2x64xf32>
    %115 = vector.extract_strided_slice %103 {offsets = [0, 0], sizes = [2, 64], strides = [1, 1]} : vector<2x96xf32> to vector<2x64xf32>
    %116 = arith.addf %114, %115 : vector<2x64xf32>
    %117 = arith.negf %116 : vector<2x64xf32>
    %118 = math.exp %117 : vector<2x64xf32>
    %cst_53 = arith.constant 1.000000e+00 : f32
    %119 = vector.broadcast %cst_53 : f32 to vector<2x64xf32>
    %120 = arith.addf %119, %118 : vector<2x64xf32>
    %121 = arith.divf %119, %120 : vector<2x64xf32>
    %122 = vector.extract_strided_slice %104 {offsets = [0, 64], sizes = [2, 32], strides = [1, 1]} : vector<2x96xf32> to vector<2x32xf32>
    %123 = vector.extract_strided_slice %113 {offsets = [0, 0], sizes = [2, 32], strides = [1, 1]} : vector<2x64xf32> to vector<2x32xf32>
    %124 = vector.extract_strided_slice %101 {offsets = [0, 64], sizes = [2, 32], strides = [1, 1]} : vector<2x96xf32> to vector<2x32xf32>
    %125 = arith.mulf %123, %124 : vector<2x32xf32>
    %126 = arith.addf %122, %125 : vector<2x32xf32>
    %127 = math.tanh %126 : vector<2x32xf32>
    %128 = vector.extract_strided_slice %105 {offsets = [0, 64], sizes = [2, 32], strides = [1, 1]} : vector<2x96xf32> to vector<2x32xf32>
    %129 = vector.extract_strided_slice %121 {offsets = [0, 0], sizes = [2, 32], strides = [1, 1]} : vector<2x64xf32> to vector<2x32xf32>
    %130 = vector.extract_strided_slice %103 {offsets = [0, 64], sizes = [2, 32], strides = [1, 1]} : vector<2x96xf32> to vector<2x32xf32>
    %131 = arith.mulf %129, %130 : vector<2x32xf32>
    %132 = arith.addf %128, %131 : vector<2x32xf32>
    %133 = math.tanh %132 : vector<2x32xf32>
    %134 = vector.extract_strided_slice %113 {offsets = [0, 32], sizes = [2, 32], strides = [1, 1]} : vector<2x64xf32> to vector<2x32xf32>
    %cst_54 = arith.constant 1.000000e+00 : f32
    %135 = vector.broadcast %cst_54 : f32 to vector<2x32xf32>
    %136 = arith.subf %135, %134 : vector<2x32xf32>
    %137 = arith.mulf %136, %127 : vector<2x32xf32>
    %138 = vector.extract_strided_slice %113 {offsets = [0, 32], sizes = [2, 32], strides = [1, 1]} : vector<2x64xf32> to vector<2x32xf32>
    %139 = arith.mulf %138, %88 : vector<2x32xf32>
    %140 = arith.addf %137, %139 : vector<2x32xf32>
    %141 = vector.extract_strided_slice %121 {offsets = [0, 32], sizes = [2, 32], strides = [1, 1]} : vector<2x64xf32> to vector<2x32xf32>
    %cst_55 = arith.constant 1.000000e+00 : f32
    %142 = vector.broadcast %cst_55 : f32 to vector<2x32xf32>
    %143 = arith.subf %142, %141 : vector<2x32xf32>
    %144 = arith.mulf %143, %133 : vector<2x32xf32>
    %145 = vector.extract_strided_slice %121 {offsets = [0, 32], sizes = [2, 32], strides = [1, 1]} : vector<2x64xf32> to vector<2x32xf32>
    %146 = arith.mulf %145, %93 : vector<2x32xf32>
    %147 = arith.addf %144, %146 : vector<2x32xf32>
    %148 = arith.mulf %97, %140 : vector<2x32xf32>
    %cst_56 = arith.constant 1.000000e+00 : f32
    %149 = vector.broadcast %cst_56 : f32 to vector<2x32xf32>
    %150 = arith.subf %149, %97 : vector<2x32xf32>
    %151 = arith.mulf %150, %88 : vector<2x32xf32>
    %152 = arith.addf %148, %151 : vector<2x32xf32>
    %153 = arith.mulf %99, %147 : vector<2x32xf32>
    %cst_57 = arith.constant 1.000000e+00 : f32
    %154 = vector.broadcast %cst_57 : f32 to vector<2x32xf32>
    %155 = arith.subf %154, %99 : vector<2x32xf32>
    %156 = arith.mulf %155, %93 : vector<2x32xf32>
    %157 = arith.addf %153, %156 : vector<2x32xf32>
    %158 = arith.mulf %97, %152 : vector<2x32xf32>
    %159 = arith.mulf %99, %157 : vector<2x32xf32>
    %160 = vector.extract_strided_slice %2 {offsets = [2, 0, 0], sizes = [1, 2, 32], strides = [1, 1, 1]} : vector<8x2x32xf32> to vector<1x2x32xf32>
    %161 = vector.shape_cast %160 : vector<1x2x32xf32> to vector<2x32xf32>
    %162 = vector.extract_strided_slice %2 {offsets = [5, 0, 0], sizes = [1, 2, 32], strides = [1, 1, 1]} : vector<8x2x32xf32> to vector<1x2x32xf32>
    %163 = vector.shape_cast %162 : vector<1x2x32xf32> to vector<2x32xf32>
    %cst_58 = arith.constant dense<0.000000e+00> : vector<2x96xf32>
    %164 = tpu.matmul %152, %4, %cst_58 {dimension_numbers = #tpu.dot_dimension_numbers<[1], [0], [0], [1], [0, 0, 1, 1], [], []>} : vector<2x32xf32>, vector<32x96xf32>, vector<2x96xf32> -> vector<2x96xf32>
    %165 = arith.addf %164, %5 : vector<2x96xf32>
    %cst_59 = arith.constant dense<0.000000e+00> : vector<2x96xf32>
    %166 = tpu.matmul %157, %6, %cst_59 {dimension_numbers = #tpu.dot_dimension_numbers<[1], [0], [0], [1], [0, 0, 1, 1], [], []>} : vector<2x32xf32>, vector<32x96xf32>, vector<2x96xf32> -> vector<2x96xf32>
    %167 = arith.addf %166, %7 : vector<2x96xf32>
    %168 = vector.extract_strided_slice %19 {offsets = [4, 0], sizes = [2, 96], strides = [1, 1]} : vector<16x96xf32> to vector<2x96xf32>
    %169 = vector.extract_strided_slice %24 {offsets = [10, 0], sizes = [2, 96], strides = [1, 1]} : vector<16x96xf32> to vector<2x96xf32>
    %170 = vector.extract_strided_slice %168 {offsets = [0, 0], sizes = [2, 64], strides = [1, 1]} : vector<2x96xf32> to vector<2x64xf32>
    %171 = vector.extract_strided_slice %165 {offsets = [0, 0], sizes = [2, 64], strides = [1, 1]} : vector<2x96xf32> to vector<2x64xf32>
    %172 = arith.addf %170, %171 : vector<2x64xf32>
    %173 = arith.negf %172 : vector<2x64xf32>
    %174 = math.exp %173 : vector<2x64xf32>
    %cst_60 = arith.constant 1.000000e+00 : f32
    %175 = vector.broadcast %cst_60 : f32 to vector<2x64xf32>
    %176 = arith.addf %175, %174 : vector<2x64xf32>
    %177 = arith.divf %175, %176 : vector<2x64xf32>
    %178 = vector.extract_strided_slice %169 {offsets = [0, 0], sizes = [2, 64], strides = [1, 1]} : vector<2x96xf32> to vector<2x64xf32>
    %179 = vector.extract_strided_slice %167 {offsets = [0, 0], sizes = [2, 64], strides = [1, 1]} : vector<2x96xf32> to vector<2x64xf32>
    %180 = arith.addf %178, %179 : vector<2x64xf32>
    %181 = arith.negf %180 : vector<2x64xf32>
    %182 = math.exp %181 : vector<2x64xf32>
    %cst_61 = arith.constant 1.000000e+00 : f32
    %183 = vector.broadcast %cst_61 : f32 to vector<2x64xf32>
    %184 = arith.addf %183, %182 : vector<2x64xf32>
    %185 = arith.divf %183, %184 : vector<2x64xf32>
    %186 = vector.extract_strided_slice %168 {offsets = [0, 64], sizes = [2, 32], strides = [1, 1]} : vector<2x96xf32> to vector<2x32xf32>
    %187 = vector.extract_strided_slice %177 {offsets = [0, 0], sizes = [2, 32], strides = [1, 1]} : vector<2x64xf32> to vector<2x32xf32>
    %188 = vector.extract_strided_slice %165 {offsets = [0, 64], sizes = [2, 32], strides = [1, 1]} : vector<2x96xf32> to vector<2x32xf32>
    %189 = arith.mulf %187, %188 : vector<2x32xf32>
    %190 = arith.addf %186, %189 : vector<2x32xf32>
    %191 = math.tanh %190 : vector<2x32xf32>
    %192 = vector.extract_strided_slice %169 {offsets = [0, 64], sizes = [2, 32], strides = [1, 1]} : vector<2x96xf32> to vector<2x32xf32>
    %193 = vector.extract_strided_slice %185 {offsets = [0, 0], sizes = [2, 32], strides = [1, 1]} : vector<2x64xf32> to vector<2x32xf32>
    %194 = vector.extract_strided_slice %167 {offsets = [0, 64], sizes = [2, 32], strides = [1, 1]} : vector<2x96xf32> to vector<2x32xf32>
    %195 = arith.mulf %193, %194 : vector<2x32xf32>
    %196 = arith.addf %192, %195 : vector<2x32xf32>
    %197 = math.tanh %196 : vector<2x32xf32>
    %198 = vector.extract_strided_slice %177 {offsets = [0, 32], sizes = [2, 32], strides = [1, 1]} : vector<2x64xf32> to vector<2x32xf32>
    %cst_62 = arith.constant 1.000000e+00 : f32
    %199 = vector.broadcast %cst_62 : f32 to vector<2x32xf32>
    %200 = arith.subf %199, %198 : vector<2x32xf32>
    %201 = arith.mulf %200, %191 : vector<2x32xf32>
    %202 = vector.extract_strided_slice %177 {offsets = [0, 32], sizes = [2, 32], strides = [1, 1]} : vector<2x64xf32> to vector<2x32xf32>
    %203 = arith.mulf %202, %152 : vector<2x32xf32>
    %204 = arith.addf %201, %203 : vector<2x32xf32>
    %205 = vector.extract_strided_slice %185 {offsets = [0, 32], sizes = [2, 32], strides = [1, 1]} : vector<2x64xf32> to vector<2x32xf32>
    %cst_63 = arith.constant 1.000000e+00 : f32
    %206 = vector.broadcast %cst_63 : f32 to vector<2x32xf32>
    %207 = arith.subf %206, %205 : vector<2x32xf32>
    %208 = arith.mulf %207, %197 : vector<2x32xf32>
    %209 = vector.extract_strided_slice %185 {offsets = [0, 32], sizes = [2, 32], strides = [1, 1]} : vector<2x64xf32> to vector<2x32xf32>
    %210 = arith.mulf %209, %157 : vector<2x32xf32>
    %211 = arith.addf %208, %210 : vector<2x32xf32>
    %212 = arith.mulf %161, %204 : vector<2x32xf32>
    %cst_64 = arith.constant 1.000000e+00 : f32
    %213 = vector.broadcast %cst_64 : f32 to vector<2x32xf32>
    %214 = arith.subf %213, %161 : vector<2x32xf32>
    %215 = arith.mulf %214, %152 : vector<2x32xf32>
    %216 = arith.addf %212, %215 : vector<2x32xf32>
    %217 = arith.mulf %163, %211 : vector<2x32xf32>
    %cst_65 = arith.constant 1.000000e+00 : f32
    %218 = vector.broadcast %cst_65 : f32 to vector<2x32xf32>
    %219 = arith.subf %218, %163 : vector<2x32xf32>
    %220 = arith.mulf %219, %157 : vector<2x32xf32>
    %221 = arith.addf %217, %220 : vector<2x32xf32>
    %222 = arith.mulf %161, %216 : vector<2x32xf32>
    %223 = arith.mulf %163, %221 : vector<2x32xf32>
    %224 = vector.extract_strided_slice %2 {offsets = [3, 0, 0], sizes = [1, 2, 32], strides = [1, 1, 1]} : vector<8x2x32xf32> to vector<1x2x32xf32>
    %225 = vector.shape_cast %224 : vector<1x2x32xf32> to vector<2x32xf32>
    %226 = vector.extract_strided_slice %2 {offsets = [4, 0, 0], sizes = [1, 2, 32], strides = [1, 1, 1]} : vector<8x2x32xf32> to vector<1x2x32xf32>
    %227 = vector.shape_cast %226 : vector<1x2x32xf32> to vector<2x32xf32>
    %cst_66 = arith.constant dense<0.000000e+00> : vector<2x96xf32>
    %228 = tpu.matmul %216, %4, %cst_66 {dimension_numbers = #tpu.dot_dimension_numbers<[1], [0], [0], [1], [0, 0, 1, 1], [], []>} : vector<2x32xf32>, vector<32x96xf32>, vector<2x96xf32> -> vector<2x96xf32>
    %229 = arith.addf %228, %5 : vector<2x96xf32>
    %cst_67 = arith.constant dense<0.000000e+00> : vector<2x96xf32>
    %230 = tpu.matmul %221, %6, %cst_67 {dimension_numbers = #tpu.dot_dimension_numbers<[1], [0], [0], [1], [0, 0, 1, 1], [], []>} : vector<2x32xf32>, vector<32x96xf32>, vector<2x96xf32> -> vector<2x96xf32>
    %231 = arith.addf %230, %7 : vector<2x96xf32>
    %232 = vector.extract_strided_slice %19 {offsets = [6, 0], sizes = [2, 96], strides = [1, 1]} : vector<16x96xf32> to vector<2x96xf32>
    %233 = vector.extract_strided_slice %24 {offsets = [8, 0], sizes = [2, 96], strides = [1, 1]} : vector<16x96xf32> to vector<2x96xf32>
    %234 = vector.extract_strided_slice %232 {offsets = [0, 0], sizes = [2, 64], strides = [1, 1]} : vector<2x96xf32> to vector<2x64xf32>
    %235 = vector.extract_strided_slice %229 {offsets = [0, 0], sizes = [2, 64], strides = [1, 1]} : vector<2x96xf32> to vector<2x64xf32>
    %236 = arith.addf %234, %235 : vector<2x64xf32>
    %237 = arith.negf %236 : vector<2x64xf32>
    %238 = math.exp %237 : vector<2x64xf32>
    %cst_68 = arith.constant 1.000000e+00 : f32
    %239 = vector.broadcast %cst_68 : f32 to vector<2x64xf32>
    %240 = arith.addf %239, %238 : vector<2x64xf32>
    %241 = arith.divf %239, %240 : vector<2x64xf32>
    %242 = vector.extract_strided_slice %233 {offsets = [0, 0], sizes = [2, 64], strides = [1, 1]} : vector<2x96xf32> to vector<2x64xf32>
    %243 = vector.extract_strided_slice %231 {offsets = [0, 0], sizes = [2, 64], strides = [1, 1]} : vector<2x96xf32> to vector<2x64xf32>
    %244 = arith.addf %242, %243 : vector<2x64xf32>
    %245 = arith.negf %244 : vector<2x64xf32>
    %246 = math.exp %245 : vector<2x64xf32>
    %cst_69 = arith.constant 1.000000e+00 : f32
    %247 = vector.broadcast %cst_69 : f32 to vector<2x64xf32>
    %248 = arith.addf %247, %246 : vector<2x64xf32>
    %249 = arith.divf %247, %248 : vector<2x64xf32>
    %250 = vector.extract_strided_slice %232 {offsets = [0, 64], sizes = [2, 32], strides = [1, 1]} : vector<2x96xf32> to vector<2x32xf32>
    %251 = vector.extract_strided_slice %241 {offsets = [0, 0], sizes = [2, 32], strides = [1, 1]} : vector<2x64xf32> to vector<2x32xf32>
    %252 = vector.extract_strided_slice %229 {offsets = [0, 64], sizes = [2, 32], strides = [1, 1]} : vector<2x96xf32> to vector<2x32xf32>
    %253 = arith.mulf %251, %252 : vector<2x32xf32>
    %254 = arith.addf %250, %253 : vector<2x32xf32>
    %255 = math.tanh %254 : vector<2x32xf32>
    %256 = vector.extract_strided_slice %233 {offsets = [0, 64], sizes = [2, 32], strides = [1, 1]} : vector<2x96xf32> to vector<2x32xf32>
    %257 = vector.extract_strided_slice %249 {offsets = [0, 0], sizes = [2, 32], strides = [1, 1]} : vector<2x64xf32> to vector<2x32xf32>
    %258 = vector.extract_strided_slice %231 {offsets = [0, 64], sizes = [2, 32], strides = [1, 1]} : vector<2x96xf32> to vector<2x32xf32>
    %259 = arith.mulf %257, %258 : vector<2x32xf32>
    %260 = arith.addf %256, %259 : vector<2x32xf32>
    %261 = math.tanh %260 : vector<2x32xf32>
    %262 = vector.extract_strided_slice %241 {offsets = [0, 32], sizes = [2, 32], strides = [1, 1]} : vector<2x64xf32> to vector<2x32xf32>
    %cst_70 = arith.constant 1.000000e+00 : f32
    %263 = vector.broadcast %cst_70 : f32 to vector<2x32xf32>
    %264 = arith.subf %263, %262 : vector<2x32xf32>
    %265 = arith.mulf %264, %255 : vector<2x32xf32>
    %266 = vector.extract_strided_slice %241 {offsets = [0, 32], sizes = [2, 32], strides = [1, 1]} : vector<2x64xf32> to vector<2x32xf32>
    %267 = arith.mulf %266, %216 : vector<2x32xf32>
    %268 = arith.addf %265, %267 : vector<2x32xf32>
    %269 = vector.extract_strided_slice %249 {offsets = [0, 32], sizes = [2, 32], strides = [1, 1]} : vector<2x64xf32> to vector<2x32xf32>
    %cst_71 = arith.constant 1.000000e+00 : f32
    %270 = vector.broadcast %cst_71 : f32 to vector<2x32xf32>
    %271 = arith.subf %270, %269 : vector<2x32xf32>
    %272 = arith.mulf %271, %261 : vector<2x32xf32>
    %273 = vector.extract_strided_slice %249 {offsets = [0, 32], sizes = [2, 32], strides = [1, 1]} : vector<2x64xf32> to vector<2x32xf32>
    %274 = arith.mulf %273, %221 : vector<2x32xf32>
    %275 = arith.addf %272, %274 : vector<2x32xf32>
    %276 = arith.mulf %225, %268 : vector<2x32xf32>
    %cst_72 = arith.constant 1.000000e+00 : f32
    %277 = vector.broadcast %cst_72 : f32 to vector<2x32xf32>
    %278 = arith.subf %277, %225 : vector<2x32xf32>
    %279 = arith.mulf %278, %216 : vector<2x32xf32>
    %280 = arith.addf %276, %279 : vector<2x32xf32>
    %281 = arith.mulf %227, %275 : vector<2x32xf32>
    %cst_73 = arith.constant 1.000000e+00 : f32
    %282 = vector.broadcast %cst_73 : f32 to vector<2x32xf32>
    %283 = arith.subf %282, %227 : vector<2x32xf32>
    %284 = arith.mulf %283, %221 : vector<2x32xf32>
    %285 = arith.addf %281, %284 : vector<2x32xf32>
    %286 = arith.mulf %225, %280 : vector<2x32xf32>
    %287 = arith.mulf %227, %285 : vector<2x32xf32>
    %288 = vector.extract_strided_slice %2 {offsets = [4, 0, 0], sizes = [1, 2, 32], strides = [1, 1, 1]} : vector<8x2x32xf32> to vector<1x2x32xf32>
    %289 = vector.shape_cast %288 : vector<1x2x32xf32> to vector<2x32xf32>
    %290 = vector.extract_strided_slice %2 {offsets = [3, 0, 0], sizes = [1, 2, 32], strides = [1, 1, 1]} : vector<8x2x32xf32> to vector<1x2x32xf32>
    %291 = vector.shape_cast %290 : vector<1x2x32xf32> to vector<2x32xf32>
    %cst_74 = arith.constant dense<0.000000e+00> : vector<2x96xf32>
    %292 = tpu.matmul %280, %4, %cst_74 {dimension_numbers = #tpu.dot_dimension_numbers<[1], [0], [0], [1], [0, 0, 1, 1], [], []>} : vector<2x32xf32>, vector<32x96xf32>, vector<2x96xf32> -> vector<2x96xf32>
    %293 = arith.addf %292, %5 : vector<2x96xf32>
    %cst_75 = arith.constant dense<0.000000e+00> : vector<2x96xf32>
    %294 = tpu.matmul %285, %6, %cst_75 {dimension_numbers = #tpu.dot_dimension_numbers<[1], [0], [0], [1], [0, 0, 1, 1], [], []>} : vector<2x32xf32>, vector<32x96xf32>, vector<2x96xf32> -> vector<2x96xf32>
    %295 = arith.addf %294, %7 : vector<2x96xf32>
    %296 = vector.extract_strided_slice %19 {offsets = [8, 0], sizes = [2, 96], strides = [1, 1]} : vector<16x96xf32> to vector<2x96xf32>
    %297 = vector.extract_strided_slice %24 {offsets = [6, 0], sizes = [2, 96], strides = [1, 1]} : vector<16x96xf32> to vector<2x96xf32>
    %298 = vector.extract_strided_slice %296 {offsets = [0, 0], sizes = [2, 64], strides = [1, 1]} : vector<2x96xf32> to vector<2x64xf32>
    %299 = vector.extract_strided_slice %293 {offsets = [0, 0], sizes = [2, 64], strides = [1, 1]} : vector<2x96xf32> to vector<2x64xf32>
    %300 = arith.addf %298, %299 : vector<2x64xf32>
    %301 = arith.negf %300 : vector<2x64xf32>
    %302 = math.exp %301 : vector<2x64xf32>
    %cst_76 = arith.constant 1.000000e+00 : f32
    %303 = vector.broadcast %cst_76 : f32 to vector<2x64xf32>
    %304 = arith.addf %303, %302 : vector<2x64xf32>
    %305 = arith.divf %303, %304 : vector<2x64xf32>
    %306 = vector.extract_strided_slice %297 {offsets = [0, 0], sizes = [2, 64], strides = [1, 1]} : vector<2x96xf32> to vector<2x64xf32>
    %307 = vector.extract_strided_slice %295 {offsets = [0, 0], sizes = [2, 64], strides = [1, 1]} : vector<2x96xf32> to vector<2x64xf32>
    %308 = arith.addf %306, %307 : vector<2x64xf32>
    %309 = arith.negf %308 : vector<2x64xf32>
    %310 = math.exp %309 : vector<2x64xf32>
    %cst_77 = arith.constant 1.000000e+00 : f32
    %311 = vector.broadcast %cst_77 : f32 to vector<2x64xf32>
    %312 = arith.addf %311, %310 : vector<2x64xf32>
    %313 = arith.divf %311, %312 : vector<2x64xf32>
    %314 = vector.extract_strided_slice %296 {offsets = [0, 64], sizes = [2, 32], strides = [1, 1]} : vector<2x96xf32> to vector<2x32xf32>
    %315 = vector.extract_strided_slice %305 {offsets = [0, 0], sizes = [2, 32], strides = [1, 1]} : vector<2x64xf32> to vector<2x32xf32>
    %316 = vector.extract_strided_slice %293 {offsets = [0, 64], sizes = [2, 32], strides = [1, 1]} : vector<2x96xf32> to vector<2x32xf32>
    %317 = arith.mulf %315, %316 : vector<2x32xf32>
    %318 = arith.addf %314, %317 : vector<2x32xf32>
    %319 = math.tanh %318 : vector<2x32xf32>
    %320 = vector.extract_strided_slice %297 {offsets = [0, 64], sizes = [2, 32], strides = [1, 1]} : vector<2x96xf32> to vector<2x32xf32>
    %321 = vector.extract_strided_slice %313 {offsets = [0, 0], sizes = [2, 32], strides = [1, 1]} : vector<2x64xf32> to vector<2x32xf32>
    %322 = vector.extract_strided_slice %295 {offsets = [0, 64], sizes = [2, 32], strides = [1, 1]} : vector<2x96xf32> to vector<2x32xf32>
    %323 = arith.mulf %321, %322 : vector<2x32xf32>
    %324 = arith.addf %320, %323 : vector<2x32xf32>
    %325 = math.tanh %324 : vector<2x32xf32>
    %326 = vector.extract_strided_slice %305 {offsets = [0, 32], sizes = [2, 32], strides = [1, 1]} : vector<2x64xf32> to vector<2x32xf32>
    %cst_78 = arith.constant 1.000000e+00 : f32
    %327 = vector.broadcast %cst_78 : f32 to vector<2x32xf32>
    %328 = arith.subf %327, %326 : vector<2x32xf32>
    %329 = arith.mulf %328, %319 : vector<2x32xf32>
    %330 = vector.extract_strided_slice %305 {offsets = [0, 32], sizes = [2, 32], strides = [1, 1]} : vector<2x64xf32> to vector<2x32xf32>
    %331 = arith.mulf %330, %280 : vector<2x32xf32>
    %332 = arith.addf %329, %331 : vector<2x32xf32>
    %333 = vector.extract_strided_slice %313 {offsets = [0, 32], sizes = [2, 32], strides = [1, 1]} : vector<2x64xf32> to vector<2x32xf32>
    %cst_79 = arith.constant 1.000000e+00 : f32
    %334 = vector.broadcast %cst_79 : f32 to vector<2x32xf32>
    %335 = arith.subf %334, %333 : vector<2x32xf32>
    %336 = arith.mulf %335, %325 : vector<2x32xf32>
    %337 = vector.extract_strided_slice %313 {offsets = [0, 32], sizes = [2, 32], strides = [1, 1]} : vector<2x64xf32> to vector<2x32xf32>
    %338 = arith.mulf %337, %285 : vector<2x32xf32>
    %339 = arith.addf %336, %338 : vector<2x32xf32>
    %340 = arith.mulf %289, %332 : vector<2x32xf32>
    %cst_80 = arith.constant 1.000000e+00 : f32
    %341 = vector.broadcast %cst_80 : f32 to vector<2x32xf32>
    %342 = arith.subf %341, %289 : vector<2x32xf32>
    %343 = arith.mulf %342, %280 : vector<2x32xf32>
    %344 = arith.addf %340, %343 : vector<2x32xf32>
    %345 = arith.mulf %291, %339 : vector<2x32xf32>
    %cst_81 = arith.constant 1.000000e+00 : f32
    %346 = vector.broadcast %cst_81 : f32 to vector<2x32xf32>
    %347 = arith.subf %346, %291 : vector<2x32xf32>
    %348 = arith.mulf %347, %285 : vector<2x32xf32>
    %349 = arith.addf %345, %348 : vector<2x32xf32>
    %350 = arith.mulf %289, %344 : vector<2x32xf32>
    %351 = arith.mulf %291, %349 : vector<2x32xf32>
    %352 = vector.extract_strided_slice %2 {offsets = [5, 0, 0], sizes = [1, 2, 32], strides = [1, 1, 1]} : vector<8x2x32xf32> to vector<1x2x32xf32>
    %353 = vector.shape_cast %352 : vector<1x2x32xf32> to vector<2x32xf32>
    %354 = vector.extract_strided_slice %2 {offsets = [2, 0, 0], sizes = [1, 2, 32], strides = [1, 1, 1]} : vector<8x2x32xf32> to vector<1x2x32xf32>
    %355 = vector.shape_cast %354 : vector<1x2x32xf32> to vector<2x32xf32>
    %cst_82 = arith.constant dense<0.000000e+00> : vector<2x96xf32>
    %356 = tpu.matmul %344, %4, %cst_82 {dimension_numbers = #tpu.dot_dimension_numbers<[1], [0], [0], [1], [0, 0, 1, 1], [], []>} : vector<2x32xf32>, vector<32x96xf32>, vector<2x96xf32> -> vector<2x96xf32>
    %357 = arith.addf %356, %5 : vector<2x96xf32>
    %cst_83 = arith.constant dense<0.000000e+00> : vector<2x96xf32>
    %358 = tpu.matmul %349, %6, %cst_83 {dimension_numbers = #tpu.dot_dimension_numbers<[1], [0], [0], [1], [0, 0, 1, 1], [], []>} : vector<2x32xf32>, vector<32x96xf32>, vector<2x96xf32> -> vector<2x96xf32>
    %359 = arith.addf %358, %7 : vector<2x96xf32>
    %360 = vector.extract_strided_slice %19 {offsets = [10, 0], sizes = [2, 96], strides = [1, 1]} : vector<16x96xf32> to vector<2x96xf32>
    %361 = vector.extract_strided_slice %24 {offsets = [4, 0], sizes = [2, 96], strides = [1, 1]} : vector<16x96xf32> to vector<2x96xf32>
    %362 = vector.extract_strided_slice %360 {offsets = [0, 0], sizes = [2, 64], strides = [1, 1]} : vector<2x96xf32> to vector<2x64xf32>
    %363 = vector.extract_strided_slice %357 {offsets = [0, 0], sizes = [2, 64], strides = [1, 1]} : vector<2x96xf32> to vector<2x64xf32>
    %364 = arith.addf %362, %363 : vector<2x64xf32>
    %365 = arith.negf %364 : vector<2x64xf32>
    %366 = math.exp %365 : vector<2x64xf32>
    %cst_84 = arith.constant 1.000000e+00 : f32
    %367 = vector.broadcast %cst_84 : f32 to vector<2x64xf32>
    %368 = arith.addf %367, %366 : vector<2x64xf32>
    %369 = arith.divf %367, %368 : vector<2x64xf32>
    %370 = vector.extract_strided_slice %361 {offsets = [0, 0], sizes = [2, 64], strides = [1, 1]} : vector<2x96xf32> to vector<2x64xf32>
    %371 = vector.extract_strided_slice %359 {offsets = [0, 0], sizes = [2, 64], strides = [1, 1]} : vector<2x96xf32> to vector<2x64xf32>
    %372 = arith.addf %370, %371 : vector<2x64xf32>
    %373 = arith.negf %372 : vector<2x64xf32>
    %374 = math.exp %373 : vector<2x64xf32>
    %cst_85 = arith.constant 1.000000e+00 : f32
    %375 = vector.broadcast %cst_85 : f32 to vector<2x64xf32>
    %376 = arith.addf %375, %374 : vector<2x64xf32>
    %377 = arith.divf %375, %376 : vector<2x64xf32>
    %378 = vector.extract_strided_slice %360 {offsets = [0, 64], sizes = [2, 32], strides = [1, 1]} : vector<2x96xf32> to vector<2x32xf32>
    %379 = vector.extract_strided_slice %369 {offsets = [0, 0], sizes = [2, 32], strides = [1, 1]} : vector<2x64xf32> to vector<2x32xf32>
    %380 = vector.extract_strided_slice %357 {offsets = [0, 64], sizes = [2, 32], strides = [1, 1]} : vector<2x96xf32> to vector<2x32xf32>
    %381 = arith.mulf %379, %380 : vector<2x32xf32>
    %382 = arith.addf %378, %381 : vector<2x32xf32>
    %383 = math.tanh %382 : vector<2x32xf32>
    %384 = vector.extract_strided_slice %361 {offsets = [0, 64], sizes = [2, 32], strides = [1, 1]} : vector<2x96xf32> to vector<2x32xf32>
    %385 = vector.extract_strided_slice %377 {offsets = [0, 0], sizes = [2, 32], strides = [1, 1]} : vector<2x64xf32> to vector<2x32xf32>
    %386 = vector.extract_strided_slice %359 {offsets = [0, 64], sizes = [2, 32], strides = [1, 1]} : vector<2x96xf32> to vector<2x32xf32>
    %387 = arith.mulf %385, %386 : vector<2x32xf32>
    %388 = arith.addf %384, %387 : vector<2x32xf32>
    %389 = math.tanh %388 : vector<2x32xf32>
    %390 = vector.extract_strided_slice %369 {offsets = [0, 32], sizes = [2, 32], strides = [1, 1]} : vector<2x64xf32> to vector<2x32xf32>
    %cst_86 = arith.constant 1.000000e+00 : f32
    %391 = vector.broadcast %cst_86 : f32 to vector<2x32xf32>
    %392 = arith.subf %391, %390 : vector<2x32xf32>
    %393 = arith.mulf %392, %383 : vector<2x32xf32>
    %394 = vector.extract_strided_slice %369 {offsets = [0, 32], sizes = [2, 32], strides = [1, 1]} : vector<2x64xf32> to vector<2x32xf32>
    %395 = arith.mulf %394, %344 : vector<2x32xf32>
    %396 = arith.addf %393, %395 : vector<2x32xf32>
    %397 = vector.extract_strided_slice %377 {offsets = [0, 32], sizes = [2, 32], strides = [1, 1]} : vector<2x64xf32> to vector<2x32xf32>
    %cst_87 = arith.constant 1.000000e+00 : f32
    %398 = vector.broadcast %cst_87 : f32 to vector<2x32xf32>
    %399 = arith.subf %398, %397 : vector<2x32xf32>
    %400 = arith.mulf %399, %389 : vector<2x32xf32>
    %401 = vector.extract_strided_slice %377 {offsets = [0, 32], sizes = [2, 32], strides = [1, 1]} : vector<2x64xf32> to vector<2x32xf32>
    %402 = arith.mulf %401, %349 : vector<2x32xf32>
    %403 = arith.addf %400, %402 : vector<2x32xf32>
    %404 = arith.mulf %353, %396 : vector<2x32xf32>
    %cst_88 = arith.constant 1.000000e+00 : f32
    %405 = vector.broadcast %cst_88 : f32 to vector<2x32xf32>
    %406 = arith.subf %405, %353 : vector<2x32xf32>
    %407 = arith.mulf %406, %344 : vector<2x32xf32>
    %408 = arith.addf %404, %407 : vector<2x32xf32>
    %409 = arith.mulf %355, %403 : vector<2x32xf32>
    %cst_89 = arith.constant 1.000000e+00 : f32
    %410 = vector.broadcast %cst_89 : f32 to vector<2x32xf32>
    %411 = arith.subf %410, %355 : vector<2x32xf32>
    %412 = arith.mulf %411, %349 : vector<2x32xf32>
    %413 = arith.addf %409, %412 : vector<2x32xf32>
    %414 = arith.mulf %353, %408 : vector<2x32xf32>
    %415 = arith.mulf %355, %413 : vector<2x32xf32>
    %416 = vector.extract_strided_slice %2 {offsets = [6, 0, 0], sizes = [1, 2, 32], strides = [1, 1, 1]} : vector<8x2x32xf32> to vector<1x2x32xf32>
    %417 = vector.shape_cast %416 : vector<1x2x32xf32> to vector<2x32xf32>
    %418 = vector.extract_strided_slice %2 {offsets = [1, 0, 0], sizes = [1, 2, 32], strides = [1, 1, 1]} : vector<8x2x32xf32> to vector<1x2x32xf32>
    %419 = vector.shape_cast %418 : vector<1x2x32xf32> to vector<2x32xf32>
    %cst_90 = arith.constant dense<0.000000e+00> : vector<2x96xf32>
    %420 = tpu.matmul %408, %4, %cst_90 {dimension_numbers = #tpu.dot_dimension_numbers<[1], [0], [0], [1], [0, 0, 1, 1], [], []>} : vector<2x32xf32>, vector<32x96xf32>, vector<2x96xf32> -> vector<2x96xf32>
    %421 = arith.addf %420, %5 : vector<2x96xf32>
    %cst_91 = arith.constant dense<0.000000e+00> : vector<2x96xf32>
    %422 = tpu.matmul %413, %6, %cst_91 {dimension_numbers = #tpu.dot_dimension_numbers<[1], [0], [0], [1], [0, 0, 1, 1], [], []>} : vector<2x32xf32>, vector<32x96xf32>, vector<2x96xf32> -> vector<2x96xf32>
    %423 = arith.addf %422, %7 : vector<2x96xf32>
    %424 = vector.extract_strided_slice %19 {offsets = [12, 0], sizes = [2, 96], strides = [1, 1]} : vector<16x96xf32> to vector<2x96xf32>
    %425 = vector.extract_strided_slice %24 {offsets = [2, 0], sizes = [2, 96], strides = [1, 1]} : vector<16x96xf32> to vector<2x96xf32>
    %426 = vector.extract_strided_slice %424 {offsets = [0, 0], sizes = [2, 64], strides = [1, 1]} : vector<2x96xf32> to vector<2x64xf32>
    %427 = vector.extract_strided_slice %421 {offsets = [0, 0], sizes = [2, 64], strides = [1, 1]} : vector<2x96xf32> to vector<2x64xf32>
    %428 = arith.addf %426, %427 : vector<2x64xf32>
    %429 = arith.negf %428 : vector<2x64xf32>
    %430 = math.exp %429 : vector<2x64xf32>
    %cst_92 = arith.constant 1.000000e+00 : f32
    %431 = vector.broadcast %cst_92 : f32 to vector<2x64xf32>
    %432 = arith.addf %431, %430 : vector<2x64xf32>
    %433 = arith.divf %431, %432 : vector<2x64xf32>
    %434 = vector.extract_strided_slice %425 {offsets = [0, 0], sizes = [2, 64], strides = [1, 1]} : vector<2x96xf32> to vector<2x64xf32>
    %435 = vector.extract_strided_slice %423 {offsets = [0, 0], sizes = [2, 64], strides = [1, 1]} : vector<2x96xf32> to vector<2x64xf32>
    %436 = arith.addf %434, %435 : vector<2x64xf32>
    %437 = arith.negf %436 : vector<2x64xf32>
    %438 = math.exp %437 : vector<2x64xf32>
    %cst_93 = arith.constant 1.000000e+00 : f32
    %439 = vector.broadcast %cst_93 : f32 to vector<2x64xf32>
    %440 = arith.addf %439, %438 : vector<2x64xf32>
    %441 = arith.divf %439, %440 : vector<2x64xf32>
    %442 = vector.extract_strided_slice %424 {offsets = [0, 64], sizes = [2, 32], strides = [1, 1]} : vector<2x96xf32> to vector<2x32xf32>
    %443 = vector.extract_strided_slice %433 {offsets = [0, 0], sizes = [2, 32], strides = [1, 1]} : vector<2x64xf32> to vector<2x32xf32>
    %444 = vector.extract_strided_slice %421 {offsets = [0, 64], sizes = [2, 32], strides = [1, 1]} : vector<2x96xf32> to vector<2x32xf32>
    %445 = arith.mulf %443, %444 : vector<2x32xf32>
    %446 = arith.addf %442, %445 : vector<2x32xf32>
    %447 = math.tanh %446 : vector<2x32xf32>
    %448 = vector.extract_strided_slice %425 {offsets = [0, 64], sizes = [2, 32], strides = [1, 1]} : vector<2x96xf32> to vector<2x32xf32>
    %449 = vector.extract_strided_slice %441 {offsets = [0, 0], sizes = [2, 32], strides = [1, 1]} : vector<2x64xf32> to vector<2x32xf32>
    %450 = vector.extract_strided_slice %423 {offsets = [0, 64], sizes = [2, 32], strides = [1, 1]} : vector<2x96xf32> to vector<2x32xf32>
    %451 = arith.mulf %449, %450 : vector<2x32xf32>
    %452 = arith.addf %448, %451 : vector<2x32xf32>
    %453 = math.tanh %452 : vector<2x32xf32>
    %454 = vector.extract_strided_slice %433 {offsets = [0, 32], sizes = [2, 32], strides = [1, 1]} : vector<2x64xf32> to vector<2x32xf32>
    %cst_94 = arith.constant 1.000000e+00 : f32
    %455 = vector.broadcast %cst_94 : f32 to vector<2x32xf32>
    %456 = arith.subf %455, %454 : vector<2x32xf32>
    %457 = arith.mulf %456, %447 : vector<2x32xf32>
    %458 = vector.extract_strided_slice %433 {offsets = [0, 32], sizes = [2, 32], strides = [1, 1]} : vector<2x64xf32> to vector<2x32xf32>
    %459 = arith.mulf %458, %408 : vector<2x32xf32>
    %460 = arith.addf %457, %459 : vector<2x32xf32>
    %461 = vector.extract_strided_slice %441 {offsets = [0, 32], sizes = [2, 32], strides = [1, 1]} : vector<2x64xf32> to vector<2x32xf32>
    %cst_95 = arith.constant 1.000000e+00 : f32
    %462 = vector.broadcast %cst_95 : f32 to vector<2x32xf32>
    %463 = arith.subf %462, %461 : vector<2x32xf32>
    %464 = arith.mulf %463, %453 : vector<2x32xf32>
    %465 = vector.extract_strided_slice %441 {offsets = [0, 32], sizes = [2, 32], strides = [1, 1]} : vector<2x64xf32> to vector<2x32xf32>
    %466 = arith.mulf %465, %413 : vector<2x32xf32>
    %467 = arith.addf %464, %466 : vector<2x32xf32>
    %468 = arith.mulf %417, %460 : vector<2x32xf32>
    %cst_96 = arith.constant 1.000000e+00 : f32
    %469 = vector.broadcast %cst_96 : f32 to vector<2x32xf32>
    %470 = arith.subf %469, %417 : vector<2x32xf32>
    %471 = arith.mulf %470, %408 : vector<2x32xf32>
    %472 = arith.addf %468, %471 : vector<2x32xf32>
    %473 = arith.mulf %419, %467 : vector<2x32xf32>
    %cst_97 = arith.constant 1.000000e+00 : f32
    %474 = vector.broadcast %cst_97 : f32 to vector<2x32xf32>
    %475 = arith.subf %474, %419 : vector<2x32xf32>
    %476 = arith.mulf %475, %413 : vector<2x32xf32>
    %477 = arith.addf %473, %476 : vector<2x32xf32>
    %478 = arith.mulf %417, %472 : vector<2x32xf32>
    %479 = arith.mulf %419, %477 : vector<2x32xf32>
    %480 = vector.extract_strided_slice %2 {offsets = [7, 0, 0], sizes = [1, 2, 32], strides = [1, 1, 1]} : vector<8x2x32xf32> to vector<1x2x32xf32>
    %481 = vector.shape_cast %480 : vector<1x2x32xf32> to vector<2x32xf32>
    %482 = vector.extract_strided_slice %2 {offsets = [0, 0, 0], sizes = [1, 2, 32], strides = [1, 1, 1]} : vector<8x2x32xf32> to vector<1x2x32xf32>
    %483 = vector.shape_cast %482 : vector<1x2x32xf32> to vector<2x32xf32>
    %cst_98 = arith.constant dense<0.000000e+00> : vector<2x96xf32>
    %484 = tpu.matmul %472, %4, %cst_98 {dimension_numbers = #tpu.dot_dimension_numbers<[1], [0], [0], [1], [0, 0, 1, 1], [], []>} : vector<2x32xf32>, vector<32x96xf32>, vector<2x96xf32> -> vector<2x96xf32>
    %485 = arith.addf %484, %5 : vector<2x96xf32>
    %cst_99 = arith.constant dense<0.000000e+00> : vector<2x96xf32>
    %486 = tpu.matmul %477, %6, %cst_99 {dimension_numbers = #tpu.dot_dimension_numbers<[1], [0], [0], [1], [0, 0, 1, 1], [], []>} : vector<2x32xf32>, vector<32x96xf32>, vector<2x96xf32> -> vector<2x96xf32>
    %487 = arith.addf %486, %7 : vector<2x96xf32>
    %488 = vector.extract_strided_slice %19 {offsets = [14, 0], sizes = [2, 96], strides = [1, 1]} : vector<16x96xf32> to vector<2x96xf32>
    %489 = vector.extract_strided_slice %24 {offsets = [0, 0], sizes = [2, 96], strides = [1, 1]} : vector<16x96xf32> to vector<2x96xf32>
    %490 = vector.extract_strided_slice %488 {offsets = [0, 0], sizes = [2, 64], strides = [1, 1]} : vector<2x96xf32> to vector<2x64xf32>
    %491 = vector.extract_strided_slice %485 {offsets = [0, 0], sizes = [2, 64], strides = [1, 1]} : vector<2x96xf32> to vector<2x64xf32>
    %492 = arith.addf %490, %491 : vector<2x64xf32>
    %493 = arith.negf %492 : vector<2x64xf32>
    %494 = math.exp %493 : vector<2x64xf32>
    %cst_100 = arith.constant 1.000000e+00 : f32
    %495 = vector.broadcast %cst_100 : f32 to vector<2x64xf32>
    %496 = arith.addf %495, %494 : vector<2x64xf32>
    %497 = arith.divf %495, %496 : vector<2x64xf32>
    %498 = vector.extract_strided_slice %489 {offsets = [0, 0], sizes = [2, 64], strides = [1, 1]} : vector<2x96xf32> to vector<2x64xf32>
    %499 = vector.extract_strided_slice %487 {offsets = [0, 0], sizes = [2, 64], strides = [1, 1]} : vector<2x96xf32> to vector<2x64xf32>
    %500 = arith.addf %498, %499 : vector<2x64xf32>
    %501 = arith.negf %500 : vector<2x64xf32>
    %502 = math.exp %501 : vector<2x64xf32>
    %cst_101 = arith.constant 1.000000e+00 : f32
    %503 = vector.broadcast %cst_101 : f32 to vector<2x64xf32>
    %504 = arith.addf %503, %502 : vector<2x64xf32>
    %505 = arith.divf %503, %504 : vector<2x64xf32>
    %506 = vector.extract_strided_slice %488 {offsets = [0, 64], sizes = [2, 32], strides = [1, 1]} : vector<2x96xf32> to vector<2x32xf32>
    %507 = vector.extract_strided_slice %497 {offsets = [0, 0], sizes = [2, 32], strides = [1, 1]} : vector<2x64xf32> to vector<2x32xf32>
    %508 = vector.extract_strided_slice %485 {offsets = [0, 64], sizes = [2, 32], strides = [1, 1]} : vector<2x96xf32> to vector<2x32xf32>
    %509 = arith.mulf %507, %508 : vector<2x32xf32>
    %510 = arith.addf %506, %509 : vector<2x32xf32>
    %511 = math.tanh %510 : vector<2x32xf32>
    %512 = vector.extract_strided_slice %489 {offsets = [0, 64], sizes = [2, 32], strides = [1, 1]} : vector<2x96xf32> to vector<2x32xf32>
    %513 = vector.extract_strided_slice %505 {offsets = [0, 0], sizes = [2, 32], strides = [1, 1]} : vector<2x64xf32> to vector<2x32xf32>
    %514 = vector.extract_strided_slice %487 {offsets = [0, 64], sizes = [2, 32], strides = [1, 1]} : vector<2x96xf32> to vector<2x32xf32>
    %515 = arith.mulf %513, %514 : vector<2x32xf32>
    %516 = arith.addf %512, %515 : vector<2x32xf32>
    %517 = math.tanh %516 : vector<2x32xf32>
    %518 = vector.extract_strided_slice %497 {offsets = [0, 32], sizes = [2, 32], strides = [1, 1]} : vector<2x64xf32> to vector<2x32xf32>
    %cst_102 = arith.constant 1.000000e+00 : f32
    %519 = vector.broadcast %cst_102 : f32 to vector<2x32xf32>
    %520 = arith.subf %519, %518 : vector<2x32xf32>
    %521 = arith.mulf %520, %511 : vector<2x32xf32>
    %522 = vector.extract_strided_slice %497 {offsets = [0, 32], sizes = [2, 32], strides = [1, 1]} : vector<2x64xf32> to vector<2x32xf32>
    %523 = arith.mulf %522, %472 : vector<2x32xf32>
    %524 = arith.addf %521, %523 : vector<2x32xf32>
    %525 = vector.extract_strided_slice %505 {offsets = [0, 32], sizes = [2, 32], strides = [1, 1]} : vector<2x64xf32> to vector<2x32xf32>
    %cst_103 = arith.constant 1.000000e+00 : f32
    %526 = vector.broadcast %cst_103 : f32 to vector<2x32xf32>
    %527 = arith.subf %526, %525 : vector<2x32xf32>
    %528 = arith.mulf %527, %517 : vector<2x32xf32>
    %529 = vector.extract_strided_slice %505 {offsets = [0, 32], sizes = [2, 32], strides = [1, 1]} : vector<2x64xf32> to vector<2x32xf32>
    %530 = arith.mulf %529, %477 : vector<2x32xf32>
    %531 = arith.addf %528, %530 : vector<2x32xf32>
    %532 = arith.mulf %481, %524 : vector<2x32xf32>
    %cst_104 = arith.constant 1.000000e+00 : f32
    %533 = vector.broadcast %cst_104 : f32 to vector<2x32xf32>
    %534 = arith.subf %533, %481 : vector<2x32xf32>
    %535 = arith.mulf %534, %472 : vector<2x32xf32>
    %536 = arith.addf %532, %535 : vector<2x32xf32>
    %537 = arith.mulf %483, %531 : vector<2x32xf32>
    %cst_105 = arith.constant 1.000000e+00 : f32
    %538 = vector.broadcast %cst_105 : f32 to vector<2x32xf32>
    %539 = arith.subf %538, %483 : vector<2x32xf32>
    %540 = arith.mulf %539, %477 : vector<2x32xf32>
    %541 = arith.addf %537, %540 : vector<2x32xf32>
    %542 = arith.mulf %481, %536 : vector<2x32xf32>
    %543 = arith.mulf %483, %541 : vector<2x32xf32>
    %544 = tpu.concatenate %536, %541 in 1 : vector<2x32xf32>, vector<2x32xf32> -> vector<2x64xf32>
    %c0_106 = arith.constant 0 : index
    %c0_107 = arith.constant 0 : index
    %545 = vector.load %arg12[%c0_106, %c0_107] : memref<64x32xf32, #tpu.memory_space<vmem>>, vector<64x32xf32>
    %cst_108 = arith.constant dense<0.000000e+00> : vector<2x32xf32>
    %546 = tpu.matmul %544, %545, %cst_108 {dimension_numbers = #tpu.dot_dimension_numbers<[1], [0], [0], [1], [0, 0, 1, 1], [], []>} : vector<2x64xf32>, vector<64x32xf32>, vector<2x32xf32> -> vector<2x32xf32>
    %c0_109 = arith.constant 0 : index
    %c0_110 = arith.constant 0 : index
    %547 = vector.load %arg13[%c0_109, %c0_110] : memref<1x32xf32, #tpu.memory_space<vmem>>, vector<1x32xf32>
    %548 = vector.broadcast %547 : vector<1x32xf32> to vector<2x32xf32>
    %549 = arith.addf %546, %548 : vector<2x32xf32>
    %550 = math.tanh %549 : vector<2x32xf32>
    %551 = vector.extract_strided_slice %94 {offsets = [0, 0], sizes = [1, 32], strides = [1, 1]} : vector<2x32xf32> to vector<1x32xf32>
    %552 = vector.extract_strided_slice %158 {offsets = [0, 0], sizes = [1, 32], strides = [1, 1]} : vector<2x32xf32> to vector<1x32xf32>
    %553 = vector.extract_strided_slice %222 {offsets = [0, 0], sizes = [1, 32], strides = [1, 1]} : vector<2x32xf32> to vector<1x32xf32>
    %554 = vector.extract_strided_slice %286 {offsets = [0, 0], sizes = [1, 32], strides = [1, 1]} : vector<2x32xf32> to vector<1x32xf32>
    %555 = vector.extract_strided_slice %350 {offsets = [0, 0], sizes = [1, 32], strides = [1, 1]} : vector<2x32xf32> to vector<1x32xf32>
    %556 = vector.extract_strided_slice %414 {offsets = [0, 0], sizes = [1, 32], strides = [1, 1]} : vector<2x32xf32> to vector<1x32xf32>
    %557 = vector.extract_strided_slice %478 {offsets = [0, 0], sizes = [1, 32], strides = [1, 1]} : vector<2x32xf32> to vector<1x32xf32>
    %558 = vector.extract_strided_slice %542 {offsets = [0, 0], sizes = [1, 32], strides = [1, 1]} : vector<2x32xf32> to vector<1x32xf32>
    %559 = tpu.concatenate %551, %552, %553, %554, %555, %556, %557, %558 in 0 : vector<1x32xf32>, vector<1x32xf32>, vector<1x32xf32>, vector<1x32xf32>, vector<1x32xf32>, vector<1x32xf32>, vector<1x32xf32>, vector<1x32xf32> -> vector<8x32xf32>
    %560 = vector.extract_strided_slice %543 {offsets = [0, 0], sizes = [1, 32], strides = [1, 1]} : vector<2x32xf32> to vector<1x32xf32>
    %561 = vector.extract_strided_slice %479 {offsets = [0, 0], sizes = [1, 32], strides = [1, 1]} : vector<2x32xf32> to vector<1x32xf32>
    %562 = vector.extract_strided_slice %415 {offsets = [0, 0], sizes = [1, 32], strides = [1, 1]} : vector<2x32xf32> to vector<1x32xf32>
    %563 = vector.extract_strided_slice %351 {offsets = [0, 0], sizes = [1, 32], strides = [1, 1]} : vector<2x32xf32> to vector<1x32xf32>
    %564 = vector.extract_strided_slice %287 {offsets = [0, 0], sizes = [1, 32], strides = [1, 1]} : vector<2x32xf32> to vector<1x32xf32>
    %565 = vector.extract_strided_slice %223 {offsets = [0, 0], sizes = [1, 32], strides = [1, 1]} : vector<2x32xf32> to vector<1x32xf32>
    %566 = vector.extract_strided_slice %159 {offsets = [0, 0], sizes = [1, 32], strides = [1, 1]} : vector<2x32xf32> to vector<1x32xf32>
    %567 = vector.extract_strided_slice %95 {offsets = [0, 0], sizes = [1, 32], strides = [1, 1]} : vector<2x32xf32> to vector<1x32xf32>
    %568 = tpu.concatenate %560, %561, %562, %563, %564, %565, %566, %567 in 0 : vector<1x32xf32>, vector<1x32xf32>, vector<1x32xf32>, vector<1x32xf32>, vector<1x32xf32>, vector<1x32xf32>, vector<1x32xf32>, vector<1x32xf32> -> vector<8x32xf32>
    %569 = tpu.concatenate %559, %568 in 1 : vector<8x32xf32>, vector<8x32xf32> -> vector<8x64xf32>
    %570 = vector.extract_strided_slice %94 {offsets = [1, 0], sizes = [1, 32], strides = [1, 1]} : vector<2x32xf32> to vector<1x32xf32>
    %571 = vector.extract_strided_slice %158 {offsets = [1, 0], sizes = [1, 32], strides = [1, 1]} : vector<2x32xf32> to vector<1x32xf32>
    %572 = vector.extract_strided_slice %222 {offsets = [1, 0], sizes = [1, 32], strides = [1, 1]} : vector<2x32xf32> to vector<1x32xf32>
    %573 = vector.extract_strided_slice %286 {offsets = [1, 0], sizes = [1, 32], strides = [1, 1]} : vector<2x32xf32> to vector<1x32xf32>
    %574 = vector.extract_strided_slice %350 {offsets = [1, 0], sizes = [1, 32], strides = [1, 1]} : vector<2x32xf32> to vector<1x32xf32>
    %575 = vector.extract_strided_slice %414 {offsets = [1, 0], sizes = [1, 32], strides = [1, 1]} : vector<2x32xf32> to vector<1x32xf32>
    %576 = vector.extract_strided_slice %478 {offsets = [1, 0], sizes = [1, 32], strides = [1, 1]} : vector<2x32xf32> to vector<1x32xf32>
    %577 = vector.extract_strided_slice %542 {offsets = [1, 0], sizes = [1, 32], strides = [1, 1]} : vector<2x32xf32> to vector<1x32xf32>
    %578 = tpu.concatenate %570, %571, %572, %573, %574, %575, %576, %577 in 0 : vector<1x32xf32>, vector<1x32xf32>, vector<1x32xf32>, vector<1x32xf32>, vector<1x32xf32>, vector<1x32xf32>, vector<1x32xf32>, vector<1x32xf32> -> vector<8x32xf32>
    %579 = vector.extract_strided_slice %543 {offsets = [1, 0], sizes = [1, 32], strides = [1, 1]} : vector<2x32xf32> to vector<1x32xf32>
    %580 = vector.extract_strided_slice %479 {offsets = [1, 0], sizes = [1, 32], strides = [1, 1]} : vector<2x32xf32> to vector<1x32xf32>
    %581 = vector.extract_strided_slice %415 {offsets = [1, 0], sizes = [1, 32], strides = [1, 1]} : vector<2x32xf32> to vector<1x32xf32>
    %582 = vector.extract_strided_slice %351 {offsets = [1, 0], sizes = [1, 32], strides = [1, 1]} : vector<2x32xf32> to vector<1x32xf32>
    %583 = vector.extract_strided_slice %287 {offsets = [1, 0], sizes = [1, 32], strides = [1, 1]} : vector<2x32xf32> to vector<1x32xf32>
    %584 = vector.extract_strided_slice %223 {offsets = [1, 0], sizes = [1, 32], strides = [1, 1]} : vector<2x32xf32> to vector<1x32xf32>
    %585 = vector.extract_strided_slice %159 {offsets = [1, 0], sizes = [1, 32], strides = [1, 1]} : vector<2x32xf32> to vector<1x32xf32>
    %586 = vector.extract_strided_slice %95 {offsets = [1, 0], sizes = [1, 32], strides = [1, 1]} : vector<2x32xf32> to vector<1x32xf32>
    %587 = tpu.concatenate %579, %580, %581, %582, %583, %584, %585, %586 in 0 : vector<1x32xf32>, vector<1x32xf32>, vector<1x32xf32>, vector<1x32xf32>, vector<1x32xf32>, vector<1x32xf32>, vector<1x32xf32>, vector<1x32xf32> -> vector<8x32xf32>
    %588 = tpu.concatenate %578, %587 in 1 : vector<8x32xf32>, vector<8x32xf32> -> vector<8x64xf32>
    %589 = tpu.concatenate %569, %588 in 0 : vector<8x64xf32>, vector<8x64xf32> -> vector<16x64xf32>
    %cst_111 = arith.constant dense<0.000000e+00> : vector<16x32xf32>
    %590 = tpu.matmul %589, %11, %cst_111 {dimension_numbers = #tpu.dot_dimension_numbers<[1], [0], [0], [1], [0, 0, 1, 1], [], []>} : vector<16x64xf32>, vector<64x32xf32>, vector<16x32xf32> -> vector<16x32xf32>
    %591 = vector.extract_strided_slice %590 {offsets = [0, 0], sizes = [8, 32], strides = [1, 1]} : vector<16x32xf32> to vector<8x32xf32>
    %592 = vector.extract_strided_slice %590 {offsets = [8, 0], sizes = [8, 32], strides = [1, 1]} : vector<16x32xf32> to vector<8x32xf32>
    %593 = vector.extract_strided_slice %3 {offsets = [0, 0], sizes = [8, 1], strides = [1, 1]} : vector<16x1xf32> to vector<8x1xf32>
    %594 = vector.extract_strided_slice %3 {offsets = [8, 0], sizes = [8, 1], strides = [1, 1]} : vector<16x1xf32> to vector<8x1xf32>
    %c0_112 = arith.constant 0 : index
    %c0_113 = arith.constant 0 : index
    %595 = vector.load %arg16[%c0_112, %c0_113] : memref<1x32xf32, #tpu.memory_space<vmem>>, vector<1x32xf32>
    %596 = vector.shape_cast %595 : vector<1x32xf32> to vector<1x32xf32>
    %597 = vector.broadcast %596 : vector<1x32xf32> to vector<8x32xf32>
    %cst_114 = arith.constant dense<0.000000e+00> : vector<2x32xf32>
    %598 = tpu.matmul %550, %10, %cst_114 {dimension_numbers = #tpu.dot_dimension_numbers<[1], [0], [0], [1], [0, 0, 1, 1], [], []>} : vector<2x32xf32>, vector<32x32xf32>, vector<2x32xf32> -> vector<2x32xf32>
    %599 = vector.extract_strided_slice %598 {offsets = [0, 0], sizes = [1, 32], strides = [1, 1]} : vector<2x32xf32> to vector<1x32xf32>
    %600 = vector.shape_cast %599 : vector<1x32xf32> to vector<1x32xf32>
    %601 = vector.broadcast %600 : vector<1x32xf32> to vector<8x32xf32>
    %602 = arith.addf %601, %591 : vector<8x32xf32>
    %603 = math.tanh %602 : vector<8x32xf32>
    %604 = arith.mulf %603, %597 : vector<8x32xf32>
    %cst_115 = arith.constant dense<0.000000e+00> : vector<8xf32>
    %605 = vector.multi_reduction <add>, %604, %cst_115 [1] : vector<8x32xf32> to vector<8xf32>
    %606 = vector.shape_cast %605 : vector<8xf32> to vector<8x1xf32>
    %607 = arith.addf %606, %593 : vector<8x1xf32>
    %cst_116 = arith.constant dense<0xFF800000> : vector<1xf32>
    %608 = vector.multi_reduction <maximumf>, %607, %cst_116 [0] : vector<8x1xf32> to vector<1xf32>
    %609 = vector.shape_cast %608 : vector<1xf32> to vector<1x1xf32>
    %610 = vector.broadcast %609 : vector<1x1xf32> to vector<8x1xf32>
    %611 = arith.subf %607, %610 : vector<8x1xf32>
    %612 = math.exp %611 : vector<8x1xf32>
    %cst_117 = arith.constant dense<0.000000e+00> : vector<1xf32>
    %613 = vector.multi_reduction <add>, %612, %cst_117 [0] : vector<8x1xf32> to vector<1xf32>
    %614 = vector.shape_cast %613 : vector<1xf32> to vector<1x1xf32>
    %615 = vector.broadcast %614 : vector<1x1xf32> to vector<8x1xf32>
    %616 = arith.divf %612, %615 : vector<8x1xf32>
    %617 = vector.broadcast %616 : vector<8x1xf32> to vector<8x64xf32>
    %618 = arith.mulf %617, %569 : vector<8x64xf32>
    %cst_118 = arith.constant dense<0.000000e+00> : vector<64xf32>
    %619 = vector.multi_reduction <add>, %618, %cst_118 [0] : vector<8x64xf32> to vector<64xf32>
    %620 = vector.shape_cast %619 : vector<64xf32> to vector<1x64xf32>
    %621 = vector.extract_strided_slice %598 {offsets = [1, 0], sizes = [1, 32], strides = [1, 1]} : vector<2x32xf32> to vector<1x32xf32>
    %622 = vector.shape_cast %621 : vector<1x32xf32> to vector<1x32xf32>
    %623 = vector.broadcast %622 : vector<1x32xf32> to vector<8x32xf32>
    %624 = arith.addf %623, %592 : vector<8x32xf32>
    %625 = math.tanh %624 : vector<8x32xf32>
    %626 = arith.mulf %625, %597 : vector<8x32xf32>
    %cst_119 = arith.constant dense<0.000000e+00> : vector<8xf32>
    %627 = vector.multi_reduction <add>, %626, %cst_119 [1] : vector<8x32xf32> to vector<8xf32>
    %628 = vector.shape_cast %627 : vector<8xf32> to vector<8x1xf32>
    %629 = arith.addf %628, %594 : vector<8x1xf32>
    %cst_120 = arith.constant dense<0xFF800000> : vector<1xf32>
    %630 = vector.multi_reduction <maximumf>, %629, %cst_120 [0] : vector<8x1xf32> to vector<1xf32>
    %631 = vector.shape_cast %630 : vector<1xf32> to vector<1x1xf32>
    %632 = vector.broadcast %631 : vector<1x1xf32> to vector<8x1xf32>
    %633 = arith.subf %629, %632 : vector<8x1xf32>
    %634 = math.exp %633 : vector<8x1xf32>
    %cst_121 = arith.constant dense<0.000000e+00> : vector<1xf32>
    %635 = vector.multi_reduction <add>, %634, %cst_121 [0] : vector<8x1xf32> to vector<1xf32>
    %636 = vector.shape_cast %635 : vector<1xf32> to vector<1x1xf32>
    %637 = vector.broadcast %636 : vector<1x1xf32> to vector<8x1xf32>
    %638 = arith.divf %634, %637 : vector<8x1xf32>
    %639 = vector.broadcast %638 : vector<8x1xf32> to vector<8x64xf32>
    %640 = arith.mulf %639, %588 : vector<8x64xf32>
    %cst_122 = arith.constant dense<0.000000e+00> : vector<64xf32>
    %641 = vector.multi_reduction <add>, %640, %cst_122 [0] : vector<8x64xf32> to vector<64xf32>
    %642 = vector.shape_cast %641 : vector<64xf32> to vector<1x64xf32>
    %643 = tpu.concatenate %620, %642 in 0 : vector<1x64xf32>, vector<1x64xf32> -> vector<2x64xf32>
    %644 = vector.extract_strided_slice %29 {offsets = [0, 0], sizes = [2, 96], strides = [1, 1]} : vector<16x96xf32> to vector<2x96xf32>
    %cst_123 = arith.constant dense<0.000000e+00> : vector<2x96xf32>
    %645 = tpu.matmul %643, %13, %cst_123 {dimension_numbers = #tpu.dot_dimension_numbers<[1], [0], [0], [1], [0, 0, 1, 1], [], []>} : vector<2x64xf32>, vector<64x96xf32>, vector<2x96xf32> -> vector<2x96xf32>
    %646 = arith.addf %644, %645 : vector<2x96xf32>
    %cst_124 = arith.constant dense<0.000000e+00> : vector<2x96xf32>
    %647 = tpu.matmul %550, %8, %cst_124 {dimension_numbers = #tpu.dot_dimension_numbers<[1], [0], [0], [1], [0, 0, 1, 1], [], []>} : vector<2x32xf32>, vector<32x96xf32>, vector<2x96xf32> -> vector<2x96xf32>
    %648 = arith.addf %647, %9 : vector<2x96xf32>
    %649 = vector.extract_strided_slice %646 {offsets = [0, 0], sizes = [2, 64], strides = [1, 1]} : vector<2x96xf32> to vector<2x64xf32>
    %650 = vector.extract_strided_slice %648 {offsets = [0, 0], sizes = [2, 64], strides = [1, 1]} : vector<2x96xf32> to vector<2x64xf32>
    %651 = arith.addf %649, %650 : vector<2x64xf32>
    %652 = arith.negf %651 : vector<2x64xf32>
    %653 = math.exp %652 : vector<2x64xf32>
    %cst_125 = arith.constant 1.000000e+00 : f32
    %654 = vector.broadcast %cst_125 : f32 to vector<2x64xf32>
    %655 = arith.addf %654, %653 : vector<2x64xf32>
    %656 = arith.divf %654, %655 : vector<2x64xf32>
    %657 = vector.extract_strided_slice %646 {offsets = [0, 64], sizes = [2, 32], strides = [1, 1]} : vector<2x96xf32> to vector<2x32xf32>
    %658 = vector.extract_strided_slice %656 {offsets = [0, 0], sizes = [2, 32], strides = [1, 1]} : vector<2x64xf32> to vector<2x32xf32>
    %659 = vector.extract_strided_slice %648 {offsets = [0, 64], sizes = [2, 32], strides = [1, 1]} : vector<2x96xf32> to vector<2x32xf32>
    %660 = arith.mulf %658, %659 : vector<2x32xf32>
    %661 = arith.addf %657, %660 : vector<2x32xf32>
    %662 = math.tanh %661 : vector<2x32xf32>
    %663 = vector.extract_strided_slice %656 {offsets = [0, 32], sizes = [2, 32], strides = [1, 1]} : vector<2x64xf32> to vector<2x32xf32>
    %cst_126 = arith.constant 1.000000e+00 : f32
    %664 = vector.broadcast %cst_126 : f32 to vector<2x32xf32>
    %665 = arith.subf %664, %663 : vector<2x32xf32>
    %666 = arith.mulf %665, %662 : vector<2x32xf32>
    %667 = vector.extract_strided_slice %656 {offsets = [0, 32], sizes = [2, 32], strides = [1, 1]} : vector<2x64xf32> to vector<2x32xf32>
    %668 = arith.mulf %667, %550 : vector<2x32xf32>
    %669 = arith.addf %666, %668 : vector<2x32xf32>
    %cst_127 = arith.constant dense<0.000000e+00> : vector<2x32xf32>
    %670 = tpu.matmul %669, %10, %cst_127 {dimension_numbers = #tpu.dot_dimension_numbers<[1], [0], [0], [1], [0, 0, 1, 1], [], []>} : vector<2x32xf32>, vector<32x32xf32>, vector<2x32xf32> -> vector<2x32xf32>
    %671 = vector.extract_strided_slice %670 {offsets = [0, 0], sizes = [1, 32], strides = [1, 1]} : vector<2x32xf32> to vector<1x32xf32>
    %672 = vector.shape_cast %671 : vector<1x32xf32> to vector<1x32xf32>
    %673 = vector.broadcast %672 : vector<1x32xf32> to vector<8x32xf32>
    %674 = arith.addf %673, %591 : vector<8x32xf32>
    %675 = math.tanh %674 : vector<8x32xf32>
    %676 = arith.mulf %675, %597 : vector<8x32xf32>
    %cst_128 = arith.constant dense<0.000000e+00> : vector<8xf32>
    %677 = vector.multi_reduction <add>, %676, %cst_128 [1] : vector<8x32xf32> to vector<8xf32>
    %678 = vector.shape_cast %677 : vector<8xf32> to vector<8x1xf32>
    %679 = arith.addf %678, %593 : vector<8x1xf32>
    %cst_129 = arith.constant dense<0xFF800000> : vector<1xf32>
    %680 = vector.multi_reduction <maximumf>, %679, %cst_129 [0] : vector<8x1xf32> to vector<1xf32>
    %681 = vector.shape_cast %680 : vector<1xf32> to vector<1x1xf32>
    %682 = vector.broadcast %681 : vector<1x1xf32> to vector<8x1xf32>
    %683 = arith.subf %679, %682 : vector<8x1xf32>
    %684 = math.exp %683 : vector<8x1xf32>
    %cst_130 = arith.constant dense<0.000000e+00> : vector<1xf32>
    %685 = vector.multi_reduction <add>, %684, %cst_130 [0] : vector<8x1xf32> to vector<1xf32>
    %686 = vector.shape_cast %685 : vector<1xf32> to vector<1x1xf32>
    %687 = vector.broadcast %686 : vector<1x1xf32> to vector<8x1xf32>
    %688 = arith.divf %684, %687 : vector<8x1xf32>
    %689 = vector.broadcast %688 : vector<8x1xf32> to vector<8x64xf32>
    %690 = arith.mulf %689, %569 : vector<8x64xf32>
    %cst_131 = arith.constant dense<0.000000e+00> : vector<64xf32>
    %691 = vector.multi_reduction <add>, %690, %cst_131 [0] : vector<8x64xf32> to vector<64xf32>
    %692 = vector.shape_cast %691 : vector<64xf32> to vector<1x64xf32>
    %693 = vector.extract_strided_slice %670 {offsets = [1, 0], sizes = [1, 32], strides = [1, 1]} : vector<2x32xf32> to vector<1x32xf32>
    %694 = vector.shape_cast %693 : vector<1x32xf32> to vector<1x32xf32>
    %695 = vector.broadcast %694 : vector<1x32xf32> to vector<8x32xf32>
    %696 = arith.addf %695, %592 : vector<8x32xf32>
    %697 = math.tanh %696 : vector<8x32xf32>
    %698 = arith.mulf %697, %597 : vector<8x32xf32>
    %cst_132 = arith.constant dense<0.000000e+00> : vector<8xf32>
    %699 = vector.multi_reduction <add>, %698, %cst_132 [1] : vector<8x32xf32> to vector<8xf32>
    %700 = vector.shape_cast %699 : vector<8xf32> to vector<8x1xf32>
    %701 = arith.addf %700, %594 : vector<8x1xf32>
    %cst_133 = arith.constant dense<0xFF800000> : vector<1xf32>
    %702 = vector.multi_reduction <maximumf>, %701, %cst_133 [0] : vector<8x1xf32> to vector<1xf32>
    %703 = vector.shape_cast %702 : vector<1xf32> to vector<1x1xf32>
    %704 = vector.broadcast %703 : vector<1x1xf32> to vector<8x1xf32>
    %705 = arith.subf %701, %704 : vector<8x1xf32>
    %706 = math.exp %705 : vector<8x1xf32>
    %cst_134 = arith.constant dense<0.000000e+00> : vector<1xf32>
    %707 = vector.multi_reduction <add>, %706, %cst_134 [0] : vector<8x1xf32> to vector<1xf32>
    %708 = vector.shape_cast %707 : vector<1xf32> to vector<1x1xf32>
    %709 = vector.broadcast %708 : vector<1x1xf32> to vector<8x1xf32>
    %710 = arith.divf %706, %709 : vector<8x1xf32>
    %711 = vector.broadcast %710 : vector<8x1xf32> to vector<8x64xf32>
    %712 = arith.mulf %711, %588 : vector<8x64xf32>
    %cst_135 = arith.constant dense<0.000000e+00> : vector<64xf32>
    %713 = vector.multi_reduction <add>, %712, %cst_135 [0] : vector<8x64xf32> to vector<64xf32>
    %714 = vector.shape_cast %713 : vector<64xf32> to vector<1x64xf32>
    %715 = tpu.concatenate %692, %714 in 0 : vector<1x64xf32>, vector<1x64xf32> -> vector<2x64xf32>
    %716 = vector.extract_strided_slice %29 {offsets = [2, 0], sizes = [2, 96], strides = [1, 1]} : vector<16x96xf32> to vector<2x96xf32>
    %cst_136 = arith.constant dense<0.000000e+00> : vector<2x96xf32>
    %717 = tpu.matmul %715, %13, %cst_136 {dimension_numbers = #tpu.dot_dimension_numbers<[1], [0], [0], [1], [0, 0, 1, 1], [], []>} : vector<2x64xf32>, vector<64x96xf32>, vector<2x96xf32> -> vector<2x96xf32>
    %718 = arith.addf %716, %717 : vector<2x96xf32>
    %cst_137 = arith.constant dense<0.000000e+00> : vector<2x96xf32>
    %719 = tpu.matmul %669, %8, %cst_137 {dimension_numbers = #tpu.dot_dimension_numbers<[1], [0], [0], [1], [0, 0, 1, 1], [], []>} : vector<2x32xf32>, vector<32x96xf32>, vector<2x96xf32> -> vector<2x96xf32>
    %720 = arith.addf %719, %9 : vector<2x96xf32>
    %721 = vector.extract_strided_slice %718 {offsets = [0, 0], sizes = [2, 64], strides = [1, 1]} : vector<2x96xf32> to vector<2x64xf32>
    %722 = vector.extract_strided_slice %720 {offsets = [0, 0], sizes = [2, 64], strides = [1, 1]} : vector<2x96xf32> to vector<2x64xf32>
    %723 = arith.addf %721, %722 : vector<2x64xf32>
    %724 = arith.negf %723 : vector<2x64xf32>
    %725 = math.exp %724 : vector<2x64xf32>
    %cst_138 = arith.constant 1.000000e+00 : f32
    %726 = vector.broadcast %cst_138 : f32 to vector<2x64xf32>
    %727 = arith.addf %726, %725 : vector<2x64xf32>
    %728 = arith.divf %726, %727 : vector<2x64xf32>
    %729 = vector.extract_strided_slice %718 {offsets = [0, 64], sizes = [2, 32], strides = [1, 1]} : vector<2x96xf32> to vector<2x32xf32>
    %730 = vector.extract_strided_slice %728 {offsets = [0, 0], sizes = [2, 32], strides = [1, 1]} : vector<2x64xf32> to vector<2x32xf32>
    %731 = vector.extract_strided_slice %720 {offsets = [0, 64], sizes = [2, 32], strides = [1, 1]} : vector<2x96xf32> to vector<2x32xf32>
    %732 = arith.mulf %730, %731 : vector<2x32xf32>
    %733 = arith.addf %729, %732 : vector<2x32xf32>
    %734 = math.tanh %733 : vector<2x32xf32>
    %735 = vector.extract_strided_slice %728 {offsets = [0, 32], sizes = [2, 32], strides = [1, 1]} : vector<2x64xf32> to vector<2x32xf32>
    %cst_139 = arith.constant 1.000000e+00 : f32
    %736 = vector.broadcast %cst_139 : f32 to vector<2x32xf32>
    %737 = arith.subf %736, %735 : vector<2x32xf32>
    %738 = arith.mulf %737, %734 : vector<2x32xf32>
    %739 = vector.extract_strided_slice %728 {offsets = [0, 32], sizes = [2, 32], strides = [1, 1]} : vector<2x64xf32> to vector<2x32xf32>
    %740 = arith.mulf %739, %669 : vector<2x32xf32>
    %741 = arith.addf %738, %740 : vector<2x32xf32>
    %cst_140 = arith.constant dense<0.000000e+00> : vector<2x32xf32>
    %742 = tpu.matmul %741, %10, %cst_140 {dimension_numbers = #tpu.dot_dimension_numbers<[1], [0], [0], [1], [0, 0, 1, 1], [], []>} : vector<2x32xf32>, vector<32x32xf32>, vector<2x32xf32> -> vector<2x32xf32>
    %743 = vector.extract_strided_slice %742 {offsets = [0, 0], sizes = [1, 32], strides = [1, 1]} : vector<2x32xf32> to vector<1x32xf32>
    %744 = vector.shape_cast %743 : vector<1x32xf32> to vector<1x32xf32>
    %745 = vector.broadcast %744 : vector<1x32xf32> to vector<8x32xf32>
    %746 = arith.addf %745, %591 : vector<8x32xf32>
    %747 = math.tanh %746 : vector<8x32xf32>
    %748 = arith.mulf %747, %597 : vector<8x32xf32>
    %cst_141 = arith.constant dense<0.000000e+00> : vector<8xf32>
    %749 = vector.multi_reduction <add>, %748, %cst_141 [1] : vector<8x32xf32> to vector<8xf32>
    %750 = vector.shape_cast %749 : vector<8xf32> to vector<8x1xf32>
    %751 = arith.addf %750, %593 : vector<8x1xf32>
    %cst_142 = arith.constant dense<0xFF800000> : vector<1xf32>
    %752 = vector.multi_reduction <maximumf>, %751, %cst_142 [0] : vector<8x1xf32> to vector<1xf32>
    %753 = vector.shape_cast %752 : vector<1xf32> to vector<1x1xf32>
    %754 = vector.broadcast %753 : vector<1x1xf32> to vector<8x1xf32>
    %755 = arith.subf %751, %754 : vector<8x1xf32>
    %756 = math.exp %755 : vector<8x1xf32>
    %cst_143 = arith.constant dense<0.000000e+00> : vector<1xf32>
    %757 = vector.multi_reduction <add>, %756, %cst_143 [0] : vector<8x1xf32> to vector<1xf32>
    %758 = vector.shape_cast %757 : vector<1xf32> to vector<1x1xf32>
    %759 = vector.broadcast %758 : vector<1x1xf32> to vector<8x1xf32>
    %760 = arith.divf %756, %759 : vector<8x1xf32>
    %761 = vector.broadcast %760 : vector<8x1xf32> to vector<8x64xf32>
    %762 = arith.mulf %761, %569 : vector<8x64xf32>
    %cst_144 = arith.constant dense<0.000000e+00> : vector<64xf32>
    %763 = vector.multi_reduction <add>, %762, %cst_144 [0] : vector<8x64xf32> to vector<64xf32>
    %764 = vector.shape_cast %763 : vector<64xf32> to vector<1x64xf32>
    %765 = vector.extract_strided_slice %742 {offsets = [1, 0], sizes = [1, 32], strides = [1, 1]} : vector<2x32xf32> to vector<1x32xf32>
    %766 = vector.shape_cast %765 : vector<1x32xf32> to vector<1x32xf32>
    %767 = vector.broadcast %766 : vector<1x32xf32> to vector<8x32xf32>
    %768 = arith.addf %767, %592 : vector<8x32xf32>
    %769 = math.tanh %768 : vector<8x32xf32>
    %770 = arith.mulf %769, %597 : vector<8x32xf32>
    %cst_145 = arith.constant dense<0.000000e+00> : vector<8xf32>
    %771 = vector.multi_reduction <add>, %770, %cst_145 [1] : vector<8x32xf32> to vector<8xf32>
    %772 = vector.shape_cast %771 : vector<8xf32> to vector<8x1xf32>
    %773 = arith.addf %772, %594 : vector<8x1xf32>
    %cst_146 = arith.constant dense<0xFF800000> : vector<1xf32>
    %774 = vector.multi_reduction <maximumf>, %773, %cst_146 [0] : vector<8x1xf32> to vector<1xf32>
    %775 = vector.shape_cast %774 : vector<1xf32> to vector<1x1xf32>
    %776 = vector.broadcast %775 : vector<1x1xf32> to vector<8x1xf32>
    %777 = arith.subf %773, %776 : vector<8x1xf32>
    %778 = math.exp %777 : vector<8x1xf32>
    %cst_147 = arith.constant dense<0.000000e+00> : vector<1xf32>
    %779 = vector.multi_reduction <add>, %778, %cst_147 [0] : vector<8x1xf32> to vector<1xf32>
    %780 = vector.shape_cast %779 : vector<1xf32> to vector<1x1xf32>
    %781 = vector.broadcast %780 : vector<1x1xf32> to vector<8x1xf32>
    %782 = arith.divf %778, %781 : vector<8x1xf32>
    %783 = vector.broadcast %782 : vector<8x1xf32> to vector<8x64xf32>
    %784 = arith.mulf %783, %588 : vector<8x64xf32>
    %cst_148 = arith.constant dense<0.000000e+00> : vector<64xf32>
    %785 = vector.multi_reduction <add>, %784, %cst_148 [0] : vector<8x64xf32> to vector<64xf32>
    %786 = vector.shape_cast %785 : vector<64xf32> to vector<1x64xf32>
    %787 = tpu.concatenate %764, %786 in 0 : vector<1x64xf32>, vector<1x64xf32> -> vector<2x64xf32>
    %788 = vector.extract_strided_slice %29 {offsets = [4, 0], sizes = [2, 96], strides = [1, 1]} : vector<16x96xf32> to vector<2x96xf32>
    %cst_149 = arith.constant dense<0.000000e+00> : vector<2x96xf32>
    %789 = tpu.matmul %787, %13, %cst_149 {dimension_numbers = #tpu.dot_dimension_numbers<[1], [0], [0], [1], [0, 0, 1, 1], [], []>} : vector<2x64xf32>, vector<64x96xf32>, vector<2x96xf32> -> vector<2x96xf32>
    %790 = arith.addf %788, %789 : vector<2x96xf32>
    %cst_150 = arith.constant dense<0.000000e+00> : vector<2x96xf32>
    %791 = tpu.matmul %741, %8, %cst_150 {dimension_numbers = #tpu.dot_dimension_numbers<[1], [0], [0], [1], [0, 0, 1, 1], [], []>} : vector<2x32xf32>, vector<32x96xf32>, vector<2x96xf32> -> vector<2x96xf32>
    %792 = arith.addf %791, %9 : vector<2x96xf32>
    %793 = vector.extract_strided_slice %790 {offsets = [0, 0], sizes = [2, 64], strides = [1, 1]} : vector<2x96xf32> to vector<2x64xf32>
    %794 = vector.extract_strided_slice %792 {offsets = [0, 0], sizes = [2, 64], strides = [1, 1]} : vector<2x96xf32> to vector<2x64xf32>
    %795 = arith.addf %793, %794 : vector<2x64xf32>
    %796 = arith.negf %795 : vector<2x64xf32>
    %797 = math.exp %796 : vector<2x64xf32>
    %cst_151 = arith.constant 1.000000e+00 : f32
    %798 = vector.broadcast %cst_151 : f32 to vector<2x64xf32>
    %799 = arith.addf %798, %797 : vector<2x64xf32>
    %800 = arith.divf %798, %799 : vector<2x64xf32>
    %801 = vector.extract_strided_slice %790 {offsets = [0, 64], sizes = [2, 32], strides = [1, 1]} : vector<2x96xf32> to vector<2x32xf32>
    %802 = vector.extract_strided_slice %800 {offsets = [0, 0], sizes = [2, 32], strides = [1, 1]} : vector<2x64xf32> to vector<2x32xf32>
    %803 = vector.extract_strided_slice %792 {offsets = [0, 64], sizes = [2, 32], strides = [1, 1]} : vector<2x96xf32> to vector<2x32xf32>
    %804 = arith.mulf %802, %803 : vector<2x32xf32>
    %805 = arith.addf %801, %804 : vector<2x32xf32>
    %806 = math.tanh %805 : vector<2x32xf32>
    %807 = vector.extract_strided_slice %800 {offsets = [0, 32], sizes = [2, 32], strides = [1, 1]} : vector<2x64xf32> to vector<2x32xf32>
    %cst_152 = arith.constant 1.000000e+00 : f32
    %808 = vector.broadcast %cst_152 : f32 to vector<2x32xf32>
    %809 = arith.subf %808, %807 : vector<2x32xf32>
    %810 = arith.mulf %809, %806 : vector<2x32xf32>
    %811 = vector.extract_strided_slice %800 {offsets = [0, 32], sizes = [2, 32], strides = [1, 1]} : vector<2x64xf32> to vector<2x32xf32>
    %812 = arith.mulf %811, %741 : vector<2x32xf32>
    %813 = arith.addf %810, %812 : vector<2x32xf32>
    %cst_153 = arith.constant dense<0.000000e+00> : vector<2x32xf32>
    %814 = tpu.matmul %813, %10, %cst_153 {dimension_numbers = #tpu.dot_dimension_numbers<[1], [0], [0], [1], [0, 0, 1, 1], [], []>} : vector<2x32xf32>, vector<32x32xf32>, vector<2x32xf32> -> vector<2x32xf32>
    %815 = vector.extract_strided_slice %814 {offsets = [0, 0], sizes = [1, 32], strides = [1, 1]} : vector<2x32xf32> to vector<1x32xf32>
    %816 = vector.shape_cast %815 : vector<1x32xf32> to vector<1x32xf32>
    %817 = vector.broadcast %816 : vector<1x32xf32> to vector<8x32xf32>
    %818 = arith.addf %817, %591 : vector<8x32xf32>
    %819 = math.tanh %818 : vector<8x32xf32>
    %820 = arith.mulf %819, %597 : vector<8x32xf32>
    %cst_154 = arith.constant dense<0.000000e+00> : vector<8xf32>
    %821 = vector.multi_reduction <add>, %820, %cst_154 [1] : vector<8x32xf32> to vector<8xf32>
    %822 = vector.shape_cast %821 : vector<8xf32> to vector<8x1xf32>
    %823 = arith.addf %822, %593 : vector<8x1xf32>
    %cst_155 = arith.constant dense<0xFF800000> : vector<1xf32>
    %824 = vector.multi_reduction <maximumf>, %823, %cst_155 [0] : vector<8x1xf32> to vector<1xf32>
    %825 = vector.shape_cast %824 : vector<1xf32> to vector<1x1xf32>
    %826 = vector.broadcast %825 : vector<1x1xf32> to vector<8x1xf32>
    %827 = arith.subf %823, %826 : vector<8x1xf32>
    %828 = math.exp %827 : vector<8x1xf32>
    %cst_156 = arith.constant dense<0.000000e+00> : vector<1xf32>
    %829 = vector.multi_reduction <add>, %828, %cst_156 [0] : vector<8x1xf32> to vector<1xf32>
    %830 = vector.shape_cast %829 : vector<1xf32> to vector<1x1xf32>
    %831 = vector.broadcast %830 : vector<1x1xf32> to vector<8x1xf32>
    %832 = arith.divf %828, %831 : vector<8x1xf32>
    %833 = vector.broadcast %832 : vector<8x1xf32> to vector<8x64xf32>
    %834 = arith.mulf %833, %569 : vector<8x64xf32>
    %cst_157 = arith.constant dense<0.000000e+00> : vector<64xf32>
    %835 = vector.multi_reduction <add>, %834, %cst_157 [0] : vector<8x64xf32> to vector<64xf32>
    %836 = vector.shape_cast %835 : vector<64xf32> to vector<1x64xf32>
    %837 = vector.extract_strided_slice %814 {offsets = [1, 0], sizes = [1, 32], strides = [1, 1]} : vector<2x32xf32> to vector<1x32xf32>
    %838 = vector.shape_cast %837 : vector<1x32xf32> to vector<1x32xf32>
    %839 = vector.broadcast %838 : vector<1x32xf32> to vector<8x32xf32>
    %840 = arith.addf %839, %592 : vector<8x32xf32>
    %841 = math.tanh %840 : vector<8x32xf32>
    %842 = arith.mulf %841, %597 : vector<8x32xf32>
    %cst_158 = arith.constant dense<0.000000e+00> : vector<8xf32>
    %843 = vector.multi_reduction <add>, %842, %cst_158 [1] : vector<8x32xf32> to vector<8xf32>
    %844 = vector.shape_cast %843 : vector<8xf32> to vector<8x1xf32>
    %845 = arith.addf %844, %594 : vector<8x1xf32>
    %cst_159 = arith.constant dense<0xFF800000> : vector<1xf32>
    %846 = vector.multi_reduction <maximumf>, %845, %cst_159 [0] : vector<8x1xf32> to vector<1xf32>
    %847 = vector.shape_cast %846 : vector<1xf32> to vector<1x1xf32>
    %848 = vector.broadcast %847 : vector<1x1xf32> to vector<8x1xf32>
    %849 = arith.subf %845, %848 : vector<8x1xf32>
    %850 = math.exp %849 : vector<8x1xf32>
    %cst_160 = arith.constant dense<0.000000e+00> : vector<1xf32>
    %851 = vector.multi_reduction <add>, %850, %cst_160 [0] : vector<8x1xf32> to vector<1xf32>
    %852 = vector.shape_cast %851 : vector<1xf32> to vector<1x1xf32>
    %853 = vector.broadcast %852 : vector<1x1xf32> to vector<8x1xf32>
    %854 = arith.divf %850, %853 : vector<8x1xf32>
    %855 = vector.broadcast %854 : vector<8x1xf32> to vector<8x64xf32>
    %856 = arith.mulf %855, %588 : vector<8x64xf32>
    %cst_161 = arith.constant dense<0.000000e+00> : vector<64xf32>
    %857 = vector.multi_reduction <add>, %856, %cst_161 [0] : vector<8x64xf32> to vector<64xf32>
    %858 = vector.shape_cast %857 : vector<64xf32> to vector<1x64xf32>
    %859 = tpu.concatenate %836, %858 in 0 : vector<1x64xf32>, vector<1x64xf32> -> vector<2x64xf32>
    %860 = vector.extract_strided_slice %29 {offsets = [6, 0], sizes = [2, 96], strides = [1, 1]} : vector<16x96xf32> to vector<2x96xf32>
    %cst_162 = arith.constant dense<0.000000e+00> : vector<2x96xf32>
    %861 = tpu.matmul %859, %13, %cst_162 {dimension_numbers = #tpu.dot_dimension_numbers<[1], [0], [0], [1], [0, 0, 1, 1], [], []>} : vector<2x64xf32>, vector<64x96xf32>, vector<2x96xf32> -> vector<2x96xf32>
    %862 = arith.addf %860, %861 : vector<2x96xf32>
    %cst_163 = arith.constant dense<0.000000e+00> : vector<2x96xf32>
    %863 = tpu.matmul %813, %8, %cst_163 {dimension_numbers = #tpu.dot_dimension_numbers<[1], [0], [0], [1], [0, 0, 1, 1], [], []>} : vector<2x32xf32>, vector<32x96xf32>, vector<2x96xf32> -> vector<2x96xf32>
    %864 = arith.addf %863, %9 : vector<2x96xf32>
    %865 = vector.extract_strided_slice %862 {offsets = [0, 0], sizes = [2, 64], strides = [1, 1]} : vector<2x96xf32> to vector<2x64xf32>
    %866 = vector.extract_strided_slice %864 {offsets = [0, 0], sizes = [2, 64], strides = [1, 1]} : vector<2x96xf32> to vector<2x64xf32>
    %867 = arith.addf %865, %866 : vector<2x64xf32>
    %868 = arith.negf %867 : vector<2x64xf32>
    %869 = math.exp %868 : vector<2x64xf32>
    %cst_164 = arith.constant 1.000000e+00 : f32
    %870 = vector.broadcast %cst_164 : f32 to vector<2x64xf32>
    %871 = arith.addf %870, %869 : vector<2x64xf32>
    %872 = arith.divf %870, %871 : vector<2x64xf32>
    %873 = vector.extract_strided_slice %862 {offsets = [0, 64], sizes = [2, 32], strides = [1, 1]} : vector<2x96xf32> to vector<2x32xf32>
    %874 = vector.extract_strided_slice %872 {offsets = [0, 0], sizes = [2, 32], strides = [1, 1]} : vector<2x64xf32> to vector<2x32xf32>
    %875 = vector.extract_strided_slice %864 {offsets = [0, 64], sizes = [2, 32], strides = [1, 1]} : vector<2x96xf32> to vector<2x32xf32>
    %876 = arith.mulf %874, %875 : vector<2x32xf32>
    %877 = arith.addf %873, %876 : vector<2x32xf32>
    %878 = math.tanh %877 : vector<2x32xf32>
    %879 = vector.extract_strided_slice %872 {offsets = [0, 32], sizes = [2, 32], strides = [1, 1]} : vector<2x64xf32> to vector<2x32xf32>
    %cst_165 = arith.constant 1.000000e+00 : f32
    %880 = vector.broadcast %cst_165 : f32 to vector<2x32xf32>
    %881 = arith.subf %880, %879 : vector<2x32xf32>
    %882 = arith.mulf %881, %878 : vector<2x32xf32>
    %883 = vector.extract_strided_slice %872 {offsets = [0, 32], sizes = [2, 32], strides = [1, 1]} : vector<2x64xf32> to vector<2x32xf32>
    %884 = arith.mulf %883, %813 : vector<2x32xf32>
    %885 = arith.addf %882, %884 : vector<2x32xf32>
    %cst_166 = arith.constant dense<0.000000e+00> : vector<2x32xf32>
    %886 = tpu.matmul %885, %10, %cst_166 {dimension_numbers = #tpu.dot_dimension_numbers<[1], [0], [0], [1], [0, 0, 1, 1], [], []>} : vector<2x32xf32>, vector<32x32xf32>, vector<2x32xf32> -> vector<2x32xf32>
    %887 = vector.extract_strided_slice %886 {offsets = [0, 0], sizes = [1, 32], strides = [1, 1]} : vector<2x32xf32> to vector<1x32xf32>
    %888 = vector.shape_cast %887 : vector<1x32xf32> to vector<1x32xf32>
    %889 = vector.broadcast %888 : vector<1x32xf32> to vector<8x32xf32>
    %890 = arith.addf %889, %591 : vector<8x32xf32>
    %891 = math.tanh %890 : vector<8x32xf32>
    %892 = arith.mulf %891, %597 : vector<8x32xf32>
    %cst_167 = arith.constant dense<0.000000e+00> : vector<8xf32>
    %893 = vector.multi_reduction <add>, %892, %cst_167 [1] : vector<8x32xf32> to vector<8xf32>
    %894 = vector.shape_cast %893 : vector<8xf32> to vector<8x1xf32>
    %895 = arith.addf %894, %593 : vector<8x1xf32>
    %cst_168 = arith.constant dense<0xFF800000> : vector<1xf32>
    %896 = vector.multi_reduction <maximumf>, %895, %cst_168 [0] : vector<8x1xf32> to vector<1xf32>
    %897 = vector.shape_cast %896 : vector<1xf32> to vector<1x1xf32>
    %898 = vector.broadcast %897 : vector<1x1xf32> to vector<8x1xf32>
    %899 = arith.subf %895, %898 : vector<8x1xf32>
    %900 = math.exp %899 : vector<8x1xf32>
    %cst_169 = arith.constant dense<0.000000e+00> : vector<1xf32>
    %901 = vector.multi_reduction <add>, %900, %cst_169 [0] : vector<8x1xf32> to vector<1xf32>
    %902 = vector.shape_cast %901 : vector<1xf32> to vector<1x1xf32>
    %903 = vector.broadcast %902 : vector<1x1xf32> to vector<8x1xf32>
    %904 = arith.divf %900, %903 : vector<8x1xf32>
    %905 = vector.broadcast %904 : vector<8x1xf32> to vector<8x64xf32>
    %906 = arith.mulf %905, %569 : vector<8x64xf32>
    %cst_170 = arith.constant dense<0.000000e+00> : vector<64xf32>
    %907 = vector.multi_reduction <add>, %906, %cst_170 [0] : vector<8x64xf32> to vector<64xf32>
    %908 = vector.shape_cast %907 : vector<64xf32> to vector<1x64xf32>
    %909 = vector.extract_strided_slice %886 {offsets = [1, 0], sizes = [1, 32], strides = [1, 1]} : vector<2x32xf32> to vector<1x32xf32>
    %910 = vector.shape_cast %909 : vector<1x32xf32> to vector<1x32xf32>
    %911 = vector.broadcast %910 : vector<1x32xf32> to vector<8x32xf32>
    %912 = arith.addf %911, %592 : vector<8x32xf32>
    %913 = math.tanh %912 : vector<8x32xf32>
    %914 = arith.mulf %913, %597 : vector<8x32xf32>
    %cst_171 = arith.constant dense<0.000000e+00> : vector<8xf32>
    %915 = vector.multi_reduction <add>, %914, %cst_171 [1] : vector<8x32xf32> to vector<8xf32>
    %916 = vector.shape_cast %915 : vector<8xf32> to vector<8x1xf32>
    %917 = arith.addf %916, %594 : vector<8x1xf32>
    %cst_172 = arith.constant dense<0xFF800000> : vector<1xf32>
    %918 = vector.multi_reduction <maximumf>, %917, %cst_172 [0] : vector<8x1xf32> to vector<1xf32>
    %919 = vector.shape_cast %918 : vector<1xf32> to vector<1x1xf32>
    %920 = vector.broadcast %919 : vector<1x1xf32> to vector<8x1xf32>
    %921 = arith.subf %917, %920 : vector<8x1xf32>
    %922 = math.exp %921 : vector<8x1xf32>
    %cst_173 = arith.constant dense<0.000000e+00> : vector<1xf32>
    %923 = vector.multi_reduction <add>, %922, %cst_173 [0] : vector<8x1xf32> to vector<1xf32>
    %924 = vector.shape_cast %923 : vector<1xf32> to vector<1x1xf32>
    %925 = vector.broadcast %924 : vector<1x1xf32> to vector<8x1xf32>
    %926 = arith.divf %922, %925 : vector<8x1xf32>
    %927 = vector.broadcast %926 : vector<8x1xf32> to vector<8x64xf32>
    %928 = arith.mulf %927, %588 : vector<8x64xf32>
    %cst_174 = arith.constant dense<0.000000e+00> : vector<64xf32>
    %929 = vector.multi_reduction <add>, %928, %cst_174 [0] : vector<8x64xf32> to vector<64xf32>
    %930 = vector.shape_cast %929 : vector<64xf32> to vector<1x64xf32>
    %931 = tpu.concatenate %908, %930 in 0 : vector<1x64xf32>, vector<1x64xf32> -> vector<2x64xf32>
    %932 = vector.extract_strided_slice %29 {offsets = [8, 0], sizes = [2, 96], strides = [1, 1]} : vector<16x96xf32> to vector<2x96xf32>
    %cst_175 = arith.constant dense<0.000000e+00> : vector<2x96xf32>
    %933 = tpu.matmul %931, %13, %cst_175 {dimension_numbers = #tpu.dot_dimension_numbers<[1], [0], [0], [1], [0, 0, 1, 1], [], []>} : vector<2x64xf32>, vector<64x96xf32>, vector<2x96xf32> -> vector<2x96xf32>
    %934 = arith.addf %932, %933 : vector<2x96xf32>
    %cst_176 = arith.constant dense<0.000000e+00> : vector<2x96xf32>
    %935 = tpu.matmul %885, %8, %cst_176 {dimension_numbers = #tpu.dot_dimension_numbers<[1], [0], [0], [1], [0, 0, 1, 1], [], []>} : vector<2x32xf32>, vector<32x96xf32>, vector<2x96xf32> -> vector<2x96xf32>
    %936 = arith.addf %935, %9 : vector<2x96xf32>
    %937 = vector.extract_strided_slice %934 {offsets = [0, 0], sizes = [2, 64], strides = [1, 1]} : vector<2x96xf32> to vector<2x64xf32>
    %938 = vector.extract_strided_slice %936 {offsets = [0, 0], sizes = [2, 64], strides = [1, 1]} : vector<2x96xf32> to vector<2x64xf32>
    %939 = arith.addf %937, %938 : vector<2x64xf32>
    %940 = arith.negf %939 : vector<2x64xf32>
    %941 = math.exp %940 : vector<2x64xf32>
    %cst_177 = arith.constant 1.000000e+00 : f32
    %942 = vector.broadcast %cst_177 : f32 to vector<2x64xf32>
    %943 = arith.addf %942, %941 : vector<2x64xf32>
    %944 = arith.divf %942, %943 : vector<2x64xf32>
    %945 = vector.extract_strided_slice %934 {offsets = [0, 64], sizes = [2, 32], strides = [1, 1]} : vector<2x96xf32> to vector<2x32xf32>
    %946 = vector.extract_strided_slice %944 {offsets = [0, 0], sizes = [2, 32], strides = [1, 1]} : vector<2x64xf32> to vector<2x32xf32>
    %947 = vector.extract_strided_slice %936 {offsets = [0, 64], sizes = [2, 32], strides = [1, 1]} : vector<2x96xf32> to vector<2x32xf32>
    %948 = arith.mulf %946, %947 : vector<2x32xf32>
    %949 = arith.addf %945, %948 : vector<2x32xf32>
    %950 = math.tanh %949 : vector<2x32xf32>
    %951 = vector.extract_strided_slice %944 {offsets = [0, 32], sizes = [2, 32], strides = [1, 1]} : vector<2x64xf32> to vector<2x32xf32>
    %cst_178 = arith.constant 1.000000e+00 : f32
    %952 = vector.broadcast %cst_178 : f32 to vector<2x32xf32>
    %953 = arith.subf %952, %951 : vector<2x32xf32>
    %954 = arith.mulf %953, %950 : vector<2x32xf32>
    %955 = vector.extract_strided_slice %944 {offsets = [0, 32], sizes = [2, 32], strides = [1, 1]} : vector<2x64xf32> to vector<2x32xf32>
    %956 = arith.mulf %955, %885 : vector<2x32xf32>
    %957 = arith.addf %954, %956 : vector<2x32xf32>
    %cst_179 = arith.constant dense<0.000000e+00> : vector<2x32xf32>
    %958 = tpu.matmul %957, %10, %cst_179 {dimension_numbers = #tpu.dot_dimension_numbers<[1], [0], [0], [1], [0, 0, 1, 1], [], []>} : vector<2x32xf32>, vector<32x32xf32>, vector<2x32xf32> -> vector<2x32xf32>
    %959 = vector.extract_strided_slice %958 {offsets = [0, 0], sizes = [1, 32], strides = [1, 1]} : vector<2x32xf32> to vector<1x32xf32>
    %960 = vector.shape_cast %959 : vector<1x32xf32> to vector<1x32xf32>
    %961 = vector.broadcast %960 : vector<1x32xf32> to vector<8x32xf32>
    %962 = arith.addf %961, %591 : vector<8x32xf32>
    %963 = math.tanh %962 : vector<8x32xf32>
    %964 = arith.mulf %963, %597 : vector<8x32xf32>
    %cst_180 = arith.constant dense<0.000000e+00> : vector<8xf32>
    %965 = vector.multi_reduction <add>, %964, %cst_180 [1] : vector<8x32xf32> to vector<8xf32>
    %966 = vector.shape_cast %965 : vector<8xf32> to vector<8x1xf32>
    %967 = arith.addf %966, %593 : vector<8x1xf32>
    %cst_181 = arith.constant dense<0xFF800000> : vector<1xf32>
    %968 = vector.multi_reduction <maximumf>, %967, %cst_181 [0] : vector<8x1xf32> to vector<1xf32>
    %969 = vector.shape_cast %968 : vector<1xf32> to vector<1x1xf32>
    %970 = vector.broadcast %969 : vector<1x1xf32> to vector<8x1xf32>
    %971 = arith.subf %967, %970 : vector<8x1xf32>
    %972 = math.exp %971 : vector<8x1xf32>
    %cst_182 = arith.constant dense<0.000000e+00> : vector<1xf32>
    %973 = vector.multi_reduction <add>, %972, %cst_182 [0] : vector<8x1xf32> to vector<1xf32>
    %974 = vector.shape_cast %973 : vector<1xf32> to vector<1x1xf32>
    %975 = vector.broadcast %974 : vector<1x1xf32> to vector<8x1xf32>
    %976 = arith.divf %972, %975 : vector<8x1xf32>
    %977 = vector.broadcast %976 : vector<8x1xf32> to vector<8x64xf32>
    %978 = arith.mulf %977, %569 : vector<8x64xf32>
    %cst_183 = arith.constant dense<0.000000e+00> : vector<64xf32>
    %979 = vector.multi_reduction <add>, %978, %cst_183 [0] : vector<8x64xf32> to vector<64xf32>
    %980 = vector.shape_cast %979 : vector<64xf32> to vector<1x64xf32>
    %981 = vector.extract_strided_slice %958 {offsets = [1, 0], sizes = [1, 32], strides = [1, 1]} : vector<2x32xf32> to vector<1x32xf32>
    %982 = vector.shape_cast %981 : vector<1x32xf32> to vector<1x32xf32>
    %983 = vector.broadcast %982 : vector<1x32xf32> to vector<8x32xf32>
    %984 = arith.addf %983, %592 : vector<8x32xf32>
    %985 = math.tanh %984 : vector<8x32xf32>
    %986 = arith.mulf %985, %597 : vector<8x32xf32>
    %cst_184 = arith.constant dense<0.000000e+00> : vector<8xf32>
    %987 = vector.multi_reduction <add>, %986, %cst_184 [1] : vector<8x32xf32> to vector<8xf32>
    %988 = vector.shape_cast %987 : vector<8xf32> to vector<8x1xf32>
    %989 = arith.addf %988, %594 : vector<8x1xf32>
    %cst_185 = arith.constant dense<0xFF800000> : vector<1xf32>
    %990 = vector.multi_reduction <maximumf>, %989, %cst_185 [0] : vector<8x1xf32> to vector<1xf32>
    %991 = vector.shape_cast %990 : vector<1xf32> to vector<1x1xf32>
    %992 = vector.broadcast %991 : vector<1x1xf32> to vector<8x1xf32>
    %993 = arith.subf %989, %992 : vector<8x1xf32>
    %994 = math.exp %993 : vector<8x1xf32>
    %cst_186 = arith.constant dense<0.000000e+00> : vector<1xf32>
    %995 = vector.multi_reduction <add>, %994, %cst_186 [0] : vector<8x1xf32> to vector<1xf32>
    %996 = vector.shape_cast %995 : vector<1xf32> to vector<1x1xf32>
    %997 = vector.broadcast %996 : vector<1x1xf32> to vector<8x1xf32>
    %998 = arith.divf %994, %997 : vector<8x1xf32>
    %999 = vector.broadcast %998 : vector<8x1xf32> to vector<8x64xf32>
    %1000 = arith.mulf %999, %588 : vector<8x64xf32>
    %cst_187 = arith.constant dense<0.000000e+00> : vector<64xf32>
    %1001 = vector.multi_reduction <add>, %1000, %cst_187 [0] : vector<8x64xf32> to vector<64xf32>
    %1002 = vector.shape_cast %1001 : vector<64xf32> to vector<1x64xf32>
    %1003 = tpu.concatenate %980, %1002 in 0 : vector<1x64xf32>, vector<1x64xf32> -> vector<2x64xf32>
    %1004 = vector.extract_strided_slice %29 {offsets = [10, 0], sizes = [2, 96], strides = [1, 1]} : vector<16x96xf32> to vector<2x96xf32>
    %cst_188 = arith.constant dense<0.000000e+00> : vector<2x96xf32>
    %1005 = tpu.matmul %1003, %13, %cst_188 {dimension_numbers = #tpu.dot_dimension_numbers<[1], [0], [0], [1], [0, 0, 1, 1], [], []>} : vector<2x64xf32>, vector<64x96xf32>, vector<2x96xf32> -> vector<2x96xf32>
    %1006 = arith.addf %1004, %1005 : vector<2x96xf32>
    %cst_189 = arith.constant dense<0.000000e+00> : vector<2x96xf32>
    %1007 = tpu.matmul %957, %8, %cst_189 {dimension_numbers = #tpu.dot_dimension_numbers<[1], [0], [0], [1], [0, 0, 1, 1], [], []>} : vector<2x32xf32>, vector<32x96xf32>, vector<2x96xf32> -> vector<2x96xf32>
    %1008 = arith.addf %1007, %9 : vector<2x96xf32>
    %1009 = vector.extract_strided_slice %1006 {offsets = [0, 0], sizes = [2, 64], strides = [1, 1]} : vector<2x96xf32> to vector<2x64xf32>
    %1010 = vector.extract_strided_slice %1008 {offsets = [0, 0], sizes = [2, 64], strides = [1, 1]} : vector<2x96xf32> to vector<2x64xf32>
    %1011 = arith.addf %1009, %1010 : vector<2x64xf32>
    %1012 = arith.negf %1011 : vector<2x64xf32>
    %1013 = math.exp %1012 : vector<2x64xf32>
    %cst_190 = arith.constant 1.000000e+00 : f32
    %1014 = vector.broadcast %cst_190 : f32 to vector<2x64xf32>
    %1015 = arith.addf %1014, %1013 : vector<2x64xf32>
    %1016 = arith.divf %1014, %1015 : vector<2x64xf32>
    %1017 = vector.extract_strided_slice %1006 {offsets = [0, 64], sizes = [2, 32], strides = [1, 1]} : vector<2x96xf32> to vector<2x32xf32>
    %1018 = vector.extract_strided_slice %1016 {offsets = [0, 0], sizes = [2, 32], strides = [1, 1]} : vector<2x64xf32> to vector<2x32xf32>
    %1019 = vector.extract_strided_slice %1008 {offsets = [0, 64], sizes = [2, 32], strides = [1, 1]} : vector<2x96xf32> to vector<2x32xf32>
    %1020 = arith.mulf %1018, %1019 : vector<2x32xf32>
    %1021 = arith.addf %1017, %1020 : vector<2x32xf32>
    %1022 = math.tanh %1021 : vector<2x32xf32>
    %1023 = vector.extract_strided_slice %1016 {offsets = [0, 32], sizes = [2, 32], strides = [1, 1]} : vector<2x64xf32> to vector<2x32xf32>
    %cst_191 = arith.constant 1.000000e+00 : f32
    %1024 = vector.broadcast %cst_191 : f32 to vector<2x32xf32>
    %1025 = arith.subf %1024, %1023 : vector<2x32xf32>
    %1026 = arith.mulf %1025, %1022 : vector<2x32xf32>
    %1027 = vector.extract_strided_slice %1016 {offsets = [0, 32], sizes = [2, 32], strides = [1, 1]} : vector<2x64xf32> to vector<2x32xf32>
    %1028 = arith.mulf %1027, %957 : vector<2x32xf32>
    %1029 = arith.addf %1026, %1028 : vector<2x32xf32>
    %cst_192 = arith.constant dense<0.000000e+00> : vector<2x32xf32>
    %1030 = tpu.matmul %1029, %10, %cst_192 {dimension_numbers = #tpu.dot_dimension_numbers<[1], [0], [0], [1], [0, 0, 1, 1], [], []>} : vector<2x32xf32>, vector<32x32xf32>, vector<2x32xf32> -> vector<2x32xf32>
    %1031 = vector.extract_strided_slice %1030 {offsets = [0, 0], sizes = [1, 32], strides = [1, 1]} : vector<2x32xf32> to vector<1x32xf32>
    %1032 = vector.shape_cast %1031 : vector<1x32xf32> to vector<1x32xf32>
    %1033 = vector.broadcast %1032 : vector<1x32xf32> to vector<8x32xf32>
    %1034 = arith.addf %1033, %591 : vector<8x32xf32>
    %1035 = math.tanh %1034 : vector<8x32xf32>
    %1036 = arith.mulf %1035, %597 : vector<8x32xf32>
    %cst_193 = arith.constant dense<0.000000e+00> : vector<8xf32>
    %1037 = vector.multi_reduction <add>, %1036, %cst_193 [1] : vector<8x32xf32> to vector<8xf32>
    %1038 = vector.shape_cast %1037 : vector<8xf32> to vector<8x1xf32>
    %1039 = arith.addf %1038, %593 : vector<8x1xf32>
    %cst_194 = arith.constant dense<0xFF800000> : vector<1xf32>
    %1040 = vector.multi_reduction <maximumf>, %1039, %cst_194 [0] : vector<8x1xf32> to vector<1xf32>
    %1041 = vector.shape_cast %1040 : vector<1xf32> to vector<1x1xf32>
    %1042 = vector.broadcast %1041 : vector<1x1xf32> to vector<8x1xf32>
    %1043 = arith.subf %1039, %1042 : vector<8x1xf32>
    %1044 = math.exp %1043 : vector<8x1xf32>
    %cst_195 = arith.constant dense<0.000000e+00> : vector<1xf32>
    %1045 = vector.multi_reduction <add>, %1044, %cst_195 [0] : vector<8x1xf32> to vector<1xf32>
    %1046 = vector.shape_cast %1045 : vector<1xf32> to vector<1x1xf32>
    %1047 = vector.broadcast %1046 : vector<1x1xf32> to vector<8x1xf32>
    %1048 = arith.divf %1044, %1047 : vector<8x1xf32>
    %1049 = vector.broadcast %1048 : vector<8x1xf32> to vector<8x64xf32>
    %1050 = arith.mulf %1049, %569 : vector<8x64xf32>
    %cst_196 = arith.constant dense<0.000000e+00> : vector<64xf32>
    %1051 = vector.multi_reduction <add>, %1050, %cst_196 [0] : vector<8x64xf32> to vector<64xf32>
    %1052 = vector.shape_cast %1051 : vector<64xf32> to vector<1x64xf32>
    %1053 = vector.extract_strided_slice %1030 {offsets = [1, 0], sizes = [1, 32], strides = [1, 1]} : vector<2x32xf32> to vector<1x32xf32>
    %1054 = vector.shape_cast %1053 : vector<1x32xf32> to vector<1x32xf32>
    %1055 = vector.broadcast %1054 : vector<1x32xf32> to vector<8x32xf32>
    %1056 = arith.addf %1055, %592 : vector<8x32xf32>
    %1057 = math.tanh %1056 : vector<8x32xf32>
    %1058 = arith.mulf %1057, %597 : vector<8x32xf32>
    %cst_197 = arith.constant dense<0.000000e+00> : vector<8xf32>
    %1059 = vector.multi_reduction <add>, %1058, %cst_197 [1] : vector<8x32xf32> to vector<8xf32>
    %1060 = vector.shape_cast %1059 : vector<8xf32> to vector<8x1xf32>
    %1061 = arith.addf %1060, %594 : vector<8x1xf32>
    %cst_198 = arith.constant dense<0xFF800000> : vector<1xf32>
    %1062 = vector.multi_reduction <maximumf>, %1061, %cst_198 [0] : vector<8x1xf32> to vector<1xf32>
    %1063 = vector.shape_cast %1062 : vector<1xf32> to vector<1x1xf32>
    %1064 = vector.broadcast %1063 : vector<1x1xf32> to vector<8x1xf32>
    %1065 = arith.subf %1061, %1064 : vector<8x1xf32>
    %1066 = math.exp %1065 : vector<8x1xf32>
    %cst_199 = arith.constant dense<0.000000e+00> : vector<1xf32>
    %1067 = vector.multi_reduction <add>, %1066, %cst_199 [0] : vector<8x1xf32> to vector<1xf32>
    %1068 = vector.shape_cast %1067 : vector<1xf32> to vector<1x1xf32>
    %1069 = vector.broadcast %1068 : vector<1x1xf32> to vector<8x1xf32>
    %1070 = arith.divf %1066, %1069 : vector<8x1xf32>
    %1071 = vector.broadcast %1070 : vector<8x1xf32> to vector<8x64xf32>
    %1072 = arith.mulf %1071, %588 : vector<8x64xf32>
    %cst_200 = arith.constant dense<0.000000e+00> : vector<64xf32>
    %1073 = vector.multi_reduction <add>, %1072, %cst_200 [0] : vector<8x64xf32> to vector<64xf32>
    %1074 = vector.shape_cast %1073 : vector<64xf32> to vector<1x64xf32>
    %1075 = tpu.concatenate %1052, %1074 in 0 : vector<1x64xf32>, vector<1x64xf32> -> vector<2x64xf32>
    %1076 = vector.extract_strided_slice %29 {offsets = [12, 0], sizes = [2, 96], strides = [1, 1]} : vector<16x96xf32> to vector<2x96xf32>
    %cst_201 = arith.constant dense<0.000000e+00> : vector<2x96xf32>
    %1077 = tpu.matmul %1075, %13, %cst_201 {dimension_numbers = #tpu.dot_dimension_numbers<[1], [0], [0], [1], [0, 0, 1, 1], [], []>} : vector<2x64xf32>, vector<64x96xf32>, vector<2x96xf32> -> vector<2x96xf32>
    %1078 = arith.addf %1076, %1077 : vector<2x96xf32>
    %cst_202 = arith.constant dense<0.000000e+00> : vector<2x96xf32>
    %1079 = tpu.matmul %1029, %8, %cst_202 {dimension_numbers = #tpu.dot_dimension_numbers<[1], [0], [0], [1], [0, 0, 1, 1], [], []>} : vector<2x32xf32>, vector<32x96xf32>, vector<2x96xf32> -> vector<2x96xf32>
    %1080 = arith.addf %1079, %9 : vector<2x96xf32>
    %1081 = vector.extract_strided_slice %1078 {offsets = [0, 0], sizes = [2, 64], strides = [1, 1]} : vector<2x96xf32> to vector<2x64xf32>
    %1082 = vector.extract_strided_slice %1080 {offsets = [0, 0], sizes = [2, 64], strides = [1, 1]} : vector<2x96xf32> to vector<2x64xf32>
    %1083 = arith.addf %1081, %1082 : vector<2x64xf32>
    %1084 = arith.negf %1083 : vector<2x64xf32>
    %1085 = math.exp %1084 : vector<2x64xf32>
    %cst_203 = arith.constant 1.000000e+00 : f32
    %1086 = vector.broadcast %cst_203 : f32 to vector<2x64xf32>
    %1087 = arith.addf %1086, %1085 : vector<2x64xf32>
    %1088 = arith.divf %1086, %1087 : vector<2x64xf32>
    %1089 = vector.extract_strided_slice %1078 {offsets = [0, 64], sizes = [2, 32], strides = [1, 1]} : vector<2x96xf32> to vector<2x32xf32>
    %1090 = vector.extract_strided_slice %1088 {offsets = [0, 0], sizes = [2, 32], strides = [1, 1]} : vector<2x64xf32> to vector<2x32xf32>
    %1091 = vector.extract_strided_slice %1080 {offsets = [0, 64], sizes = [2, 32], strides = [1, 1]} : vector<2x96xf32> to vector<2x32xf32>
    %1092 = arith.mulf %1090, %1091 : vector<2x32xf32>
    %1093 = arith.addf %1089, %1092 : vector<2x32xf32>
    %1094 = math.tanh %1093 : vector<2x32xf32>
    %1095 = vector.extract_strided_slice %1088 {offsets = [0, 32], sizes = [2, 32], strides = [1, 1]} : vector<2x64xf32> to vector<2x32xf32>
    %cst_204 = arith.constant 1.000000e+00 : f32
    %1096 = vector.broadcast %cst_204 : f32 to vector<2x32xf32>
    %1097 = arith.subf %1096, %1095 : vector<2x32xf32>
    %1098 = arith.mulf %1097, %1094 : vector<2x32xf32>
    %1099 = vector.extract_strided_slice %1088 {offsets = [0, 32], sizes = [2, 32], strides = [1, 1]} : vector<2x64xf32> to vector<2x32xf32>
    %1100 = arith.mulf %1099, %1029 : vector<2x32xf32>
    %1101 = arith.addf %1098, %1100 : vector<2x32xf32>
    %cst_205 = arith.constant dense<0.000000e+00> : vector<2x32xf32>
    %1102 = tpu.matmul %1101, %10, %cst_205 {dimension_numbers = #tpu.dot_dimension_numbers<[1], [0], [0], [1], [0, 0, 1, 1], [], []>} : vector<2x32xf32>, vector<32x32xf32>, vector<2x32xf32> -> vector<2x32xf32>
    %1103 = vector.extract_strided_slice %1102 {offsets = [0, 0], sizes = [1, 32], strides = [1, 1]} : vector<2x32xf32> to vector<1x32xf32>
    %1104 = vector.shape_cast %1103 : vector<1x32xf32> to vector<1x32xf32>
    %1105 = vector.broadcast %1104 : vector<1x32xf32> to vector<8x32xf32>
    %1106 = arith.addf %1105, %591 : vector<8x32xf32>
    %1107 = math.tanh %1106 : vector<8x32xf32>
    %1108 = arith.mulf %1107, %597 : vector<8x32xf32>
    %cst_206 = arith.constant dense<0.000000e+00> : vector<8xf32>
    %1109 = vector.multi_reduction <add>, %1108, %cst_206 [1] : vector<8x32xf32> to vector<8xf32>
    %1110 = vector.shape_cast %1109 : vector<8xf32> to vector<8x1xf32>
    %1111 = arith.addf %1110, %593 : vector<8x1xf32>
    %cst_207 = arith.constant dense<0xFF800000> : vector<1xf32>
    %1112 = vector.multi_reduction <maximumf>, %1111, %cst_207 [0] : vector<8x1xf32> to vector<1xf32>
    %1113 = vector.shape_cast %1112 : vector<1xf32> to vector<1x1xf32>
    %1114 = vector.broadcast %1113 : vector<1x1xf32> to vector<8x1xf32>
    %1115 = arith.subf %1111, %1114 : vector<8x1xf32>
    %1116 = math.exp %1115 : vector<8x1xf32>
    %cst_208 = arith.constant dense<0.000000e+00> : vector<1xf32>
    %1117 = vector.multi_reduction <add>, %1116, %cst_208 [0] : vector<8x1xf32> to vector<1xf32>
    %1118 = vector.shape_cast %1117 : vector<1xf32> to vector<1x1xf32>
    %1119 = vector.broadcast %1118 : vector<1x1xf32> to vector<8x1xf32>
    %1120 = arith.divf %1116, %1119 : vector<8x1xf32>
    %1121 = vector.broadcast %1120 : vector<8x1xf32> to vector<8x64xf32>
    %1122 = arith.mulf %1121, %569 : vector<8x64xf32>
    %cst_209 = arith.constant dense<0.000000e+00> : vector<64xf32>
    %1123 = vector.multi_reduction <add>, %1122, %cst_209 [0] : vector<8x64xf32> to vector<64xf32>
    %1124 = vector.shape_cast %1123 : vector<64xf32> to vector<1x64xf32>
    %1125 = vector.extract_strided_slice %1102 {offsets = [1, 0], sizes = [1, 32], strides = [1, 1]} : vector<2x32xf32> to vector<1x32xf32>
    %1126 = vector.shape_cast %1125 : vector<1x32xf32> to vector<1x32xf32>
    %1127 = vector.broadcast %1126 : vector<1x32xf32> to vector<8x32xf32>
    %1128 = arith.addf %1127, %592 : vector<8x32xf32>
    %1129 = math.tanh %1128 : vector<8x32xf32>
    %1130 = arith.mulf %1129, %597 : vector<8x32xf32>
    %cst_210 = arith.constant dense<0.000000e+00> : vector<8xf32>
    %1131 = vector.multi_reduction <add>, %1130, %cst_210 [1] : vector<8x32xf32> to vector<8xf32>
    %1132 = vector.shape_cast %1131 : vector<8xf32> to vector<8x1xf32>
    %1133 = arith.addf %1132, %594 : vector<8x1xf32>
    %cst_211 = arith.constant dense<0xFF800000> : vector<1xf32>
    %1134 = vector.multi_reduction <maximumf>, %1133, %cst_211 [0] : vector<8x1xf32> to vector<1xf32>
    %1135 = vector.shape_cast %1134 : vector<1xf32> to vector<1x1xf32>
    %1136 = vector.broadcast %1135 : vector<1x1xf32> to vector<8x1xf32>
    %1137 = arith.subf %1133, %1136 : vector<8x1xf32>
    %1138 = math.exp %1137 : vector<8x1xf32>
    %cst_212 = arith.constant dense<0.000000e+00> : vector<1xf32>
    %1139 = vector.multi_reduction <add>, %1138, %cst_212 [0] : vector<8x1xf32> to vector<1xf32>
    %1140 = vector.shape_cast %1139 : vector<1xf32> to vector<1x1xf32>
    %1141 = vector.broadcast %1140 : vector<1x1xf32> to vector<8x1xf32>
    %1142 = arith.divf %1138, %1141 : vector<8x1xf32>
    %1143 = vector.broadcast %1142 : vector<8x1xf32> to vector<8x64xf32>
    %1144 = arith.mulf %1143, %588 : vector<8x64xf32>
    %cst_213 = arith.constant dense<0.000000e+00> : vector<64xf32>
    %1145 = vector.multi_reduction <add>, %1144, %cst_213 [0] : vector<8x64xf32> to vector<64xf32>
    %1146 = vector.shape_cast %1145 : vector<64xf32> to vector<1x64xf32>
    %1147 = tpu.concatenate %1124, %1146 in 0 : vector<1x64xf32>, vector<1x64xf32> -> vector<2x64xf32>
    %1148 = vector.extract_strided_slice %29 {offsets = [14, 0], sizes = [2, 96], strides = [1, 1]} : vector<16x96xf32> to vector<2x96xf32>
    %cst_214 = arith.constant dense<0.000000e+00> : vector<2x96xf32>
    %1149 = tpu.matmul %1147, %13, %cst_214 {dimension_numbers = #tpu.dot_dimension_numbers<[1], [0], [0], [1], [0, 0, 1, 1], [], []>} : vector<2x64xf32>, vector<64x96xf32>, vector<2x96xf32> -> vector<2x96xf32>
    %1150 = arith.addf %1148, %1149 : vector<2x96xf32>
    %cst_215 = arith.constant dense<0.000000e+00> : vector<2x96xf32>
    %1151 = tpu.matmul %1101, %8, %cst_215 {dimension_numbers = #tpu.dot_dimension_numbers<[1], [0], [0], [1], [0, 0, 1, 1], [], []>} : vector<2x32xf32>, vector<32x96xf32>, vector<2x96xf32> -> vector<2x96xf32>
    %1152 = arith.addf %1151, %9 : vector<2x96xf32>
    %1153 = vector.extract_strided_slice %1150 {offsets = [0, 0], sizes = [2, 64], strides = [1, 1]} : vector<2x96xf32> to vector<2x64xf32>
    %1154 = vector.extract_strided_slice %1152 {offsets = [0, 0], sizes = [2, 64], strides = [1, 1]} : vector<2x96xf32> to vector<2x64xf32>
    %1155 = arith.addf %1153, %1154 : vector<2x64xf32>
    %1156 = arith.negf %1155 : vector<2x64xf32>
    %1157 = math.exp %1156 : vector<2x64xf32>
    %cst_216 = arith.constant 1.000000e+00 : f32
    %1158 = vector.broadcast %cst_216 : f32 to vector<2x64xf32>
    %1159 = arith.addf %1158, %1157 : vector<2x64xf32>
    %1160 = arith.divf %1158, %1159 : vector<2x64xf32>
    %1161 = vector.extract_strided_slice %1150 {offsets = [0, 64], sizes = [2, 32], strides = [1, 1]} : vector<2x96xf32> to vector<2x32xf32>
    %1162 = vector.extract_strided_slice %1160 {offsets = [0, 0], sizes = [2, 32], strides = [1, 1]} : vector<2x64xf32> to vector<2x32xf32>
    %1163 = vector.extract_strided_slice %1152 {offsets = [0, 64], sizes = [2, 32], strides = [1, 1]} : vector<2x96xf32> to vector<2x32xf32>
    %1164 = arith.mulf %1162, %1163 : vector<2x32xf32>
    %1165 = arith.addf %1161, %1164 : vector<2x32xf32>
    %1166 = math.tanh %1165 : vector<2x32xf32>
    %1167 = vector.extract_strided_slice %1160 {offsets = [0, 32], sizes = [2, 32], strides = [1, 1]} : vector<2x64xf32> to vector<2x32xf32>
    %cst_217 = arith.constant 1.000000e+00 : f32
    %1168 = vector.broadcast %cst_217 : f32 to vector<2x32xf32>
    %1169 = arith.subf %1168, %1167 : vector<2x32xf32>
    %1170 = arith.mulf %1169, %1166 : vector<2x32xf32>
    %1171 = vector.extract_strided_slice %1160 {offsets = [0, 32], sizes = [2, 32], strides = [1, 1]} : vector<2x64xf32> to vector<2x32xf32>
    %1172 = arith.mulf %1171, %1101 : vector<2x32xf32>
    %1173 = arith.addf %1170, %1172 : vector<2x32xf32>
    %1174 = tpu.concatenate %669, %741, %813, %885, %957, %1029, %1101, %1173 in 0 : vector<2x32xf32>, vector<2x32xf32>, vector<2x32xf32>, vector<2x32xf32>, vector<2x32xf32>, vector<2x32xf32>, vector<2x32xf32>, vector<2x32xf32> -> vector<16x32xf32>
    %1175 = tpu.concatenate %643, %715, %787, %859, %931, %1003, %1075, %1147 in 0 : vector<2x64xf32>, vector<2x64xf32>, vector<2x64xf32>, vector<2x64xf32>, vector<2x64xf32>, vector<2x64xf32>, vector<2x64xf32>, vector<2x64xf32> -> vector<16x64xf32>
    %c0_218 = arith.constant 0 : index
    %c0_219 = arith.constant 0 : index
    %1176 = vector.load %arg22[%c0_218, %c0_219] : memref<16x32xf32, #tpu.memory_space<vmem>>, vector<16x32xf32>
    tpu.vector_store %arg22[%c0_218, %c0_219], %1174 {strides = array<i32>} : memref<16x32xf32, #tpu.memory_space<vmem>>, vector<16x32xf32>,
    %c0_220 = arith.constant 0 : index
    %c0_221 = arith.constant 0 : index
    %1177 = vector.load %arg23[%c0_220, %c0_221] : memref<2x32xf32, #tpu.memory_space<vmem>>, vector<2x32xf32>
    tpu.vector_store %arg23[%c0_220, %c0_221], %1173 {strides = array<i32>} : memref<2x32xf32, #tpu.memory_space<vmem>>, vector<2x32xf32>,
    %1178 = tpu.concatenate %1, %1174, %1175 in 1 : vector<16x32xf32>, vector<16x32xf32>, vector<16x64xf32> -> vector<16x128xf32>
    %cst_222 = arith.constant dense<0.000000e+00> : vector<16x32xf32>
    %1179 = tpu.matmul %1178, %14, %cst_222 {dimension_numbers = #tpu.dot_dimension_numbers<[1], [0], [0], [1], [0, 0, 1, 1], [], []>} : vector<16x128xf32>, vector<128x32xf32>, vector<16x32xf32> -> vector<16x32xf32>
    %c0_223 = arith.constant 0 : index
    %c0_224 = arith.constant 0 : index
    %1180 = vector.load %arg24[%c0_223, %c0_224] : memref<16x32xf32, #tpu.memory_space<vmem>>, vector<16x32xf32>
    tpu.vector_store %arg24[%c0_223, %c0_224], %1179 {strides = array<i32>} : memref<16x32xf32, #tpu.memory_space<vmem>>, vector<16x32xf32>,
    return
  }
}

</mosaic_0001>

<bundles_post_ra>
// kernel: encoder_decoder_forward.1
= control target key start
LH: loop header
LB: loop body
LE: loop exit
PB: predicated region body
PF: predicated region fallthrough
CT: control target
= control target key end

     0   :  { %s8543_s0 = inlined_call_operand.vmem [shape: f32[16,32], index: 0, kind: input, shape index: {}]   ;;  %s8544_s1 = inlined_call_operand.vmem [shape: f32[16,32], index: 1, kind: input, shape index: {}]   ;;  %s8545_s2 = inlined_call_operand.vmem [shape: f32[8,2,32], index: 2, kind: input, shape index: {}]   ;;  %s8546_s3 = inlined_call_operand.vmem [shape: f32[16,1], index: 3, kind: input, shape index: {}]   ;;  %s8547_s4 = inlined_call_operand.vmem [shape: f32[32,96], index: 4, kind: input, shape index: {}]   ;;  %s8548_s5 = inlined_call_operand.vmem [shape: f32[32,96], index: 5, kind: input, shape index: {}]   ;;  %s8549_s6 = inlined_call_operand.vmem [shape: f32[1,96], index: 6, kind: input, shape index: {}]   ;;  %s8550_s7 = inlined_call_operand.vmem [shape: f32[2,96], index: 7, kind: input, shape index: {}]   ;;  %s8551_s8 = inlined_call_operand.vmem [shape: f32[32,96], index: 8, kind: input, shape index: {}]   ;;  %s8552_s9 = inlined_call_operand.vmem [shape: f32[32,96], index: 9, kind: input, shape index: {}]   ;;  %s8553_s10 = inlined_call_operand.vmem [shape: f32[1,96], index: 10, kind: input, shape index: {}]   ;;  %s8554_s11 = inlined_call_operand.vmem [shape: f32[2,96], index: 11, kind: input, shape index: {}]   ;;  %s8555_s12 = inlined_call_operand.vmem [shape: f32[64,32], index: 12, kind: input, shape index: {}]   ;;  %s8556_s13 = inlined_call_operand.vmem [shape: f32[1,32], index: 13, kind: input, shape index: {}]   ;;  %s8557_s14 = inlined_call_operand.vmem [shape: f32[64,32], index: 14, kind: input, shape index: {}]   ;;  %s8558_s15 = inlined_call_operand.vmem [shape: f32[32,32], index: 15, kind: input, shape index: {}]   ;;  %s8559_s16 = inlined_call_operand.vmem [shape: f32[1,32], index: 16, kind: input, shape index: {}]   ;;  %s8560_s17 = inlined_call_operand.vmem [shape: f32[96,96], index: 17, kind: input, shape index: {}]   ;;  %s8561_s18 = inlined_call_operand.vmem [shape: f32[32,96], index: 18, kind: input, shape index: {}]   ;;  %s8562_s19 = inlined_call_operand.vmem [shape: f32[1,96], index: 19, kind: input, shape index: {}]   ;;  %s8563_s20 = inlined_call_operand.vmem [shape: f32[2,96], index: 20, kind: input, shape index: {}]   ;;  %s8564_s21 = inlined_call_operand.vmem [shape: f32[128,32], index: 21, kind: input, shape index: {}]   ;;  %s8565_s22 = inlined_call_operand.vmem [shape: f32[16,32], index: 22, kind: output, shape index: {0}]   ;;  %s8566_s23 = inlined_call_operand.hbm [shape: f32[2,32], index: 23, kind: output, shape index: {1}]   ;;  %s8567_s24 = inlined_call_operand.vmem [shape: f32[16,32], index: 24, kind: output, shape index: {2}]  }
   0x1   :  { %8576 = sst [smem:[#allocation5_spill]] %s8543_s0 }
   0x2   :  { %8577 = sst [smem:[#allocation6_spill]] %s8544_s1 }
   0x3   :  { %8578 = sst [smem:[#allocation7_spill]] %s8545_s2 }
   0x4   :  { %8579 = sst [smem:[#allocation8_spill]] %s8546_s3 }
   0x5   :  { %8580 = sst [smem:[#allocation9_spill]] %s8547_s4 }
   0x6   :  { %8581 = sst [smem:[#allocation10_spill]] %s8548_s5 }
   0x7   :  { %8582 = sst [smem:[#allocation11_spill]] %s8549_s6 }
   0x8   :  { %8583 = sst [smem:[#allocation12_spill]] %s8550_s7 }
   0x9   :  { %8584 = sst [smem:[#allocation13_spill]] %s8551_s8 }
   0xa   :  { %s8585_s27 = sld [smem:[#allocation9_spill]]  ;;  %s8586_s0 = sld [smem:[#allocation10_spill]]  ;;  %vm155_vm0 = vcmask 261120   ;;  %v7013_v4 = vmov 0.0|0.0   ;;  %vm7014_vm1 = vmmov 0   ;;  %v7015_v13 = vmov 0.0  }
   0xb   :  { %6371 = vmatprep.subr.bf16.mxu1 %v7013_v4  ;;  %s8587_s29 = sld [smem:[#allocation5_spill]]  ;;  %5778 = vmatprep.mubr.msk.f32.mxu1 %vm7014_vm1, %v7015_v13 }
   0xc   :  { %s8588_s30 = sld [smem:[#allocation13_spill]] }
  0x10   :  { %v144_v0 = vld [vmem:[%s8585_s27] sm:$0xff]  ;;  %v145_v1 = vld [vmem:[%s8585_s27 + $0x8] sm:$0xff]  ;;  %v146_v6 = vld [vmem:[%s8585_s27 + $0x10] sm:$0xff] }
  0x11   :  { %v89_v2 = vld [vmem:[%s8586_s0] sm:$0xff]  ;;  %v6347_v3 = vpack.c.bf16 %v145_v1, %v144_v0  ;;  %v90_v5 = vld [vmem:[%s8586_s0 + $0x8] sm:$0xff]  ;;  %v147_v7 = vld [vmem:[%s8585_s27 + $0x18] sm:$0xff] }
  0x12   :  { %v7165_v8 = vpack.c.bf16 %v90_v5, %v89_v2  ;;  %v6351_v9 = vpack.c.bf16 %v147_v7, %v146_v6  ;;  %v91_v10 = vld [vmem:[%s8586_s0 + $0x10] sm:$0xff]  ;;  %v92_v11 = vld [vmem:[%s8586_s0 + $0x18] sm:$0xff]  ;;  %v75_v12 = vld [vmem:[%s8587_s29] sm:$0xff] }
  0x13   :  { %6348 = vmatprep.subr.bf16.mxu0 %v6347_v3  ;;  %5745 = vmatprep.mubr.msk.f32.mxu0 %vm155_vm0, %v75_v12  ;;  %v237_v14 = vld [vmem:[%s8588_s30] sm:$0xff]  ;;  %v238_v15 = vld [vmem:[%s8588_s30 + $0x8] sm:$0xff]  ;;  %v7186_v16 = vpack.c.bf16 %v92_v11, %v91_v10  ;;  %v239_v18 = vld [vmem:[%s8588_s30 + $0x10] sm:$0xff] }
  0x14   :  { %6350 = vmatpush3.bf16.msra.mxu0 %v6347_v3  ;;  %6373 = vmatpush3.bf16.msra.mxu1 %v7165_v8  ;;  %v6355_v17 = vpack.c.bf16 %v238_v15, %v237_v14  ;;  %v240_v19 = vld [vmem:[%s8588_s30 + $0x18] sm:$0xff]  ;;  %v76_v20 = vld [vmem:[%s8587_s29 + $0x8] sm:$0xff] }
  0x15   :  { %6352 = vmatprep.subr.bf16.mxu0 %v6351_v9  ;;  %6374 = vmatprep.subr.bf16.mxu1 %v7013_v4 }
  0x18   :  { %6354 = vmatpush3.bf16.msra.mxu0 %v6351_v9  ;;  %6376 = vmatpush3.bf16.msra.mxu1 %v7186_v16 }
  0x19   :  { %30 = vsyncpa [#allocation3], 0  ;;  %6356 = vmatprep.subr.bf16.mxu0 %v6355_v17  ;;  %v6359_v21 = vpack.c.bf16 %v240_v19, %v239_v18  ;;  %6383 = vmatprep.subr.bf16.mxu1 %v7013_v4  ;;  %v116_v22 = vld [vmem:[%s8560_s17] sm:$0xff]  ;;  %v117_v23 = vld [vmem:[%s8560_s17 + $0x8] sm:$0xff]  ;;  %s8589_s8 = sld [smem:[#allocation6_spill]]  ;;  %s8590_s3 = sld [smem:[#allocation11_spill]] }
  0x1a   :  { %v6363_v24 = vpack.c.bf16 %v117_v23, %v116_v22  ;;  %v118_v25 = vld [vmem:[%s8560_s17 + $0x10] sm:$0xff]  ;;  %v119_v26 = vld [vmem:[%s8560_s17 + $0x18] sm:$0xff]  ;;  %v94_v29 = vld [vmem:[%s8552_s9] sm:$0xff]  ;;  %s8591_s6 = sld [smem:[#allocation12_spill]]  ;;  %s7016_s2 = smov 64   ;;  %vm2333_vm2 = vcmask 1040384  }
  0x1b   :  { %5746 = vmatmul.mubr.msk.f32.vlgmr.msra.gmra.mrb[0].mxu0 %vm155_vm0, %v76_v20  ;;  %5779 = vmatmul.mubr.f32.vlgmr.msra.gmra.mrb[0].mxu1 %v7015_v13  ;;  %v6367_v27 = vpack.c.bf16 %v119_v26, %v118_v25  ;;  %v95_v30 = vld [vmem:[%s8552_s9 + $0x8] sm:$0xff]  ;;  %v96_v33 = vld [vmem:[%s8552_s9 + $0x10] sm:$0xff]  ;;  %v97_v34 = vld [vmem:[%s8552_s9 + $0x18] sm:$0xff]  ;;  %s7017_s27 = smov 96   ;;  %s8592_s9 = sld [smem:[#allocation7_spill]]  ;;  %vm2335_vm3 = vcmask 1041408  }
  0x1c   :  { %6358 = vmatpush3.bf16.msra.mxu0 %v6355_v17  ;;  %5756 = vmatprep.mubr.msk.f32.mxu0 %vm155_vm0, %v75_v12  ;;  %v7235_v32 = vpack.c.bf16 %v95_v30, %v94_v29  ;;  %v7246_v35 = vpack.c.bf16 %v97_v34, %v96_v33  ;;  %v5377_v42 = vld [vmem:[%s8553_s10] ss:$0 sm:$0xff]  ;;  %s7018_s25 = smov 32   ;;  %vm2337_vm4 = vcmask 1042432   ;;  %vm2339_vm5 = vcmask 1043456  }
  0x1d   :  { %6360 = vmatprep.subr.bf16.mxu0 %v6359_v21  ;;  %6385 = vmatpush3.bf16.msra.mxu1 %v7165_v8  ;;  %v5380_v46 = vld [vmem:[%s8562_s19] ss:$0 sm:$0xff]  ;;  %vm2341_vm6 = vcmask 1044480   ;;  %vm2343_vm7 = vcmask 1045504   ;;  %vm2345_vm8 = vcmask 1046528   ;;  %vm2237_vm9 = vcmask 523264  }
  0x1e   :  { %6386 = vmatprep.subr.bf16.mxu1 %v7013_v4  ;;  %5800 = vmatprep.mubr.msk.f32.mxu1 %vm7014_vm1, %v7015_v13  ;;  %v7280_v50 = vld [vmem:[%s8554_s11] sm:$0x3]  ;;  %vm2601_vm10 = vcmask 7168   ;;  %vm5261_vm11 = vcmask 261126  }
  0x1f   :  { %v77_v28 = vld [vmem:[%s8589_s8] sm:$0xff]  ;;  %v78_v31 = vld [vmem:[%s8589_s8 + $0x8] sm:$0xff] }
  0x20   :  { %6362 = vmatpush3.bf16.msra.mxu0 %v6359_v21  ;;  %v5374_v36 = vld [vmem:[%s8590_s3] ss:$0 sm:$0xff] }
  0x21   :  { %6364 = vmatprep.subr.bf16.mxu0 %v6363_v24  ;;  %6388 = vmatpush3.bf16.msra.mxu1 %v7186_v16  ;;  %v7286_v55 = vld [vmem:[%s8591_s6] sm:$0x3]  ;;  %v7308_v30 = vld [vmem:[%s8592_s9 + $0xe] sm:$0x3] }
  0x22   :  { %6395 = vmatprep.subr.bf16.mxu1 %v7013_v4  ;;  %v622_v33 = vsub.f32 1.0, %v7308_v30 }
  0x23   :  { %5757 = vmatmul.mubr.msk.f32.vlgmr.msra.gmra.mrb[2].mxu0 %vm155_vm0, %v76_v20 }
  0x24   :  { %6366 = vmatpush3.bf16.msra.mxu0 %v6363_v24  ;;  %5767 = vmatprep.mubr.msk.f32.mxu0 %vm155_vm0, %v77_v28 }
  0x25   :  { %6368 = vmatprep.subr.bf16.mxu0 %v6367_v27 }
  0x28   :  { %6370 = vmatpush3.bf16.msra.mxu0 %v6367_v27 }
  0x29   :  { %6377 = vmatprep.subr.bf16.mxu0 %v7013_v4 }
  0x2b   :  { %5768 = vmatmul.mubr.msk.f32.vlgmr.msra.gmra.mrb[4].mxu0 %vm155_vm0, %v78_v31  ;;  %v7313_v31 = vld [vmem:[%s8592_s9] sm:$0x3] }
  0x2c   :  { %6379 = vmatpush3.bf16.msra.mxu0 %v7235_v32  ;;  %5789 = vmatprep.mubr.msk.f32.mxu0 %vm7014_vm1, %v7015_v13  ;;  %v613_v34 = vsub.f32 1.0, %v7313_v31 }
  0x2d   :  { %6380 = vmatprep.subr.bf16.mxu0 %v7013_v4 }
  0x30   :  { %6382 = vmatpush3.bf16.msra.mxu0 %v7246_v35 }
  0x31   :  { %6389 = vmatprep.subr.bf16.mxu0 %v7013_v4 }
  0x33   :  { %5790 = vmatmul.mubr.f32.vlgmr.msra.gmra.mrb[6].mxu0 %v7015_v13 }
  0x34   :  { %6391 = vmatpush3.bf16.msra.mxu0 %v7235_v32  ;;  %5811 = vmatprep.mubr.msk.f32.mxu0 %vm7014_vm1, %v7015_v13 }
  0x35   :  { %6392 = vmatprep.subr.bf16.mxu0 %v7013_v4 }
  0x38   :  { %6394 = vmatpush3.bf16.msra.mxu0 %v7246_v35 }
  0x39   :  { %6401 = vmatprep.subr.bf16.mxu0 %v7013_v4 }
  0xee   :  { %v5747_v37 = vpop.f32.mrb[0].mxu0  ;;  %v480_v38 = vpop.f32.mrb[0].mxu1 }
  0xef   :  { %v7263_v39 = vadd.f32 %v5747_v37, %v5374_v36  ;;  %v228_v40 = vpop.f32.mrb[1].mxu0  ;;  %v5780_v41 = vpop.f32.mrb[1].mxu1  ;;  %v481_v56 = vadd.f32 %v480_v38, %v7286_v55 }
  0xf0   :  { %v7293_v58 = vadd.f32 %v5374_v36, %v228_v40  ;;  %v623_v36 = vmul.f32 0.0, %v622_v33  ;;  %v614_v40 = vmul.f32 0.0, %v613_v34 }
  0xf2   :  { %v554_v60 = vadd.f32 %v481_v56, %v7293_v58 }
  0xf4   :  { %v5383_v62 = vmul.f32 -1.442695, %v554_v60 }
  0xf6   :  { %v5758_v43 = vpop.f32.mrb[2].mxu0 }
  0xf7   :  { %v314_v44 = vpop.f32.mrb[3].mxu0  ;;  %v7291_v57 = vadd.f32 %v5758_v43, %v5377_v42 }
  0xf8   :  { %v7268_v45 = vadd.f32 %v5377_v42, %v314_v44 }
  0xfe   :  { %v5769_v47 = vpop.f32.mrb[4].mxu0 }
  0xff   :  { %v7273_v48 = vadd.f32 %v5769_v47, %v5380_v46  ;;  %v7275_v49 = vpop.f32.mrb[5].mxu0 }
 0x106   :  { %v550_v51 = vpop.f32.mrb[6].mxu0 }
 0x107   :  { %v551_v52 = vadd.f32 %v550_v51, %v7280_v50  ;;  %v5791_v53 = vpop.f32.mrb[7].mxu0 }
 0x109   :  { %v562_v54 = vrot.slane %v551_v52, 2 }
 0x10b   :  { %582 = vrot.lane.b32.xlu0 %v562_v54, %s7016_s2  ;;  %v564_v59 = vadd.f32 %v562_v54, %v7291_v57 }
 0x10d   :  { %v5384_v61 = vmul.f32 -1.442695, %v564_v59 }
 0x10f   :  { %572 = vrot.lane.b32.xlu0 %v481_v56, %s7016_s2  ;;  %6734 = vpow2.f32 %v5384_v61 }
 0x110   :  { %6736 = vpow2.f32 %v5383_v62 }
 0x119   :  { %v6735_v63 = vpop.eup %6734 }
 0x11a   :  { %v568_v0 = vadd.f32 1.0, %v6735_v63  ;;  %v6737_v1 = vpop.eup %6736 }
 0x11b   :  { %v558_v2 = vadd.f32 1.0, %v6737_v1 }
 0x11c   :  { %6738 = vrcp.f32 %v568_v0 }
 0x11d   :  { %6740 = vrcp.f32 %v558_v2 }
 0x126   :  { %v6739_v3 = vpop.eup %6738 }
 0x127   :  { %v6741_v7 = vpop.eup %6740  ;;  %v600_v19 = vsub.f32 1.0, %v6739_v3  ;;  %v606_v21 = vmul.f32 0.0, %v6739_v3 }
 0x128   :  { %v592_v24 = vsub.f32 1.0, %v6741_v7  ;;  %v598_v26 = vmul.f32 0.0, %v6741_v7 }
 0x17d   :  { %v583_v5 = vpop.permute.xlu0 %582 }
 0x17e   :  { %v585_v6 = vmul.f32 %v6739_v3, %v583_v5 }
 0x180   :  { %587 = vrot.lane.b32.xlu1 %v585_v6, %s7016_s2 }
 0x181   :  { %v573_v9 = vpop.permute.xlu0 %572 }
 0x182   :  { %v575_v10 = vmul.f32 %v6741_v7, %v573_v9 }
 0x184   :  { %577 = vrot.lane.b32.xlu1 %v575_v10, %s7016_s2 }
 0x1f2   :  { %v588_v11 = vpop.permute.xlu1 %587 }
 0x1f3   :  { %v590_v12 = vadd.f32 %v588_v11, %v7291_v57 }
 0x1f5   :  { %6742 = vtanh.f32 %v590_v12 }
 0x1f6   :  { %v578_v14 = vpop.permute.xlu1 %577 }
 0x1f7   :  { %v580_v15 = vadd.f32 %v578_v14, %v7293_v58 }
 0x1f9   :  { %6744 = vtanh.f32 %v580_v15 }
 0x1ff   :  { %v6743_v17 = vpop.eup %6742 }
 0x200   :  { %602 = vrot.lane.b32.xlu0 %v6743_v17, %s7017_s27 }
 0x203   :  { %v6745_v18 = vpop.eup %6744 }
 0x204   :  { %594 = vrot.lane.b32.xlu1 %v6745_v18, %s7017_s27 }
 0x272   :  { %v603_v20 = vpop.permute.xlu0 %602 }
 0x273   :  { %v605_v22 = vmul.f32 %v603_v20, %v600_v19 }
 0x275   :  { %v607_v23 = vadd.f32 %v606_v21, %v605_v22 }
 0x276   :  { %v595_v25 = vpop.permute.xlu1 %594 }
 0x277   :  { %v597_v27 = vmul.f32 %v595_v25, %v592_v24  ;;  %v617_v28 = vrot.slane %v607_v23, 6 }
 0x279   :  { %v599_v29 = vadd.f32 %v598_v26, %v597_v27  ;;  %618 = vrot.lane.b32.xlu0 %v617_v28, %s7017_s27 }
 0x27b   :  { %609 = vrot.lane.b32.xlu1 %v599_v29, %s7017_s27 }
 0x2eb   :  { %v619_v37 = vpop.permute.xlu0 %618 }
 0x2ec   :  { %v621_v38 = vmul.f32 %v619_v37, %v7308_v30 }
 0x2ed   :  { %v610_v41 = vpop.permute.xlu1 %609 }
 0x2ee   :  { %v7322_v42 = vadd.f32 %v623_v36, %v621_v38  ;;  %v612_v43 = vmul.f32 %v610_v41, %v7313_v31 }
 0x2f0   :  { %v7325_v44 = vadd.f32 %v614_v40, %v612_v43  ;;  %5812 = vmatmul.mubr.msk.f32.vlgmr.msra.gmra.mrb[8].mxu0 %vm155_vm0, %v7322_v42  ;;  %v831_v12 = vrot.slane %v7322_v42, 4 }
 0x2f1   :  { %6403 = vmatpush3.bf16.msra.mxu0 %v7235_v32  ;;  %5833 = vmatprep.mubr.msk.f32.mxu0 %vm7014_vm1, %v7015_v13 }
 0x2f2   :  { %5801 = vmatmul.mubr.msk.f32.vlgmr.msra.gmra.mrb[2].mxu1 %vm155_vm0, %v7325_v44  ;;  %6404 = vmatprep.subr.bf16.mxu0 %v7013_v4  ;;  %v819_v14 = vrot.slane %v7325_v44, 6 }
 0x2f3   :  { %6397 = vmatpush3.bf16.msra.mxu1 %v7165_v8  ;;  %5822 = vmatprep.mubr.msk.f32.mxu1 %vm7014_vm1, %v7015_v13 }
 0x2f4   :  { %6398 = vmatprep.subr.bf16.mxu1 %v7013_v4 }
 0x2f5   :  { %6406 = vmatpush3.bf16.msra.mxu0 %v7246_v35 }
 0x2f6   :  { %6413 = vmatprep.subr.bf16.mxu0 %v7013_v4 }
 0x2f7   :  { %6400 = vmatpush3.bf16.msra.mxu1 %v7186_v16 }
 0x2f8   :  { %6407 = vmatprep.subr.bf16.mxu1 %v7013_v4 }
 0x3c3   :  { %v769_v46 = vpop.f32.mrb[8].mxu0 }
 0x3c4   :  { %v770_v47 = vadd.f32 %v769_v46, %v7280_v50  ;;  %v5813_v51 = vpop.f32.mrb[9].mxu0  ;;  %v7364_v46 = vld [vmem:[%s8592_s9 + $0xc] sm:$0x3] }
 0x3c5   :  { %v696_v52 = vpop.f32.mrb[2].mxu1  ;;  %v7370_v51 = vld [vmem:[%s8592_s9 + $0x2] sm:$0x3] }
 0x3c6   :  { %v784_v53 = vrot.slane %v770_v47, 4  ;;  %v697_v54 = vadd.f32 %v696_v52, %v7286_v55  ;;  %v5802_v56 = vpop.f32.mrb[3].mxu1  ;;  %v852_v47 = vsub.f32 1.0, %v7364_v46 }
 0x3c7   :  { %v843_v56 = vsub.f32 1.0, %v7370_v51 }
 0x3c8   :  { %v774_v59 = vrot.slane %v697_v54, 6  ;;  %803 = vrot.lane.b32.xlu0 %v784_v53, %s7016_s2  ;;  %v786_v60 = vadd.f32 %v784_v53, %v7291_v57  ;;  %v853_v53 = vmul.f32 %v852_v47, %v7322_v42 }
 0x3ca   :  { %793 = vrot.lane.b32.xlu1 %v774_v59, %s7016_s2  ;;  %v776_v61 = vadd.f32 %v774_v59, %v7293_v58  ;;  %v5388_v62 = vmul.f32 -1.442695, %v786_v60 }
 0x3cc   :  { %v5387_v63 = vmul.f32 -1.442695, %v776_v61  ;;  %6746 = vpow2.f32 %v5388_v62  ;;  %v625_v61 = vmul.f32 %v7325_v44, %v7313_v31  ;;  %v844_v62 = vmul.f32 %v843_v56, %v7325_v44  ;;  %v6981_v31 = vld [vmem:[%s8592_s9 + $0xc] sm:$0x3] }
 0x3ce   :  { %6748 = vpow2.f32 %v5387_v63 }
 0x3d6   :  { %v6747_v0 = vpop.eup %6746 }
 0x3d7   :  { %v790_v2 = vadd.f32 1.0, %v6747_v0 }
 0x3d8   :  { %v6749_v1 = vpop.eup %6748 }
 0x3d9   :  { %v780_v3 = vadd.f32 1.0, %v6749_v1  ;;  %6750 = vrcp.f32 %v790_v2  ;;  %v2381_v1 = vrot.slane %v625_v61, 1 }
 0x3db   :  { %6752 = vrcp.f32 %v780_v3 }
 0x3e3   :  { %v6751_v5 = vpop.eup %6750 }
 0x3e4   :  { %v825_v23 = vsub.f32 1.0, %v6751_v5 }
 0x3e5   :  { %v6753_v9 = vpop.eup %6752 }
 0x3e6   :  { %v813_v29 = vsub.f32 1.0, %v6753_v9 }
 0x43a   :  { %v804_v6 = vpop.permute.xlu0 %803 }
 0x43b   :  { %v806_v7 = vmul.f32 %v6751_v5, %v804_v6 }
 0x43c   :  { %v794_v10 = vpop.permute.xlu1 %793 }
 0x43d   :  { %v796_v11 = vmul.f32 %v6753_v9, %v794_v10  ;;  %808 = vrot.lane.b32.xlu0 %v806_v7, %s7016_s2 }
 0x43f   :  { %798 = vrot.lane.b32.xlu1 %v796_v11, %s7016_s2 }
 0x443   :  { %832 = vrot.lane.b32.xlu1 %v831_v12, %s7018_s25 }
 0x447   :  { %820 = vrot.lane.b32.xlu1 %v819_v14, %s7018_s25 }
 0x4af   :  { %v809_v15 = vpop.permute.xlu0 %808 }
 0x4b0   :  { %v811_v17 = vadd.f32 %v809_v15, %v7291_v57 }
 0x4b1   :  { %v799_v18 = vpop.permute.xlu1 %798 }
 0x4b2   :  { %6754 = vtanh.f32 %v811_v17  ;;  %v801_v19 = vadd.f32 %v799_v18, %v7293_v58 }
 0x4b4   :  { %6756 = vtanh.f32 %v801_v19 }
 0x4b5   :  { %v833_v22 = vpop.permute.xlu1 %832 }
 0x4b6   :  { %v835_v25 = vmul.f32 %v6751_v5, %v833_v22 }
 0x4b9   :  { %v821_v27 = vpop.permute.xlu1 %820 }
 0x4ba   :  { %v823_v37 = vmul.f32 %v6753_v9, %v821_v27 }
 0x4bc   :  { %v6755_v20 = vpop.eup %6754 }
 0x4bd   :  { %827 = vrot.lane.b32.xlu0 %v6755_v20, %s7017_s27 }
 0x4be   :  { %v6757_v21 = vpop.eup %6756 }
 0x4c1   :  { %815 = vrot.lane.b32.xlu0 %v6757_v21, %s7017_s27 }
 0x52f   :  { %v828_v24 = vpop.permute.xlu0 %827 }
 0x530   :  { %v830_v26 = vmul.f32 %v828_v24, %v825_v23 }
 0x532   :  { %v836_v28 = vadd.f32 %v835_v25, %v830_v26 }
 0x533   :  { %v816_v36 = vpop.permute.xlu0 %815 }
 0x534   :  { %v818_v38 = vmul.f32 %v816_v36, %v813_v29  ;;  %v847_v40 = vrot.slane %v836_v28, 4 }
 0x536   :  { %v824_v41 = vadd.f32 %v823_v37, %v818_v38  ;;  %848 = vrot.lane.b32.xlu0 %v847_v40, %s7017_s27 }
 0x538   :  { %v838_v43 = vrot.slane %v824_v41, 2 }
 0x53a   :  { %839 = vrot.lane.b32.xlu1 %v838_v43, %s7017_s27 }
 0x5a8   :  { %v849_v52 = vpop.permute.xlu0 %848 }
 0x5a9   :  { %v851_v54 = vmul.f32 %v849_v52, %v7364_v46 }
 0x5ab   :  { %v7377_v59 = vadd.f32 %v853_v53, %v851_v54 }
 0x5ac   :  { %v840_v60 = vpop.permute.xlu1 %839 }
 0x5ad   :  { %v842_v63 = vmul.f32 %v840_v60, %v7370_v51  ;;  %5834 = vmatmul.mubr.msk.f32.vlgmr.msra.gmra.mrb[10].mxu0 %vm155_vm0, %v7377_v59  ;;  %v1061_v37 = vrot.slane %v7377_v59, 6 }
 0x5ae   :  { %6415 = vmatpush3.bf16.msra.mxu0 %v7235_v32  ;;  %5855 = vmatprep.mubr.msk.f32.mxu0 %vm7014_vm1, %v7015_v13 }
 0x5af   :  { %v7390_v0 = vadd.f32 %v844_v62, %v842_v63  ;;  %6416 = vmatprep.subr.bf16.mxu0 %v7013_v4 }
 0x5b1   :  { %v855_v2 = vmul.f32 %v7390_v0, %v7370_v51  ;;  %5823 = vmatmul.mubr.msk.f32.vlgmr.msra.gmra.mrb[4].mxu1 %vm155_vm0, %v7390_v0  ;;  %v1049_v38 = vrot.slane %v7390_v0, 4 }
 0x5b2   :  { %6409 = vmatpush3.bf16.msra.mxu1 %v7165_v8  ;;  %6418 = vmatpush3.bf16.msra.mxu0 %v7246_v35 }
 0x5b3   :  { %v2313_v44 = vrot.slane %v855_v2, 7  ;;  %v7400_v3 = vsel %vm2333_vm2, %v2381_v1, %v855_v2  ;;  %6410 = vmatprep.subr.bf16.mxu1 %v7013_v4  ;;  %5844 = vmatprep.mubr.msk.f32.mxu1 %vm7014_vm1, %v7015_v13 }
 0x5b4   :  { %6425 = vmatprep.subr.bf16.mxu0 %v7013_v4 }
 0x5b5   :  { %v7407_v5 = vsel %vm2333_vm2, %v625_v61, %v2313_v44 }
 0x5b6   :  { %6412 = vmatpush3.bf16.msra.mxu1 %v7186_v16 }
 0x5b7   :  { %6419 = vmatprep.subr.bf16.mxu1 %v7013_v4 }
 0x680   :  { %v999_v6 = vpop.f32.mrb[10].mxu0 }
 0x681   :  { %v1000_v7 = vadd.f32 %v999_v6, %v7280_v50  ;;  %v5835_v9 = vpop.f32.mrb[11].mxu0 }
 0x683   :  { %v1014_v10 = vrot.slane %v1000_v7, 6 }
 0x684   :  { %v926_v11 = vpop.f32.mrb[4].mxu1 }
 0x685   :  { %v927_v12 = vadd.f32 %v926_v11, %v7286_v55  ;;  %1033 = vrot.lane.b32.xlu0 %v1014_v10, %s7016_s2  ;;  %v5824_v14 = vpop.f32.mrb[5].mxu1  ;;  %v1016_v17 = vadd.f32 %v1014_v10, %v7291_v57 }
 0x687   :  { %v1004_v15 = vrot.slane %v927_v12, 4  ;;  %v5392_v18 = vmul.f32 -1.442695, %v1016_v17 }
 0x689   :  { %1023 = vrot.lane.b32.xlu1 %v1004_v15, %s7016_s2  ;;  %v1006_v19 = vadd.f32 %v1004_v15, %v7293_v58  ;;  %6758 = vpow2.f32 %v5392_v18  ;;  %v7432_v15 = vld [vmem:[%s8592_s9 + $0xa] sm:$0x3]  ;;  %v7438_v18 = vld [vmem:[%s8592_s9 + $0x4] sm:$0x3] }
 0x68a   :  { %v1082_v17 = vsub.f32 1.0, %v7432_v15 }
 0x68b   :  { %v5391_v20 = vmul.f32 -1.442695, %v1006_v19 }
 0x68d   :  { %6760 = vpow2.f32 %v5391_v20  ;;  %v1083_v20 = vmul.f32 %v1082_v17, %v7377_v59 }
 0x693   :  { %v6759_v21 = vpop.eup %6758 }
 0x694   :  { %v1020_v22 = vadd.f32 1.0, %v6759_v21 }
 0x696   :  { %6762 = vrcp.f32 %v1020_v22  ;;  %v1073_v22 = vsub.f32 1.0, %v7438_v18 }
 0x697   :  { %v6761_v23 = vpop.eup %6760 }
 0x698   :  { %v1010_v24 = vadd.f32 1.0, %v6761_v23 }
 0x69a   :  { %6764 = vrcp.f32 %v1010_v24 }
 0x6a0   :  { %v6763_v25 = vpop.eup %6762 }
 0x6a1   :  { %v1055_v61 = vsub.f32 1.0, %v6763_v25 }
 0x6a4   :  { %v6765_v28 = vpop.eup %6764 }
 0x6a5   :  { %v1043_v6 = vsub.f32 1.0, %v6765_v28 }
 0x6f7   :  { %v1034_v26 = vpop.permute.xlu0 %1033 }
 0x6f8   :  { %v1036_v27 = vmul.f32 %v6763_v25, %v1034_v26 }
 0x6fa   :  { %1038 = vrot.lane.b32.xlu0 %v1036_v27, %s7016_s2 }
 0x6fb   :  { %v1024_v29 = vpop.permute.xlu1 %1023 }
 0x6fc   :  { %v1026_v36 = vmul.f32 %v6765_v28, %v1024_v29 }
 0x6fe   :  { %1028 = vrot.lane.b32.xlu1 %v1026_v36, %s7016_s2 }
 0x702   :  { %1062 = vrot.lane.b32.xlu1 %v1061_v37, %s7018_s25 }
 0x706   :  { %1050 = vrot.lane.b32.xlu1 %v1049_v38, %s7018_s25 }
 0x76c   :  { %v1039_v40 = vpop.permute.xlu0 %1038 }
 0x76d   :  { %v1041_v41 = vadd.f32 %v1039_v40, %v7291_v57 }
 0x76f   :  { %6766 = vtanh.f32 %v1041_v41 }
 0x770   :  { %v1029_v43 = vpop.permute.xlu1 %1028 }
 0x771   :  { %v1031_v52 = vadd.f32 %v1029_v43, %v7293_v58 }
 0x773   :  { %6768 = vtanh.f32 %v1031_v52 }
 0x774   :  { %v1063_v60 = vpop.permute.xlu1 %1062 }
 0x775   :  { %v1065_v63 = vmul.f32 %v6763_v25, %v1063_v60  ;;  %v1074_v25 = vmul.f32 %v1073_v22, %v7390_v0 }
 0x778   :  { %v1051_v2 = vpop.permute.xlu1 %1050 }
 0x779   :  { %v6767_v53 = vpop.eup %6766  ;;  %v1053_v9 = vmul.f32 %v6765_v28, %v1051_v2 }
 0x77a   :  { %1057 = vrot.lane.b32.xlu0 %v6767_v53, %s7017_s27 }
 0x77d   :  { %v6769_v54 = vpop.eup %6768 }
 0x77e   :  { %1045 = vrot.lane.b32.xlu0 %v6769_v54, %s7017_s27 }
 0x7ec   :  { %v1058_v62 = vpop.permute.xlu0 %1057 }
 0x7ed   :  { %v1060_v1 = vmul.f32 %v1058_v62, %v1055_v61 }
 0x7ef   :  { %v1066_v44 = vadd.f32 %v1065_v63, %v1060_v1 }
 0x7f0   :  { %v1046_v7 = vpop.permute.xlu0 %1045 }
 0x7f1   :  { %v1048_v10 = vmul.f32 %v1046_v7, %v1043_v6  ;;  %v1077_v11 = vrot.slane %v1066_v44, 2 }
 0x7f3   :  { %v1054_v12 = vadd.f32 %v1053_v9, %v1048_v10  ;;  %1078 = vrot.lane.b32.xlu0 %v1077_v11, %s7017_s27 }
 0x7f5   :  { %v1068_v14 = vrot.slane %v1054_v12, 4 }
 0x7f7   :  { %1069 = vrot.lane.b32.xlu1 %v1068_v14, %s7017_s27 }
 0x865   :  { %v1079_v19 = vpop.permute.xlu0 %1078 }
 0x866   :  { %v1081_v21 = vmul.f32 %v1079_v19, %v7432_v15 }
 0x868   :  { %v7445_v23 = vadd.f32 %v1083_v20, %v1081_v21 }
 0x869   :  { %v1070_v24 = vpop.permute.xlu1 %1069 }
 0x86a   :  { %v1072_v26 = vmul.f32 %v1070_v24, %v7438_v18  ;;  %5856 = vmatmul.mubr.msk.f32.vlgmr.msra.gmra.mrb[12].mxu0 %vm155_vm0, %v7445_v23 }
 0x86b   :  { %6427 = vmatpush3.bf16.msra.mxu0 %v7235_v32  ;;  %5877 = vmatprep.mubr.msk.f32.mxu0 %vm7014_vm1, %v7015_v13 }
 0x86c   :  { %v7456_v27 = vadd.f32 %v1074_v25, %v1072_v26  ;;  %6428 = vmatprep.subr.bf16.mxu0 %v7013_v4 }
 0x86e   :  { %v1085_v28 = vmul.f32 %v7456_v27, %v7438_v18  ;;  %5845 = vmatmul.mubr.msk.f32.vlgmr.msra.gmra.mrb[6].mxu1 %vm155_vm0, %v7456_v27  ;;  %v1277_v12 = vrot.slane %v7456_v27, 2 }
 0x86f   :  { %6430 = vmatpush3.bf16.msra.mxu0 %v7246_v35  ;;  %6421 = vmatpush3.bf16.msra.mxu1 %v7165_v8 }
 0x870   :  { %v2316_v0 = vrot.slane %v1085_v28, 6  ;;  %v2383_v29 = vrot.slane %v1085_v28, 7  ;;  %6422 = vmatprep.subr.bf16.mxu1 %v7013_v4  ;;  %5866 = vmatprep.mubr.msk.f32.mxu1 %vm7014_vm1, %v7015_v13 }
 0x871   :  { %6437 = vmatprep.subr.bf16.mxu0 %v7013_v4 }
 0x872   :  { %v7471_v36 = vsel %vm2335_vm3, %v7407_v5, %v2316_v0  ;;  %v7475_v37 = vsel %vm2335_vm3, %v7400_v3, %v2383_v29 }
 0x873   :  { %6424 = vmatpush3.bf16.msra.mxu1 %v7186_v16 }
 0x874   :  { %6431 = vmatprep.subr.bf16.mxu1 %v7013_v4 }
 0x93d   :  { %v1229_v38 = vpop.f32.mrb[12].mxu0 }
 0x93e   :  { %v1230_v40 = vadd.f32 %v1229_v38, %v7280_v50  ;;  %v5857_v41 = vpop.f32.mrb[13].mxu0 }
 0x940   :  { %1261 = vrot.lane.b32.xlu0 %v1230_v40, %s7016_s2  ;;  %v1243_v3 = vadd.f32 %v1230_v40, %v7291_v57 }
 0x941   :  { %v1156_v43 = vpop.f32.mrb[6].mxu1 }
 0x942   :  { %v1157_v52 = vadd.f32 %v1156_v43, %v7286_v55  ;;  %v5846_v53 = vpop.f32.mrb[7].mxu1  ;;  %v5396_v54 = vmul.f32 -1.442695, %v1243_v3  ;;  %v7500_v3 = vld [vmem:[%s8592_s9 + $0x8] sm:$0x3] }
 0x944   :  { %v1234_v5 = vrot.slane %v1157_v52, 2  ;;  %6770 = vpow2.f32 %v5396_v54  ;;  %v1308_v54 = vsub.f32 1.0, %v7500_v3 }
 0x946   :  { %1250 = vrot.lane.b32.xlu1 %v1234_v5, %s7016_s2  ;;  %v1236_v60 = vadd.f32 %v1234_v5, %v7293_v58 }
 0x948   :  { %v5395_v61 = vmul.f32 -1.442695, %v1236_v60 }
 0x94a   :  { %6772 = vpow2.f32 %v5395_v61  ;;  %v1309_v61 = vmul.f32 %v1308_v54, %v7445_v23 }
 0x94e   :  { %v6771_v62 = vpop.eup %6770 }
 0x94f   :  { %v1247_v63 = vadd.f32 1.0, %v6771_v62 }
 0x951   :  { %6774 = vrcp.f32 %v1247_v63  ;;  %v7510_v63 = vld [vmem:[%s8592_s9 + $0x6] sm:$0x3] }
 0x954   :  { %v6773_v1 = vpop.eup %6772 }
 0x955   :  { %v1240_v2 = vadd.f32 1.0, %v6773_v1 }
 0x957   :  { %6776 = vrcp.f32 %v1240_v2  ;;  %v1300_v2 = vsub.f32 1.0, %v7510_v63 }
 0x95b   :  { %v6775_v44 = vpop.eup %6774 }
 0x95c   :  { %v1283_v28 = vsub.f32 1.0, %v6775_v44 }
 0x961   :  { %v6777_v9 = vpop.eup %6776 }
 0x9b2   :  { %v1262_v6 = vpop.permute.xlu0 %1261 }
 0x9b3   :  { %v1264_v7 = vmul.f32 %v6775_v44, %v1262_v6  ;;  %v1301_v6 = vmul.f32 %v1300_v2, %v7456_v27 }
 0x9b5   :  { %1266 = vrot.lane.b32.xlu0 %v1264_v7, %s7016_s2 }
 0x9b8   :  { %v1251_v10 = vpop.permute.xlu1 %1250 }
 0x9b9   :  { %v1253_v11 = vmul.f32 %v6777_v9, %v1251_v10 }
 0x9bb   :  { %1255 = vrot.lane.b32.xlu1 %v1253_v11, %s7016_s2 }
 0x9bf   :  { %1289 = vrot.lane.b32.xlu1 %v7445_v23, %s7018_s25 }
 0x9c3   :  { %1278 = vrot.lane.b32.xlu1 %v1277_v12, %s7018_s25 }
 0xa27   :  { %v1267_v14 = vpop.permute.xlu0 %1266 }
 0xa28   :  { %v1269_v19 = vadd.f32 %v1267_v14, %v7291_v57  ;;  %v1271_v57 = vsub.f32 1.0, %v6777_v9 }
 0xa2a   :  { %6778 = vtanh.f32 %v1269_v19 }
 0xa2d   :  { %v1256_v20 = vpop.permute.xlu1 %1255 }
 0xa2e   :  { %v1258_v21 = vadd.f32 %v1256_v20, %v7293_v58 }
 0xa30   :  { %6780 = vtanh.f32 %v1258_v21 }
 0xa31   :  { %v1290_v26 = vpop.permute.xlu1 %1289 }
 0xa32   :  { %v1292_v29 = vmul.f32 %v6775_v44, %v1290_v26 }
 0xa34   :  { %v6779_v24 = vpop.eup %6778 }
 0xa35   :  { %1285 = vrot.lane.b32.xlu0 %v6779_v24, %s7017_s27  ;;  %v1279_v41 = vpop.permute.xlu1 %1278 }
 0xa36   :  { %v1281_v52 = vmul.f32 %v6777_v9, %v1279_v41 }
 0xa3a   :  { %v6781_v25 = vpop.eup %6780 }
 0xa3b   :  { %1273 = vrot.lane.b32.xlu0 %v6781_v25, %s7017_s27 }
 0xaa7   :  { %v1286_v0 = vpop.permute.xlu0 %1285 }
 0xaa8   :  { %v1288_v38 = vmul.f32 %v1286_v0, %v1283_v28 }
 0xaaa   :  { %v1293_v40 = vadd.f32 %v1292_v29, %v1288_v38 }
 0xaac   :  { %1304 = vrot.lane.b32.xlu0 %v1293_v40, %s7017_s27 }
 0xaad   :  { %v1274_v43 = vpop.permute.xlu0 %1273 }
 0xaae   :  { %v1276_v58 = vmul.f32 %v1274_v43, %v1271_v57 }
 0xab0   :  { %v1282_v53 = vadd.f32 %v1281_v52, %v1276_v58 }
 0xab2   :  { %v1295_v5 = vrot.slane %v1282_v53, 6 }
 0xab4   :  { %1296 = vrot.lane.b32.xlu1 %v1295_v5, %s7017_s27 }
 0xb1e   :  { %v1305_v60 = vpop.permute.xlu0 %1304 }
 0xb1f   :  { %v1307_v62 = vmul.f32 %v1305_v60, %v7500_v3 }
 0xb21   :  { %v7512_v1 = vadd.f32 %v1309_v61, %v1307_v62 }
 0xb23   :  { %5878 = vmatmul.mubr.msk.f32.vlgmr.msra.gmra.mrb[14].mxu0 %vm155_vm0, %v7512_v1  ;;  %v1514_v53 = vrot.slane %v7512_v1, 2 }
 0xb24   :  { %6439 = vmatpush3.bf16.msra.mxu0 %v7235_v32  ;;  %5899 = vmatprep.mubr.msk.f32.mxu0 %vm7014_vm1, %v7015_v13 }
 0xb25   :  { %6440 = vmatprep.subr.bf16.mxu0 %v7013_v4 }
 0xb26   :  { %v1297_v44 = vpop.permute.xlu1 %1296 }
 0xb27   :  { %v1299_v7 = vmul.f32 %v1297_v44, %v7510_v63 }
 0xb28   :  { %6442 = vmatpush3.bf16.msra.mxu0 %v7246_v35 }
 0xb29   :  { %v7526_v9 = vadd.f32 %v1301_v6, %v1299_v7  ;;  %6449 = vmatprep.subr.bf16.mxu0 %v7013_v4 }
 0xb2b   :  { %5867 = vmatmul.mubr.msk.f32.vlgmr.msra.gmra.mrb[8].mxu1 %vm155_vm0, %v7526_v9 }
 0xb2c   :  { %6433 = vmatpush3.bf16.msra.mxu1 %v7165_v8  ;;  %5888 = vmatprep.mubr.msk.f32.mxu1 %vm7014_vm1, %v7015_v13 }
 0xb2d   :  { %6434 = vmatprep.subr.bf16.mxu1 %v7013_v4 }
 0xb30   :  { %6436 = vmatpush3.bf16.msra.mxu1 %v7186_v16 }
 0xb31   :  { %6443 = vmatprep.subr.bf16.mxu1 %v7013_v4 }
 0xbf6   :  { %v1455_v27 = vpop.f32.mrb[14].mxu0 }
 0xbf7   :  { %v1456_v10 = vadd.f32 %v1455_v27, %v7280_v50  ;;  %v5879_v11 = vpop.f32.mrb[15].mxu0 }
 0xbf9   :  { %v1467_v12 = vrot.slane %v1456_v10, 2 }
 0xbfb   :  { %1487 = vrot.lane.b32.xlu0 %v1467_v12, %s7016_s2  ;;  %v1469_v21 = vadd.f32 %v1467_v12, %v7268_v45 }
 0xbfd   :  { %v5400_v24 = vmul.f32 -1.442695, %v1469_v21 }
 0xbfe   :  { %v1382_v14 = vpop.f32.mrb[8].mxu1 }
 0xbff   :  { %v1383_v19 = vadd.f32 %v1382_v14, %v7286_v55  ;;  %v5868_v20 = vpop.f32.mrb[9].mxu1  ;;  %6782 = vpow2.f32 %v5400_v24 }
 0xc01   :  { %1477 = vrot.lane.b32.xlu1 %v1383_v19, %s7016_s2  ;;  %v1459_v25 = vadd.f32 %v1383_v19, %v7263_v39 }
 0xc03   :  { %v5399_v26 = vmul.f32 -1.442695, %v1459_v25 }
 0xc05   :  { %6784 = vpow2.f32 %v5399_v26 }
 0xc09   :  { %v6783_v28 = vpop.eup %6782 }
 0xc0a   :  { %v1473_v0 = vadd.f32 1.0, %v6783_v28 }
 0xc0c   :  { %6786 = vrcp.f32 %v1473_v0 }
 0xc0f   :  { %v6785_v29 = vpop.eup %6784 }
 0xc10   :  { %v1463_v38 = vadd.f32 1.0, %v6785_v29  ;;  %v1533_v29 = vmul.f32 %v7512_v1, %v1300_v2 }
 0xc12   :  { %6788 = vrcp.f32 %v1463_v38 }
 0xc16   :  { %v6787_v40 = vpop.eup %6786 }
 0xc17   :  { %v1508_v27 = vsub.f32 1.0, %v6787_v40 }
 0xc1c   :  { %v6789_v43 = vpop.eup %6788 }
 0xc1d   :  { %v1497_v20 = vsub.f32 1.0, %v6789_v43 }
 0xc6d   :  { %v1488_v41 = vpop.permute.xlu0 %1487 }
 0xc6e   :  { %v1490_v57 = vmul.f32 %v6787_v40, %v1488_v41  ;;  %v1311_v41 = vmul.f32 %v7526_v9, %v7510_v63 }
 0xc70   :  { %1492 = vrot.lane.b32.xlu0 %v1490_v57, %s7016_s2 }
 0xc73   :  { %v1478_v52 = vpop.permute.xlu1 %1477 }
 0xc74   :  { %v1480_v58 = vmul.f32 %v6789_v43, %v1478_v52 }
 0xc76   :  { %1482 = vrot.lane.b32.xlu1 %v1480_v58, %s7016_s2  ;;  %v2319_v58 = vrot.slane %v1311_v41, 5 }
 0xc7a   :  { %1515 = vrot.lane.b32.xlu1 %v1514_v53, %s7018_s25  ;;  %v2385_v53 = vrot.slane %v1311_v41, 6 }
 0xc7e   :  { %1503 = vrot.lane.b32.xlu1 %v7526_v9, %s7018_s25 }
 0xce2   :  { %v1493_v5 = vpop.permute.xlu0 %1492 }
 0xce3   :  { %v1495_v60 = vadd.f32 %v1493_v5, %v7268_v45 }
 0xce5   :  { %6790 = vtanh.f32 %v1495_v60  ;;  %v2338_v60 = vsel %vm2337_vm4, %v7471_v36, %v2319_v58 }
 0xce8   :  { %v1483_v61 = vpop.permute.xlu1 %1482 }
 0xce9   :  { %v1485_v62 = vadd.f32 %v1483_v61, %v7263_v39  ;;  %v2397_v61 = vsel %vm2337_vm4, %v7475_v37, %v2385_v53 }
 0xceb   :  { %6792 = vtanh.f32 %v1485_v62 }
 0xcec   :  { %v1516_v7 = vpop.permute.xlu1 %1515 }
 0xced   :  { %v1518_v11 = vmul.f32 %v6787_v40, %v1516_v7 }
 0xcef   :  { %v6791_v44 = vpop.eup %6790 }
 0xcf0   :  { %1510 = vrot.lane.b32.xlu0 %v6791_v44, %s7017_s27  ;;  %v1504_v19 = vpop.permute.xlu1 %1503 }
 0xcf1   :  { %v1506_v25 = vmul.f32 %v6789_v43, %v1504_v19  ;;  %v1525_v43 = vmul.f32 %v1308_v54, %v7526_v9 }
 0xcf5   :  { %v6793_v6 = vpop.eup %6792 }
 0xcf6   :  { %1499 = vrot.lane.b32.xlu0 %v6793_v6, %s7017_s27 }
 0xd62   :  { %v1511_v10 = vpop.permute.xlu0 %1510 }
 0xd63   :  { %v1513_v12 = vmul.f32 %v1511_v10, %v1508_v27 }
 0xd65   :  { %v1519_v14 = vadd.f32 %v1518_v11, %v1513_v12 }
 0xd67   :  { %v1528_v21 = vrot.slane %v1519_v14, 6 }
 0xd68   :  { %v1500_v24 = vpop.permute.xlu0 %1499 }
 0xd69   :  { %v1502_v26 = vmul.f32 %v1500_v24, %v1497_v20  ;;  %1529 = vrot.lane.b32.xlu0 %v1528_v21, %s7017_s27 }
 0xd6b   :  { %v1507_v28 = vadd.f32 %v1506_v25, %v1502_v26 }
 0xd6d   :  { %1521 = vrot.lane.b32.xlu1 %v1507_v28, %s7017_s27 }
 0xddb   :  { %v1530_v0 = vpop.permute.xlu0 %1529 }
 0xddc   :  { %v1532_v38 = vmul.f32 %v1530_v0, %v7510_v63 }
 0xdde   :  { %v7559_v40 = vadd.f32 %v1533_v29, %v1532_v38 }
 0xddf   :  { %v1522_v57 = vpop.permute.xlu1 %1521 }
 0xde0   :  { %v1524_v52 = vmul.f32 %v1522_v57, %v7500_v3  ;;  %5900 = vmatmul.mubr.msk.f32.vlgmr.msra.gmra.mrb[16].mxu0 %vm155_vm0, %v7559_v40  ;;  %v1741_v57 = vrot.slane %v7559_v40, 4 }
 0xde1   :  { %6451 = vmatpush3.bf16.msra.mxu0 %v7235_v32  ;;  %5921 = vmatprep.mubr.msk.f32.mxu0 %vm7014_vm1, %v7015_v13 }
 0xde2   :  { %v7572_v2 = vadd.f32 %v1525_v43, %v1524_v52  ;;  %6452 = vmatprep.subr.bf16.mxu0 %v7013_v4 }
 0xde4   :  { %v1535_v5 = vmul.f32 %v7572_v2, %v7500_v3  ;;  %5889 = vmatmul.mubr.msk.f32.vlgmr.msra.gmra.mrb[10].mxu1 %vm155_vm0, %v7572_v2  ;;  %v1729_v43 = vrot.slane %v7572_v2, 6 }
 0xde5   :  { %6445 = vmatpush3.bf16.msra.mxu1 %v7165_v8  ;;  %6454 = vmatpush3.bf16.msra.mxu0 %v7246_v35 }
 0xde6   :  { %v2322_v54 = vrot.slane %v1535_v5, 4  ;;  %v2387_v9 = vrot.slane %v1535_v5, 5  ;;  %6446 = vmatprep.subr.bf16.mxu1 %v7013_v4  ;;  %5910 = vmatprep.mubr.msk.f32.mxu1 %vm7014_vm1, %v7015_v13 }
 0xde7   :  { %6461 = vmatprep.subr.bf16.mxu0 %v7013_v4 }
 0xde8   :  { %v7590_v62 = vsel %vm2339_vm5, %v2338_v60, %v2322_v54  ;;  %v7593_v44 = vsel %vm2339_vm5, %v2397_v61, %v2387_v9 }
 0xde9   :  { %6448 = vmatpush3.bf16.msra.mxu1 %v7186_v16 }
 0xdea   :  { %6455 = vmatprep.subr.bf16.mxu1 %v7013_v4 }
 0xeb3   :  { %v1679_v6 = vpop.f32.mrb[16].mxu0 }
 0xeb4   :  { %v1680_v7 = vadd.f32 %v1679_v6, %v7280_v50  ;;  %v5901_v27 = vpop.f32.mrb[17].mxu0 }
 0xeb6   :  { %v1694_v10 = vrot.slane %v1680_v7, 4 }
 0xeb7   :  { %v1606_v11 = vpop.f32.mrb[10].mxu1 }
 0xeb8   :  { %v1607_v36 = vadd.f32 %v1606_v11, %v7286_v55  ;;  %1713 = vrot.lane.b32.xlu0 %v1694_v10, %s7016_s2  ;;  %v5890_v37 = vpop.f32.mrb[11].mxu1  ;;  %v1696_v14 = vadd.f32 %v1694_v10, %v7268_v45 }
 0xeba   :  { %v1684_v12 = vrot.slane %v1607_v36, 6  ;;  %v5404_v19 = vmul.f32 -1.442695, %v1696_v14 }
 0xebc   :  { %1703 = vrot.lane.b32.xlu1 %v1684_v12, %s7016_s2  ;;  %v1686_v20 = vadd.f32 %v1684_v12, %v7263_v39  ;;  %6794 = vpow2.f32 %v5404_v19 }
 0xebe   :  { %v5403_v21 = vmul.f32 -1.442695, %v1686_v20 }
 0xec0   :  { %6796 = vpow2.f32 %v5403_v21 }
 0xec6   :  { %v6795_v50 = vpop.eup %6794 }
 0xec7   :  { %v1700_v24 = vadd.f32 1.0, %v6795_v50 }
 0xec9   :  { %6798 = vrcp.f32 %v1700_v24  ;;  %v1761_v24 = vmul.f32 %v7559_v40, %v1073_v22 }
 0xeca   :  { %v6797_v25 = vpop.eup %6796 }
 0xecb   :  { %v1690_v26 = vadd.f32 1.0, %v6797_v25 }
 0xecd   :  { %6800 = vrcp.f32 %v1690_v26 }
 0xed3   :  { %v6799_v55 = vpop.eup %6798 }
 0xed4   :  { %v1735_v61 = vsub.f32 1.0, %v6799_v55 }
 0xed7   :  { %v6801_v29 = vpop.eup %6800 }
 0xed8   :  { %v1723_v36 = vsub.f32 1.0, %v6801_v29 }
 0xf2a   :  { %v1714_v28 = vpop.permute.xlu0 %1713 }
 0xf2b   :  { %v1716_v0 = vmul.f32 %v6799_v55, %v1714_v28  ;;  %v1753_v28 = vmul.f32 %v7572_v2, %v1082_v17 }
 0xf2d   :  { %1718 = vrot.lane.b32.xlu0 %v1716_v0, %s7016_s2 }
 0xf2e   :  { %v1704_v38 = vpop.permute.xlu1 %1703 }
 0xf2f   :  { %v1706_v41 = vmul.f32 %v6801_v29, %v1704_v38 }
 0xf31   :  { %1708 = vrot.lane.b32.xlu1 %v1706_v41, %s7016_s2 }
 0xf35   :  { %1742 = vrot.lane.b32.xlu1 %v1741_v57, %s7018_s25 }
 0xf39   :  { %1730 = vrot.lane.b32.xlu1 %v1729_v43, %s7018_s25 }
 0xf9f   :  { %v1719_v52 = vpop.permute.xlu0 %1718 }
 0xfa0   :  { %v1721_v58 = vadd.f32 %v1719_v52, %v7268_v45 }
 0xfa2   :  { %6802 = vtanh.f32 %v1721_v58 }
 0xfa3   :  { %v1709_v53 = vpop.permute.xlu1 %1708 }
 0xfa4   :  { %v1711_v5 = vadd.f32 %v1709_v53, %v7263_v39 }
 0xfa6   :  { %6804 = vtanh.f32 %v1711_v5 }
 0xfa7   :  { %v1743_v60 = vpop.permute.xlu1 %1742 }
 0xfa8   :  { %v1745_v7 = vmul.f32 %v6799_v55, %v1743_v60 }
 0xfab   :  { %v1731_v10 = vpop.permute.xlu1 %1730 }
 0xfac   :  { %v6803_v54 = vpop.eup %6802  ;;  %v1733_v12 = vmul.f32 %v6801_v29, %v1731_v10 }
 0xfad   :  { %1737 = vrot.lane.b32.xlu0 %v6803_v54, %s7017_s27 }
 0xfb0   :  { %v6805_v9 = vpop.eup %6804 }
 0xfb1   :  { %1725 = vrot.lane.b32.xlu0 %v6805_v9, %s7017_s27 }
0x101f   :  { %v1738_v6 = vpop.permute.xlu0 %1737 }
0x1020   :  { %v1740_v27 = vmul.f32 %v1738_v6, %v1735_v61 }
0x1022   :  { %v1746_v11 = vadd.f32 %v1745_v7, %v1740_v27 }
0x1023   :  { %v1726_v37 = vpop.permute.xlu0 %1725 }
0x1024   :  { %v1756_v14 = vrot.slane %v1746_v11, 4  ;;  %v1728_v19 = vmul.f32 %v1726_v37, %v1723_v36 }
0x1026   :  { %v1734_v20 = vadd.f32 %v1733_v12, %v1728_v19  ;;  %1757 = vrot.lane.b32.xlu0 %v1756_v14, %s7017_s27 }
0x1028   :  { %v1748_v21 = vrot.slane %v1734_v20, 2 }
0x102a   :  { %1749 = vrot.lane.b32.xlu1 %v1748_v21, %s7017_s27 }
0x1098   :  { %v1758_v50 = vpop.permute.xlu0 %1757 }
0x1099   :  { %v1760_v25 = vmul.f32 %v1758_v50, %v7438_v18 }
0x109b   :  { %v7619_v26 = vadd.f32 %v1761_v24, %v1760_v25 }
0x109c   :  { %v1750_v55 = vpop.permute.xlu1 %1749 }
0x109d   :  { %v1752_v0 = vmul.f32 %v1750_v55, %v7432_v15  ;;  %5922 = vmatmul.mubr.msk.f32.vlgmr.msra.gmra.mrb[18].mxu0 %vm155_vm0, %v7619_v26  ;;  %v1969_v14 = vrot.slane %v7619_v26, 6 }
0x109e   :  { %6463 = vmatpush3.bf16.msra.mxu0 %v7235_v32  ;;  %5943 = vmatprep.mubr.msk.f32.mxu0 %vm7014_vm1, %v7015_v13 }
0x109f   :  { %v7630_v22 = vadd.f32 %v1753_v28, %v1752_v0  ;;  %6464 = vmatprep.subr.bf16.mxu0 %v7013_v4 }
0x10a1   :  { %v1763_v29 = vmul.f32 %v7630_v22, %v7432_v15  ;;  %5911 = vmatmul.mubr.msk.f32.vlgmr.msra.gmra.mrb[12].mxu1 %vm155_vm0, %v7630_v22  ;;  %v1957_v19 = vrot.slane %v7630_v22, 4 }
0x10a2   :  { %6457 = vmatpush3.bf16.msra.mxu1 %v7165_v8  ;;  %6466 = vmatpush3.bf16.msra.mxu0 %v7246_v35  ;;  %v7655_v35 = vld [vmem:[%s8554_s11] sm:$0x3]  ;;  %s8593_s11 = sld [smem:[#allocation8_spill]] }
0x10a3   :  { %v2325_v17 = vrot.slane %v1763_v29, 3  ;;  %v2389_v32 = vrot.slane %v1763_v29, 4  ;;  %6458 = vmatprep.subr.bf16.mxu1 %v7013_v4  ;;  %5932 = vmatprep.mubr.msk.f32.mxu1 %vm7014_vm1, %v7015_v13 }
0x10a5   :  { %v7644_v2 = vsel %vm2341_vm6, %v7590_v62, %v2325_v17  ;;  %v7648_v38 = vsel %vm2341_vm6, %v7593_v44, %v2389_v32  ;;  %v7661_v44 = vld [vmem:[%s8591_s6] sm:$0x3] }
0x10a6   :  { %6460 = vmatpush3.bf16.msra.mxu1 %v7186_v16 }
0x10a7   :  { %6467 = vmatprep.subr.bf16.mxu1 %v7013_v4 }
0x1170   :  { %v1907_v8 = vpop.f32.mrb[18].mxu0 }
0x1171   :  { %v1908_v41 = vadd.f32 %v7655_v35, %v1907_v8  ;;  %v5923_v57 = vpop.f32.mrb[19].mxu0 }
0x1173   :  { %v1922_v43 = vrot.slane %v1908_v41, 6 }
0x1174   :  { %v1834_v62 = vpop.f32.mrb[12].mxu1 }
0x1175   :  { %v1835_v16 = vadd.f32 %v7661_v44, %v1834_v62  ;;  %1941 = vrot.lane.b32.xlu0 %v1922_v43, %s7016_s2  ;;  %v5912_v52 = vpop.f32.mrb[13].mxu1  ;;  %v1924_v53 = vadd.f32 %v1922_v43, %v7268_v45 }
0x1177   :  { %v1912_v58 = vrot.slane %v1835_v16, 4  ;;  %v5408_v5 = vmul.f32 -1.442695, %v1924_v53 }
0x1179   :  { %1931 = vrot.lane.b32.xlu1 %v1912_v58, %s7016_s2  ;;  %v1914_v54 = vadd.f32 %v1912_v58, %v7263_v39  ;;  %6806 = vpow2.f32 %v5408_v5 }
0x117b   :  { %v5407_v9 = vmul.f32 -1.442695, %v1914_v54  ;;  %v1989_v54 = vmul.f32 %v7619_v26, %v843_v56 }
0x117d   :  { %6808 = vpow2.f32 %v5407_v9 }
0x1183   :  { %v6807_v60 = vpop.eup %6806 }
0x1184   :  { %v1928_v61 = vadd.f32 1.0, %v6807_v60 }
0x1186   :  { %6810 = vrcp.f32 %v1928_v61 }
0x1187   :  { %v6809_v6 = vpop.eup %6808 }
0x1188   :  { %v1918_v7 = vadd.f32 1.0, %v6809_v6  ;;  %v1981_v6 = vmul.f32 %v7630_v22, %v852_v47 }
0x118a   :  { %6812 = vrcp.f32 %v1918_v7 }
0x1190   :  { %v6811_v27 = vpop.eup %6810 }
0x1191   :  { %v1963_v0 = vsub.f32 1.0, %v6811_v27 }
0x1194   :  { %v6813_v36 = vpop.eup %6812 }
0x1195   :  { %v1951_v57 = vsub.f32 1.0, %v6813_v36 }
0x11e7   :  { %v1942_v10 = vpop.permute.xlu0 %1941 }
0x11e8   :  { %v1944_v11 = vmul.f32 %v6811_v27, %v1942_v10 }
0x11ea   :  { %1946 = vrot.lane.b32.xlu0 %v1944_v11, %s7016_s2 }
0x11eb   :  { %v1932_v37 = vpop.permute.xlu1 %1931 }
0x11ec   :  { %v1934_v12 = vmul.f32 %v6813_v36, %v1932_v37 }
0x11ee   :  { %1936 = vrot.lane.b32.xlu1 %v1934_v12, %s7016_s2 }
0x11f2   :  { %1970 = vrot.lane.b32.xlu1 %v1969_v14, %s7018_s25 }
0x11f6   :  { %1958 = vrot.lane.b32.xlu1 %v1957_v19, %s7018_s25 }
0x125c   :  { %v1947_v20 = vpop.permute.xlu0 %1946 }
0x125d   :  { %v1949_v21 = vadd.f32 %v1947_v20, %v7268_v45 }
0x125f   :  { %6814 = vtanh.f32 %v1949_v21 }
0x1260   :  { %v1937_v50 = vpop.permute.xlu1 %1936 }
0x1261   :  { %v1939_v24 = vadd.f32 %v1937_v50, %v7263_v39 }
0x1263   :  { %6816 = vtanh.f32 %v1939_v24 }
0x1264   :  { %v1971_v28 = vpop.permute.xlu1 %1970 }
0x1265   :  { %v1973_v17 = vmul.f32 %v6811_v27, %v1971_v28 }
0x1268   :  { %v1959_v8 = vpop.permute.xlu1 %1958 }
0x1269   :  { %v6815_v25 = vpop.eup %6814  ;;  %v1961_v62 = vmul.f32 %v6813_v36, %v1959_v8 }
0x126a   :  { %1965 = vrot.lane.b32.xlu0 %v6815_v25, %s7017_s27 }
0x126d   :  { %v6817_v55 = vpop.eup %6816 }
0x126e   :  { %1953 = vrot.lane.b32.xlu0 %v6817_v55, %s7017_s27 }
0x12dc   :  { %v1966_v29 = vpop.permute.xlu0 %1965 }
0x12dd   :  { %v1968_v32 = vmul.f32 %v1966_v29, %v1963_v0 }
0x12df   :  { %v1974_v41 = vadd.f32 %v1973_v17, %v1968_v32 }
0x12e0   :  { %v1954_v43 = vpop.permute.xlu0 %1953 }
0x12e1   :  { %v1984_v16 = vrot.slane %v1974_v41, 2  ;;  %v1956_v52 = vmul.f32 %v1954_v43, %v1951_v57 }
0x12e3   :  { %v1962_v58 = vadd.f32 %v1961_v62, %v1956_v52  ;;  %1985 = vrot.lane.b32.xlu0 %v1984_v16, %s7017_s27 }
0x12e5   :  { %v1976_v53 = vrot.slane %v1962_v58, 4 }
0x12e7   :  { %1977 = vrot.lane.b32.xlu1 %v1976_v53, %s7017_s27 }
0x1355   :  { %v1986_v5 = vpop.permute.xlu0 %1985 }
0x1356   :  { %v1988_v9 = vmul.f32 %v1986_v5, %v7370_v51 }
0x1358   :  { %v7684_v60 = vadd.f32 %v1989_v54, %v1988_v9 }
0x1359   :  { %v1978_v61 = vpop.permute.xlu1 %1977 }
0x135a   :  { %v1980_v7 = vmul.f32 %v1978_v61, %v7364_v46  ;;  %5944 = vmatmul.mubr.msk.f32.vlgmr.msra.gmra.mrb[20].mxu0 %vm155_vm0, %v7684_v60 }
0x135c   :  { %v7692_v27 = vadd.f32 %v1981_v6, %v1980_v7 }
0x135e   :  { %v1991_v10 = vmul.f32 %v7692_v27, %v7364_v46  ;;  %5933 = vmatmul.mubr.msk.f32.vlgmr.msra.gmra.mrb[14].mxu1 %vm155_vm0, %v7692_v27  ;;  %v2183_v32 = vrot.slane %v7692_v27, 2 }
0x135f   :  { %5962 = vmatprep.mubr.msk.f32.mxu1 %vm7014_vm1, %v7015_v13 }
0x1360   :  { %v2328_v51 = vrot.slane %v1991_v10, 2  ;;  %v2391_v56 = vrot.slane %v1991_v10, 3  ;;  %v2222_v10 = vld [vmem:[%s8555_s12] sm:$0xff] }
0x1362   :  { %v7702_v47 = vsel %vm2343_vm7, %v7644_v2, %v2328_v51  ;;  %v7706_v22 = vsel %vm2343_vm7, %v7648_v38, %v2391_v56  ;;  %v2223_v51 = vld [vmem:[%s8555_s12 + $0x8] sm:$0xff]  ;;  %v2224_v56 = vld [vmem:[%s8555_s12 + $0x10] sm:$0xff] }
0x142d   :  { %v2135_v11 = vpop.f32.mrb[20].mxu0 }
0x142e   :  { %v2136_v46 = vadd.f32 %v7655_v35, %v2135_v11  ;;  %v5945_v36 = vpop.f32.mrb[21].mxu0  ;;  %v6468_v11 = vpack.c.bf16 %v2223_v51, %v2222_v10 }
0x1430   :  { %2167 = vrot.lane.b32.xlu0 %v2136_v46, %s7016_s2  ;;  %v2149_v2 = vadd.f32 %v2136_v46, %v7268_v45  ;;  %v2225_v46 = vld [vmem:[%s8555_s12 + $0x18] sm:$0xff]  ;;  %6469 = vmatpush3.bf16.msra.mxu1 %v6468_v11 }
0x1431   :  { %v2062_v37 = vpop.f32.mrb[14].mxu1  ;;  %6470 = vmatprep.subr.bf16.mxu1 %v7013_v4 }
0x1432   :  { %v2063_v12 = vadd.f32 %v7661_v44, %v2062_v37  ;;  %v5934_v14 = vpop.f32.mrb[15].mxu1  ;;  %v5412_v20 = vmul.f32 -1.442695, %v2149_v2  ;;  %v108_v37 = vld [vmem:[%s8557_s14] sm:$0xff] }
0x1433   :  { %v6471_v14 = vpack.c.bf16 %v2225_v46, %v2224_v56 }
0x1434   :  { %v2140_v19 = vrot.slane %v2063_v12, 2  ;;  %6818 = vpow2.f32 %v5412_v20  ;;  %v109_v12 = vld [vmem:[%s8557_s14 + $0x8] sm:$0xff]  ;;  %v2226_v20 = vld [vmem:[%s8555_s12 + $0x20] sm:$0xff] }
0x1435   :  { %6472 = vmatpush3.bf16.msra.mxu1 %v6471_v14 }
0x1436   :  { %2156 = vrot.lane.b32.xlu1 %v2140_v19, %s7016_s2  ;;  %v2142_v21 = vadd.f32 %v2140_v19, %v7263_v39  ;;  %v6479_v19 = vpack.c.bf16 %v109_v12, %v108_v37  ;;  %6473 = vmatprep.subr.bf16.mxu1 %v7013_v4 }
0x1438   :  { %v5411_v38 = vmul.f32 -1.442695, %v2142_v21  ;;  %v2227_v21 = vld [vmem:[%s8555_s12 + $0x28] sm:$0xff]  ;;  %6480 = vmatprep.subr.bf16.mxu0 %v6479_v19 }
0x1439   :  { %6482 = vmatpush3.bf16.msra.mxu0 %v6479_v19 }
0x143a   :  { %6820 = vpow2.f32 %v5411_v38  ;;  %v6474_v38 = vpack.c.bf16 %v2227_v21, %v2226_v20 }
0x143c   :  { %6475 = vmatpush3.bf16.msra.mxu1 %v6474_v38 }
0x143d   :  { %6476 = vmatprep.subr.bf16.mxu1 %v7013_v4 }
0x143e   :  { %v6819_v50 = vpop.eup %6818 }
0x143f   :  { %v2153_v35 = vadd.f32 1.0, %v6819_v50  ;;  %v2228_v50 = vld [vmem:[%s8555_s12 + $0x30] sm:$0xff] }
0x1441   :  { %6822 = vrcp.f32 %v2153_v35  ;;  %v2229_v35 = vld [vmem:[%s8555_s12 + $0x38] sm:$0xff]  ;;  %s7020_s12 = smov [#allocation2]  }
0x1442   :  { %s5360_s6 = sshll.u32 %s7020_s12, 4  ;;  %s5361_s6 = int_to_ptr.vmem [resolvable:$true] %s5360_s6 }
0x1443   :  { %p6994_p1 = scmp.lt.s32.totalorder %s5361_s6, %s5361_s6 }
0x1444   :  { %v6821_v24 = vpop.eup %6820 }
0x1445   :  { %v2146_v25 = vadd.f32 1.0, %v6821_v24  ;;  %v6477_v24 = vpack.c.bf16 %v2229_v35, %v2228_v50 }
0x1447   :  { %6824 = vrcp.f32 %v2146_v25  ;;  %6478 = vmatpush3.bf16.msra.mxu1 %v6477_v24  ;;  %v110_v25 = vld [vmem:[%s8557_s14 + $0x10] sm:$0xff] }
0x1448   :  { %6495 = vmatprep.subr.bf16.mxu1 %v7013_v4 }
0x144b   :  { %v6823_v55 = vpop.eup %6822 }
0x144c   :  { %v2189_v58 = vsub.f32 1.0, %v6823_v55 }
0x1451   :  { %v6825_v0 = vpop.eup %6824 }
0x14a2   :  { %v2168_v44 = vpop.permute.xlu0 %2167 }
0x14a3   :  { %v2170_v28 = vmul.f32 %v6823_v55, %v2168_v44 }
0x14a5   :  { %2172 = vrot.lane.b32.xlu0 %v2170_v28, %s7016_s2  ;;  %v112_v28 = vld [vmem:[%s8557_s14 + $0x20] sm:$0xff] }
0x14a8   :  { %v2157_v29 = vpop.permute.xlu1 %2156 }
0x14a9   :  { %v2159_v17 = vmul.f32 %v6825_v0, %v2157_v29  ;;  %v114_v29 = vld [vmem:[%s8557_s14 + $0x30] sm:$0xff] }
0x14ab   :  { %2161 = vrot.lane.b32.xlu1 %v2159_v17, %s7016_s2 }
0x14af   :  { %2195 = vrot.lane.b32.xlu1 %v7684_v60, %s7018_s25 }
0x14b3   :  { %2184 = vrot.lane.b32.xlu1 %v2183_v32, %s7018_s25  ;;  %v115_v32 = vld [vmem:[%s8557_s14 + $0x38] sm:$0xff] }
0x1517   :  { %v2173_v8 = vpop.permute.xlu0 %2172 }
0x1518   :  { %v2175_v41 = vadd.f32 %v2173_v8, %v7268_v45  ;;  %v2177_v45 = vsub.f32 1.0, %v6825_v0  ;;  %v6491_v8 = vpack.c.bf16 %v115_v32, %v114_v29 }
0x151a   :  { %6826 = vtanh.f32 %v2175_v41 }
0x151d   :  { %v2162_v57 = vpop.permute.xlu1 %2161 }
0x151e   :  { %v2164_v43 = vadd.f32 %v2162_v57, %v7263_v39  ;;  %v6978_v57 = vld [vmem:[%s8592_s9 + $0x2] sm:$0x3] }
0x1520   :  { %6828 = vtanh.f32 %v2164_v43  ;;  %v1992_v43 = vmul.f32 %v6978_v57, %v7684_v60  ;;  %v106_v57 = vld [vmem:[%s8558_s15 + $0x10] sm:$0xff] }
0x1521   :  { %v2196_v52 = vpop.permute.xlu1 %2195 }
0x1522   :  { %v2198_v5 = vmul.f32 %v6823_v55, %v2196_v52  ;;  %v111_v55 = vld [vmem:[%s8557_s14 + $0x18] sm:$0xff] }
0x1523   :  { %v6483_v44 = vpack.c.bf16 %v111_v55, %v110_v25 }
0x1524   :  { %v6827_v62 = vpop.eup %6826 }
0x1525   :  { %2191 = vrot.lane.b32.xlu0 %v6827_v62, %s7017_s27  ;;  %v2185_v61 = vpop.permute.xlu1 %2184  ;;  %6484 = vmatprep.subr.bf16.mxu0 %v6483_v44  ;;  %v2213_v62 = vmul.f32 %v7684_v60, %v613_v34  ;;  %v856_v34 = vmul.f32 %v6981_v31, %v7377_v59  ;;  %v1086_v60 = vmul.f32 %v7445_v23, %v7432_v15  ;;  %v99_v31 = vld [vmem:[%s8561_s18] sm:$0xff] }
0x1526   :  { %v2187_v7 = vmul.f32 %v6825_v0, %v2185_v61  ;;  %v113_v0 = vld [vmem:[%s8557_s14 + $0x28] sm:$0xff]  ;;  %6486 = vmatpush3.bf16.msra.mxu0 %v6483_v44 }
0x1527   :  { %v6487_v17 = vpack.c.bf16 %v113_v0, %v112_v28  ;;  %v2360_v23 = vrot.slane %v1086_v60, 3  ;;  %v2411_v19 = vrot.slane %v1086_v60, 4  ;;  %v2413_v30 = vrot.slane %v856_v34, 3 }
0x1529   :  { %6488 = vmatprep.subr.bf16.mxu0 %v6487_v17 }
0x152a   :  { %v6829_v16 = vpop.eup %6828  ;;  %6490 = vmatpush3.bf16.msra.mxu0 %v6487_v17 }
0x152b   :  { %2179 = vrot.lane.b32.xlu0 %v6829_v16, %s7017_s27  ;;  %6492 = vmatprep.subr.bf16.mxu0 %v6491_v8  ;;  %v6979_v16 = vld [vmem:[%s8592_s9] sm:$0x3] }
0x152e   :  { %6494 = vmatpush3.bf16.msra.mxu0 %v6491_v8 }
0x152f   :  { %6501 = vmatprep.subr.bf16.mxu0 %v7013_v4 }
0x1597   :  { %v2192_v53 = vpop.permute.xlu0 %2191 }
0x1598   :  { %v2194_v54 = vmul.f32 %v2192_v53, %v2189_v58  ;;  %v1764_v58 = vmul.f32 %v7619_v26, %v7438_v18  ;;  %v6980_v53 = vld [vmem:[%s8592_s9 + $0xe] sm:$0x3]  ;;  %v1312_v26 = vmul.f32 %v7512_v1, %v7500_v3  ;;  %v2206_v1 = vmul.f32 %v7692_v27, %v622_v33 }
0x159a   :  { %v2199_v9 = vadd.f32 %v2198_v5, %v2194_v54  ;;  %v626_v5 = vmul.f32 %v6980_v53, %v7322_v42  ;;  %v1536_v54 = vmul.f32 %v7559_v40, %v7510_v63  ;;  %v2348_v42 = vrot.slane %v1992_v43, 7 }
0x159b   :  { %v2351_v61 = vrot.slane %v1764_v58, 6  ;;  %v2405_v63 = vrot.slane %v1764_v58, 7  ;;  %v2357_v51 = vrot.slane %v1312_v26, 4 }
0x159c   :  { %2209 = vrot.lane.b32.xlu0 %v2199_v9, %s7017_s27  ;;  %v2366_v59 = vrot.slane %v626_v5, 1  ;;  %v2415_v38 = vrot.slane %v626_v5, 2 }
0x159d   :  { %v2180_v6 = vpop.permute.xlu0 %2179 }
0x159e   :  { %v2182_v39 = vmul.f32 %v2180_v6, %v2177_v45  ;;  %v2363_v45 = vrot.slane %v856_v34, 2  ;;  %v2354_v6 = vrot.slane %v1536_v54, 5  ;;  %v100_v34 = vld [vmem:[%s8561_s18 + $0x8] sm:$0xff] }
0x15a0   :  { %v2188_v36 = vadd.f32 %v2187_v7, %v2182_v39  ;;  %v2407_v39 = vrot.slane %v1536_v54, 6  ;;  %v7876_v54 = vpack.c.bf16 %v100_v34, %v99_v31 }
0x15a2   :  { %v2201_v2 = vrot.slane %v2188_v36, 6  ;;  %v2409_v36 = vrot.slane %v1312_v26, 5  ;;  %v101_v26 = vld [vmem:[%s8561_s18 + $0x10] sm:$0xff] }
0x15a4   :  { %2202 = vrot.lane.b32.xlu1 %v2201_v2, %s7017_s27 }
0x160e   :  { %v2210_v41 = vpop.permute.xlu0 %2209 }
0x160f   :  { %v2212_v52 = vmul.f32 %v6979_v16, %v2210_v41  ;;  %v105_v41 = vld [vmem:[%s8558_s15 + $0x8] sm:$0xff] }
0x1611   :  { %v2214_v18 = vadd.f32 %v2213_v62, %v2212_v52  ;;  %v107_v62 = vld [vmem:[%s8558_s15 + $0x18] sm:$0xff]  ;;  %v5413_v52 = vld [vmem:[%s8556_s13] ss:$0 sm:$0xff] }
0x1613   :  { %v2216_v9 = vmul.f32 %v6979_v16, %v2214_v18  ;;  %2218 = vrot.lane.b32.xlu0 %v2214_v18, %s7018_s25  ;;  %v7860_v16 = vpack.c.bf16 %v107_v62, %v106_v57 }
0x1615   :  { %v2368_v7 = vsel %vm2333_vm2, %v2216_v9, %v2348_v42  ;;  %v2403_v15 = vrot.slane %v2216_v9, 1  ;;  %v102_v42 = vld [vmem:[%s8561_s18 + $0x18] sm:$0xff] }
0x1616   :  { %v2369_v40 = vsel %vm2335_vm3, %v2368_v7, %v2351_v61  ;;  %v2203_v10 = vpop.permute.xlu1 %2202  ;;  %v7891_v61 = vpack.c.bf16 %v102_v42, %v101_v26 }
0x1617   :  { %v2417_v3 = vsel %vm2333_vm2, %v2403_v15, %v1992_v43  ;;  %v2205_v56 = vmul.f32 %v6980_v53, %v2203_v10  ;;  %v2370_v11 = vsel %vm2337_vm4, %v2369_v40, %v2354_v6 }
0x1618   :  { %v2371_v46 = vsel %vm2339_vm5, %v2370_v11, %v2357_v51  ;;  %v2418_v37 = vsel %vm2335_vm3, %v2417_v3, %v2405_v63 }
0x1619   :  { %v2207_v12 = vadd.f32 %v2206_v1, %v2205_v56  ;;  %v2372_v14 = vsel %vm2341_vm6, %v2371_v46, %v2360_v23  ;;  %v2419_v2 = vsel %vm2337_vm4, %v2418_v37, %v2407_v39  ;;  %v7919_v1 = vld [vmem:[%s8559_s16] ss:$0 sm:$0xff] }
0x161a   :  { %v2373_v20 = vsel %vm2343_vm7, %v2372_v14, %v2363_v45  ;;  %v2420_v33 = vsel %vm2339_vm5, %v2419_v2, %v2409_v36  ;;  %v2590_v45 = vlaneseq  ;;  %v7019_v14 = vmov 0   ;;  %v7933_v2 = vld [vmem:[%s8593_s11 + $0x8] sm:$0xff] }
0x161b   :  { %v2215_v27 = vmul.f32 %v6980_v53, %v2207_v12  ;;  %v2374_v21 = vsel %vm2345_vm8, %v2373_v20, %v2366_v59  ;;  %v2421_v50 = vsel %vm2341_vm6, %v2420_v33, %v2411_v19  ;;  %6728 = vset.pattern.permute.xlu1 %v7019_v14  ;;  %6727 = vset.pattern.permute.xlu0 %v7019_v14  ;;  %v7928_v19 = vld [vmem:[%s8593_s11] sm:$0xff] }
0x161c   :  { %2376 = vrot.lane.b32.xlu1 %v2374_v21, %s7018_s25  ;;  %v2422_v35 = vsel %vm2343_vm7, %v2421_v50, %v2413_v30  ;;  %v2591_v59 = vshrl.u32 %v2590_v45, 7  ;;  %v7950_v14 = vld [vmem:[%s8563_s20] sm:$0x3] }
0x161d   :  { %v2331_v24 = vrot.slane %v2215_v27, 1  ;;  %v2393_v25 = vrot.slane %v2215_v27, 2  ;;  %v2423_v55 = vsel %vm2345_vm8, %v2422_v35, %v2415_v38 }
0x161e   :  { %2425 = vrot.lane.b32.xlu0 %v2423_v55, %s7018_s25  ;;  %v7906_v6 = vsub.s32 0, %v2591_v59  ;;  %v7908_v7 = vsub.s32 1, %v2591_v59 }
0x161f   :  { %v2346_v44 = vsel %vm2345_vm8, %v7702_v47, %v2331_v24  ;;  %v2401_v28 = vsel %vm2345_vm8, %v7706_v22, %v2393_v25  ;;  %v104_v22 = vld [vmem:[%s8558_s15] sm:$0xff] }
0x1620   :  { %v7854_v43 = vpack.c.bf16 %v105_v41, %v104_v22 }
0x1685   :  { %v2219_v0 = vpop.permute.xlu0 %2218 }
0x1686   :  { %v2221_v29 = vsel %vm155_vm0, %v2207_v12, %v2219_v0 }
0x1687   :  { %5963 = vmatmul.mubr.msk.f32.vlgmr.msra.gmra.mrb[16].mxu1 %vm2237_vm9, %v2221_v29 }
0x1688   :  { %5992 = vmatprep.mubr.msk.f32.mxu1 %vm7014_vm1, %v7015_v13  ;;  %6497 = vmatpush3.bf16.msra.mxu1 %v7854_v43 }
0x1689   :  { %6498 = vmatprep.subr.bf16.mxu1 %v7013_v4 }
0x168c   :  { %6500 = vmatpush3.bf16.msra.mxu1 %v7860_v16 }
0x168d   :  { %6513 = vmatprep.subr.bf16.mxu1 %v7013_v4 }
0x168e   :  { %v2377_v17 = vpop.permute.xlu1 %2376 }
0x168f   :  { %v7834_v32 = vsel %vm155_vm0, %v2346_v44, %v2377_v17 }
0x1690   :  { %v2426_v8 = vpop.permute.xlu0 %2425  ;;  %5981 = vmatprep.mubr.msk.f32.mxu0 %vm2237_vm9, %v7834_v32 }
0x1691   :  { %v7839_v47 = vsel %vm155_vm0, %v2401_v28, %v2426_v8 }
0x1692   :  { %5982 = vmatmul.mubr.msk.f32.vlgmr.msra.gmra.mrb[22].mxu0 %vm2237_vm9, %v7839_v47 }
0x1693   :  { %6011 = vmatprep.mubr.msk.f32.mxu0 %vm7014_vm1, %v7015_v13 }
0x175a   :  { %v2307_v58 = vpop.f32.mrb[16].mxu1 }
0x175b   :  { %v2308_v53 = vadd.f32 %v5413_v52, %v2307_v58  ;;  %v5964_v5 = vpop.f32.mrb[17].mxu1 }
0x175d   :  { %6830 = vtanh.f32 %v2308_v53 }
0x1765   :  { %v7874_v60 = vpop.f32.mrb[22].mxu0 }
0x1766   :  { %v7878_v18 = vpop.f32.mrb[23].mxu0 }
0x1767   :  { %v7886_v9 = vpop.eup %6830 }
0x1768   :  { %5993 = vmatmul.mubr.msk.f32.vlgmr.msra.gmra.mrb[18].mxu1 %vm155_vm0, %v7886_v9 }
0x1769   :  { %6515 = vmatpush3.bf16.msra.mxu1 %v7876_v54  ;;  %6022 = vmatprep.mubr.msk.f32.mxu1 %vm7014_vm1, %v7015_v13 }
0x176a   :  { %6516 = vmatprep.subr.bf16.mxu1 %v7013_v4 }
0x176d   :  { %6518 = vmatpush3.bf16.msra.mxu1 %v7891_v61 }
0x176e   :  { %6519 = vmatprep.subr.bf16.mxu1 %v7013_v4 }
0x1770   :  { %6023 = vmatmul.mubr.msk.f32.vlgmr.msra.gmra.mrb[20].mxu1 %vm155_vm0, %v7886_v9 }
0x1771   :  { %6521 = vmatpush3.bf16.msra.mxu1 %v7854_v43  ;;  %6033 = vmatprep.mubr.msk.f32.mxu1 %vm7014_vm1, %v7015_v13 }
0x1772   :  { %6522 = vmatprep.subr.bf16.mxu1 %v7013_v4 }
0x1775   :  { %6524 = vmatpush3.bf16.msra.mxu1 %v7860_v16 }
0x1776   :  { %6537 = vmatprep.subr.bf16.mxu1 %v7013_v4 }
0x183b   :  { %v2586_v15 = vpop.f32.mrb[18].mxu1 }
0x183c   :  { %v2593_v23 = vrot.slane %v2586_v15, %v7906_v6  ;;  %v2637_v39 = vrot.slane %v2586_v15, %v7908_v7  ;;  %v5994_v63 = vpop.f32.mrb[19].mxu1 }
0x183e   :  { %v2594_v40 = vadd.f32 %v2593_v23, %v7878_v18  ;;  %v2638_v10 = vadd.f32 %v7874_v60, %v2637_v39 }
0x1840   :  { %6832 = vtanh.f32 %v2594_v40 }
0x1841   :  { %6834 = vtanh.f32 %v2638_v10 }
0x1843   :  { %v7914_v51 = vpop.f32.mrb[20].mxu1 }
0x1844   :  { %v6024_v3 = vpop.f32.mrb[21].mxu1 }
0x184a   :  { %v6833_v56 = vpop.eup %6832 }
0x184b   :  { %v6835_v11 = vpop.eup %6834  ;;  %v2596_v46 = vmul.f32 %v6833_v56, %v7919_v1 }
0x184c   :  { %v2640_v36 = vmul.f32 %v6835_v11, %v7919_v1 }
0x184d   :  { %v2597_v37 = vsel %vm155_vm0, %v2596_v46, 0.0 }
0x184e   :  { %v2641_v12 = vsel %vm155_vm0, %v2640_v36, 0.0  ;;  %2598 = vadd.xlane.f32.xlu1 %v2597_v37  ;;  %v120_v37 = vld [vmem:[%s8560_s17 + $0x20] sm:$0xff] }
0x184f   :  { %2642 = vadd.xlane.f32.xlu0 %v2641_v12  ;;  %v121_v12 = vld [vmem:[%s8560_s17 + $0x28] sm:$0xff] }
0x18db   :  { %v2599_v20 = vpop.xlane.xlu1 %2598 }
0x18dc   :  { %v2643_v30 = vpop.xlane.xlu0 %2642  ;;  %v2600_v33 = vadd.f32 %v2599_v20, %v7928_v19  ;;  %v7952_v20 = vpack.c.bf16 %v121_v12, %v120_v37 }
0x18dd   :  { %v2644_v27 = vadd.f32 %v2643_v30, %v7933_v2  ;;  %v2819_v30 = vadd.f32 %v7914_v51, %v7950_v14  ;;  %v124_v51 = vld [vmem:[%s8560_s17 + $0x40] sm:$0xff] }
0x18de   :  { %v2602_v21 = vsel %vm2601_vm10, %v2600_v33, -inf  ;;  %6503 = vmatpush3.bf16.msra.mxu0 %v7952_v20 }
0x18df   :  { %v2645_v38 = vsel %vm2601_vm10, %v2644_v27, -inf  ;;  %v2603_v50 = vrot.slane %v2602_v21, 4  ;;  %6504 = vmatprep.subr.bf16.mxu0 %v7013_v4 }
0x18e0   :  { %v2646_v35 = vrot.slane %v2645_v38, 4 }
0x18e1   :  { %v2604_v24 = vmax.f32 %v2602_v21, %v2603_v50 }
0x18e2   :  { %v2647_v25 = vmax.f32 %v2645_v38, %v2646_v35  ;;  %v125_v38 = vld [vmem:[%s8560_s17 + $0x48] sm:$0xff]  ;;  %v126_v35 = vld [vmem:[%s8560_s17 + $0x50] sm:$0xff] }
0x18e3   :  { %v2605_v55 = vrot.slane %v2604_v24, 2  ;;  %v7975_v50 = vpack.c.bf16 %v125_v38, %v124_v51 }
0x18e4   :  { %v2648_v44 = vrot.slane %v2647_v25, 2 }
0x18e5   :  { %v2606_v28 = vmax.f32 %v2604_v24, %v2605_v55  ;;  %v127_v24 = vld [vmem:[%s8560_s17 + $0x58] sm:$0xff] }
0x18e6   :  { %v2649_v0 = vmax.f32 %v2647_v25, %v2648_v44  ;;  %v7985_v25 = vpack.c.bf16 %v127_v24, %v126_v35 }
0x18e7   :  { %v2607_v29 = vrot.slane %v2606_v28, 1 }
0x18e8   :  { %v2650_v17 = vrot.slane %v2649_v0, 1 }
0x18e9   :  { %v2608_v8 = vmax.f32 %v2606_v28, %v2607_v29 }
0x18ea   :  { %v2651_v22 = vmax.f32 %v2649_v0, %v2650_v17 }
0x18eb   :  { %v2609_v41 = vsub.f32 %v2600_v33, %v2608_v8  ;;  %v122_v33 = vld [vmem:[%s8560_s17 + $0x30] sm:$0xff] }
0x18ec   :  { %v2652_v57 = vsub.f32 %v2644_v27, %v2651_v22  ;;  %v123_v27 = vld [vmem:[%s8560_s17 + $0x38] sm:$0xff] }
0x18ed   :  { %v2610_v62 = vmul.f32 1.442695, %v2609_v41  ;;  %v7964_v21 = vpack.c.bf16 %v123_v27, %v122_v33 }
0x18ee   :  { %v2653_v52 = vmul.f32 1.442695, %v2652_v57 }
0x18ef   :  { %6836 = vpow2.f32 %v2610_v62  ;;  %6506 = vmatpush3.bf16.msra.mxu0 %v7964_v21 }
0x18f0   :  { %6838 = vpow2.f32 %v2653_v52  ;;  %6507 = vmatprep.subr.bf16.mxu0 %v7013_v4 }
0x18f3   :  { %6509 = vmatpush3.bf16.msra.mxu0 %v7975_v50 }
0x18f4   :  { %6510 = vmatprep.subr.bf16.mxu0 %v7013_v4 }
0x18f7   :  { %6512 = vmatpush3.bf16.msra.mxu0 %v7985_v25 }
0x18f8   :  { %6525 = vmatprep.subr.bf16.mxu0 %v7013_v4 }
0x18f9   :  { %v6837_v58 = vpop.eup %6836 }
0x18fa   :  { %v6839_v53 = vpop.eup %6838  ;;  %v2612_v5 = vsel %vm2601_vm10, %v6837_v58, 0.0 }
0x18fb   :  { %v2655_v31 = vsel %vm2601_vm10, %v6839_v53, 0.0  ;;  %v2613_v34 = vrot.slane %v2612_v5, 4 }
0x18fc   :  { %v2656_v26 = vrot.slane %v2655_v31, 4 }
0x18fd   :  { %v2614_v42 = vadd.f32 %v2613_v34, %v2612_v5 }
0x18fe   :  { %v2657_v45 = vadd.f32 %v2656_v26, %v2655_v31 }
0x18ff   :  { %v2615_v59 = vrot.slane %v2614_v42, 2 }
0x1900   :  { %v2658_v15 = vrot.slane %v2657_v45, 2 }
0x1901   :  { %v2616_v23 = vadd.f32 %v2615_v59, %v2614_v42 }
0x1902   :  { %v2659_v39 = vadd.f32 %v2658_v15, %v2657_v45  ;;  %v6982_v45 = vld [vmem:[%s8562_s19] ss:$0 sm:$0xff] }
0x1903   :  { %v2617_v63 = vrot.slane %v2616_v23, 1  ;;  %v8012_v59 = vadd.f32 %v6982_v45, %v7275_v49 }
0x1904   :  { %v2660_v40 = vrot.slane %v2659_v39, 1 }
0x1905   :  { %v2618_v10 = vadd.f32 %v2617_v63, %v2616_v23 }
0x1906   :  { %v2661_v3 = vadd.f32 %v2660_v40, %v2659_v39 }
0x1907   :  { %6840 = vrcp.f32 %v2618_v10 }
0x1908   :  { %6842 = vrcp.f32 %v2661_v3 }
0x1911   :  { %v6841_v56 = vpop.eup %6840 }
0x1912   :  { %v6843_v11 = vpop.eup %6842  ;;  %v2620_v46 = vmul.f32 %v6841_v56, %v6837_v58 }
0x1913   :  { %v2663_v36 = vmul.f32 %v6843_v11, %v6839_v53 }
0x1914   :  { %2623 = vperm.xlu0 %6727, %v2620_v46  }
0x1915   :  { %2666 = vperm.xlu1 %6728, %v2663_v36  }
0x1919   :  { %2830 = vrot.lane.b32.xlu1 %v2819_v30, %s7016_s2 }
0x1993   :  { %v2624_v55 = vpop.permute.xlu0 %2623 }
0x1994   :  { %v2626_v44 = vmul.f32 %v2624_v55, %v7834_v32  ;;  %v2667_v28 = vpop.permute.xlu1 %2666 }
0x1995   :  { %v2669_v0 = vmul.f32 %v2667_v28, %v7839_v47 }
0x1996   :  { %v2627_v29 = vsel %vm2237_vm9, %v2626_v44, 0.0 }
0x1997   :  { %v2628_v17 = vrot.slane %v2627_v29, 4  ;;  %v2670_v8 = vsel %vm2237_vm9, %v2669_v0, 0.0 }
0x1998   :  { %v2671_v22 = vrot.slane %v2670_v8, 4  ;;  %v2831_v11 = vpop.permute.xlu1 %2830 }
0x1999   :  { %v2629_v41 = vadd.f32 %v2628_v17, %v2627_v29 }
0x199a   :  { %v2672_v57 = vadd.f32 %v2671_v22, %v2670_v8 }
0x199b   :  { %v2630_v62 = vrot.slane %v2629_v41, 2 }
0x199c   :  { %v2673_v52 = vrot.slane %v2672_v57, 2 }
0x199d   :  { %v2631_v58 = vadd.f32 %v2630_v62, %v2629_v41 }
0x199e   :  { %v2674_v53 = vadd.f32 %v2673_v52, %v2672_v57 }
0x199f   :  { %v2632_v5 = vrot.slane %v2631_v58, 1 }
0x19a0   :  { %v2675_v31 = vrot.slane %v2674_v53, 1 }
0x19a1   :  { %v2633_v34 = vadd.f32 %v2632_v5, %v2631_v58 }
0x19a2   :  { %v2676_v26 = vadd.f32 %v2675_v31, %v2674_v53 }
0x19a4   :  { %v7994_v42 = vsel %vm2333_vm2, %v2633_v34, %v2676_v26 }
0x19a5   :  { %6012 = vmatmul.mubr.msk.f32.vlgmr.msra.gmra.mrb[24].mxu0 %vm2237_vm9, %v7994_v42 }
0x19a6   :  { %6527 = vmatpush3.bf16.msra.mxu0 %v7952_v20  ;;  %6052 = vmatprep.mubr.msk.f32.mxu0 %vm7014_vm1, %v7015_v13 }
0x19a7   :  { %6528 = vmatprep.subr.bf16.mxu0 %v7013_v4 }
0x19aa   :  { %6530 = vmatpush3.bf16.msra.mxu0 %v7964_v21 }
0x19ab   :  { %6531 = vmatprep.subr.bf16.mxu0 %v7013_v4 }
0x19ae   :  { %6533 = vmatpush3.bf16.msra.mxu0 %v7975_v50 }
0x19af   :  { %6534 = vmatprep.subr.bf16.mxu0 %v7013_v4 }
0x19b2   :  { %6536 = vmatpush3.bf16.msra.mxu0 %v7985_v25 }
0x19b3   :  { %6549 = vmatprep.subr.bf16.mxu0 %v7013_v4 }
0x1a78   :  { %v2747_v15 = vpop.f32.mrb[24].mxu0 }
0x1a79   :  { %v2751_v23 = vadd.f32 %v2747_v15, %v8012_v59  ;;  %v6013_v39 = vpop.f32.mrb[25].mxu0 }
0x1a7b   :  { %v2822_v63 = vadd.f32 %v2819_v30, %v2751_v23 }
0x1a7d   :  { %v5421_v40 = vmul.f32 -1.442695, %v2822_v63 }
0x1a7f   :  { %6844 = vpow2.f32 %v5421_v40 }
0x1a89   :  { %v6845_v10 = vpop.eup %6844 }
0x1a8a   :  { %v2826_v3 = vadd.f32 1.0, %v6845_v10 }
0x1a8c   :  { %6846 = vrcp.f32 %v2826_v3 }
0x1a96   :  { %v6847_v56 = vpop.eup %6846 }
0x1a97   :  { %v2833_v46 = vmul.f32 %v6847_v56, %v2831_v11  ;;  %v2840_v30 = vsub.f32 1.0, %v6847_v56 }
0x1a99   :  { %2835 = vrot.lane.b32.xlu1 %v2833_v46, %s7016_s2 }
0x1b0b   :  { %v2836_v36 = vpop.permute.xlu1 %2835 }
0x1b0c   :  { %v2838_v37 = vadd.f32 %v2836_v36, %v2751_v23 }
0x1b0e   :  { %6848 = vtanh.f32 %v2838_v37 }
0x1b18   :  { %v6849_v49 = vpop.eup %6848 }
0x1b19   :  { %2842 = vrot.lane.b32.xlu1 %v6849_v49, %s7017_s27 }
0x1b1d   :  { %2846 = vrot.lane.b32.xlu1 %v7886_v9, %s7018_s25 }
0x1b8b   :  { %v2843_v12 = vpop.permute.xlu1 %2842 }
0x1b8c   :  { %v2845_v27 = vmul.f32 %v2843_v12, %v2840_v30 }
0x1b8f   :  { %v2847_v33 = vpop.permute.xlu1 %2846 }
0x1b90   :  { %v2849_v51 = vmul.f32 %v6847_v56, %v2847_v33 }
0x1b92   :  { %v8019_v38 = vadd.f32 %v2849_v51, %v2845_v27 }
0x1b94   :  { %2852 = vrot.lane.b32.xlu1 %v8019_v38, %s7017_s27 }
0x1c06   :  { %v2853_v35 = vpop.permute.xlu1 %2852 }
0x1c07   :  { %6034 = vmatmul.mubr.msk.f32.vlgmr.msra.gmra.mrb[22].mxu1 %vm155_vm0, %v2853_v35 }
0x1c08   :  { %6539 = vmatpush3.bf16.msra.mxu1 %v7876_v54  ;;  %6063 = vmatprep.mubr.msk.f32.mxu1 %vm7014_vm1, %v7015_v13 }
0x1c09   :  { %6540 = vmatprep.subr.bf16.mxu1 %v7013_v4 }
0x1c0c   :  { %6542 = vmatpush3.bf16.msra.mxu1 %v7891_v61 }
0x1c0d   :  { %6543 = vmatprep.subr.bf16.mxu1 %v7013_v4 }
0x1c0f   :  { %6064 = vmatmul.mubr.msk.f32.vlgmr.msra.gmra.mrb[24].mxu1 %vm155_vm0, %v2853_v35 }
0x1c10   :  { %6545 = vmatpush3.bf16.msra.mxu1 %v7854_v43  ;;  %6074 = vmatprep.mubr.msk.f32.mxu1 %vm7014_vm1, %v7015_v13 }
0x1c11   :  { %6546 = vmatprep.subr.bf16.mxu1 %v7013_v4 }
0x1c14   :  { %6548 = vmatpush3.bf16.msra.mxu1 %v7860_v16 }
0x1c15   :  { %6561 = vmatprep.subr.bf16.mxu1 %v7013_v4 }
0x1cda   :  { %v2922_v9 = vpop.f32.mrb[22].mxu1 }
0x1cdb   :  { %v2929_v24 = vrot.slane %v2922_v9, %v7906_v6  ;;  %v2972_v55 = vrot.slane %v2922_v9, %v7908_v7  ;;  %v6035_v44 = vpop.f32.mrb[23].mxu1 }
0x1cdd   :  { %v2930_v28 = vadd.f32 %v2929_v24, %v7878_v18  ;;  %v2973_v0 = vadd.f32 %v7874_v60, %v2972_v55 }
0x1cdf   :  { %6850 = vtanh.f32 %v2930_v28 }
0x1ce0   :  { %6852 = vtanh.f32 %v2973_v0 }
0x1ce2   :  { %v3156_v29 = vpop.f32.mrb[24].mxu1 }
0x1ce3   :  { %v6065_v17 = vpop.f32.mrb[25].mxu1 }
0x1ce9   :  { %v6851_v8 = vpop.eup %6850 }
0x1cea   :  { %v6853_v22 = vpop.eup %6852  ;;  %v2932_v41 = vmul.f32 %v6851_v8, %v7919_v1 }
0x1ceb   :  { %v2975_v57 = vmul.f32 %v6853_v22, %v7919_v1 }
0x1cec   :  { %v2933_v62 = vsel %vm155_vm0, %v2932_v41, 0.0 }
0x1ced   :  { %v2976_v52 = vsel %vm155_vm0, %v2975_v57, 0.0  ;;  %2934 = vadd.xlane.f32.xlu1 %v2933_v62 }
0x1cee   :  { %2977 = vadd.xlane.f32.xlu0 %v2976_v52 }
0x1d7a   :  { %v2935_v58 = vpop.xlane.xlu1 %2934 }
0x1d7b   :  { %v2978_v53 = vpop.xlane.xlu0 %2977  ;;  %v2936_v5 = vadd.f32 %v2935_v58, %v7928_v19 }
0x1d7c   :  { %v2979_v31 = vadd.f32 %v2978_v53, %v7933_v2  ;;  %v3157_v53 = vadd.f32 %v3156_v29, %v7950_v14 }
0x1d7d   :  { %v2937_v34 = vsel %vm2601_vm10, %v2936_v5, -inf }
0x1d7e   :  { %v2980_v26 = vsel %vm2601_vm10, %v2979_v31, -inf  ;;  %v2938_v45 = vrot.slane %v2937_v34, 4 }
0x1d7f   :  { %v2981_v15 = vrot.slane %v2980_v26, 4 }
0x1d80   :  { %v2939_v23 = vmax.f32 %v2937_v34, %v2938_v45  ;;  %v3161_v34 = vrot.slane %v3157_v53, 6 }
0x1d81   :  { %v2982_v39 = vmax.f32 %v2980_v26, %v2981_v15 }
0x1d82   :  { %v2940_v63 = vrot.slane %v2939_v23, 2 }
0x1d83   :  { %v2983_v40 = vrot.slane %v2982_v39, 2 }
0x1d84   :  { %v2941_v10 = vmax.f32 %v2939_v23, %v2940_v63 }
0x1d85   :  { %v2984_v3 = vmax.f32 %v2982_v39, %v2983_v40 }
0x1d86   :  { %v2942_v56 = vrot.slane %v2941_v10, 1 }
0x1d87   :  { %v2985_v11 = vrot.slane %v2984_v3, 1 }
0x1d88   :  { %v2943_v46 = vmax.f32 %v2941_v10, %v2942_v56 }
0x1d89   :  { %v2986_v36 = vmax.f32 %v2984_v3, %v2985_v11 }
0x1d8a   :  { %v2944_v37 = vsub.f32 %v2936_v5, %v2943_v46 }
0x1d8b   :  { %v2987_v49 = vsub.f32 %v2979_v31, %v2986_v36 }
0x1d8c   :  { %v2945_v12 = vmul.f32 1.442695, %v2944_v37 }
0x1d8d   :  { %v2988_v30 = vmul.f32 1.442695, %v2987_v49 }
0x1d8e   :  { %6854 = vpow2.f32 %v2945_v12 }
0x1d8f   :  { %6856 = vpow2.f32 %v2988_v30 }
0x1d98   :  { %v6855_v33 = vpop.eup %6854 }
0x1d99   :  { %v6857_v27 = vpop.eup %6856  ;;  %v2947_v51 = vsel %vm2601_vm10, %v6855_v33, 0.0 }
0x1d9a   :  { %v2990_v35 = vsel %vm2601_vm10, %v6857_v27, 0.0  ;;  %v2948_v9 = vrot.slane %v2947_v51, 4 }
0x1d9b   :  { %v2991_v24 = vrot.slane %v2990_v35, 4 }
0x1d9c   :  { %v2949_v55 = vadd.f32 %v2948_v9, %v2947_v51 }
0x1d9d   :  { %v2992_v44 = vadd.f32 %v2991_v24, %v2990_v35 }
0x1d9e   :  { %v2950_v28 = vrot.slane %v2949_v55, 2 }
0x1d9f   :  { %v2993_v0 = vrot.slane %v2992_v44, 2 }
0x1da0   :  { %v2951_v17 = vadd.f32 %v2950_v28, %v2949_v55 }
0x1da1   :  { %v2994_v8 = vadd.f32 %v2993_v0, %v2992_v44 }
0x1da2   :  { %v2952_v22 = vrot.slane %v2951_v17, 1 }
0x1da3   :  { %v2995_v41 = vrot.slane %v2994_v8, 1 }
0x1da4   :  { %v2953_v57 = vadd.f32 %v2952_v22, %v2951_v17 }
0x1da5   :  { %v2996_v62 = vadd.f32 %v2995_v41, %v2994_v8 }
0x1da6   :  { %6858 = vrcp.f32 %v2953_v57 }
0x1da7   :  { %6860 = vrcp.f32 %v2996_v62 }
0x1db0   :  { %v6859_v52 = vpop.eup %6858 }
0x1db1   :  { %v6861_v58 = vpop.eup %6860  ;;  %v2955_v5 = vmul.f32 %v6859_v52, %v6855_v33  ;;  %v3186_v52 = vrot.slane %v8019_v38, 6 }
0x1db2   :  { %v2998_v31 = vmul.f32 %v6861_v58, %v6857_v27 }
0x1db3   :  { %2958 = vperm.xlu1 %6728, %v2955_v5  }
0x1db4   :  { %3001 = vperm.xlu0 %6727, %v2998_v31  }
0x1db7   :  { %3170 = vrot.lane.b32.xlu1 %v3161_v34, %s7016_s2 }
0x1e32   :  { %v2959_v26 = vpop.permute.xlu1 %2958 }
0x1e33   :  { %v3002_v45 = vpop.permute.xlu0 %3001  ;;  %v2961_v15 = vmul.f32 %v2959_v26, %v7834_v32 }
0x1e34   :  { %v3004_v23 = vmul.f32 %v3002_v45, %v7839_v47 }
0x1e35   :  { %v2962_v39 = vsel %vm2237_vm9, %v2961_v15, 0.0 }
0x1e36   :  { %v3005_v63 = vsel %vm2237_vm9, %v3004_v23, 0.0  ;;  %v2963_v40 = vrot.slane %v2962_v39, 4  ;;  %v3171_v17 = vpop.permute.xlu1 %3170 }
0x1e37   :  { %v3006_v10 = vrot.slane %v3005_v63, 4 }
0x1e38   :  { %v2964_v29 = vadd.f32 %v2963_v40, %v2962_v39 }
0x1e39   :  { %v3007_v3 = vadd.f32 %v3006_v10, %v3005_v63 }
0x1e3a   :  { %v2965_v56 = vrot.slane %v2964_v29, 2 }
0x1e3b   :  { %v3008_v11 = vrot.slane %v3007_v3, 2 }
0x1e3c   :  { %v2966_v46 = vadd.f32 %v2965_v56, %v2964_v29 }
0x1e3d   :  { %v3009_v36 = vadd.f32 %v3008_v11, %v3007_v3 }
0x1e3e   :  { %v2967_v37 = vrot.slane %v2966_v46, 1 }
0x1e3f   :  { %v3010_v49 = vrot.slane %v3009_v36, 1 }
0x1e40   :  { %v2968_v12 = vadd.f32 %v2967_v37, %v2966_v46 }
0x1e41   :  { %v3011_v30 = vadd.f32 %v3010_v49, %v3009_v36 }
0x1e43   :  { %v8058_v33 = vsel %vm2333_vm2, %v2968_v12, %v3011_v30 }
0x1e44   :  { %6053 = vmatmul.mubr.msk.f32.vlgmr.msra.gmra.mrb[26].mxu0 %vm2237_vm9, %v8058_v33 }
0x1e45   :  { %6551 = vmatpush3.bf16.msra.mxu0 %v7952_v20  ;;  %6093 = vmatprep.mubr.msk.f32.mxu0 %vm7014_vm1, %v7015_v13 }
0x1e46   :  { %6552 = vmatprep.subr.bf16.mxu0 %v7013_v4 }
0x1e49   :  { %6554 = vmatpush3.bf16.msra.mxu0 %v7964_v21 }
0x1e4a   :  { %6555 = vmatprep.subr.bf16.mxu0 %v7013_v4 }
0x1e4d   :  { %6557 = vmatpush3.bf16.msra.mxu0 %v7975_v50 }
0x1e4e   :  { %6558 = vmatprep.subr.bf16.mxu0 %v7013_v4 }
0x1e51   :  { %6560 = vmatpush3.bf16.msra.mxu0 %v7985_v25 }
0x1e52   :  { %6573 = vmatprep.subr.bf16.mxu0 %v7013_v4 }
0x1f17   :  { %v3082_v27 = vpop.f32.mrb[26].mxu0 }
0x1f18   :  { %v3087_v51 = vrot.slane %v3082_v27, 6  ;;  %v6054_v35 = vpop.f32.mrb[27].mxu0 }
0x1f1a   :  { %v3089_v9 = vadd.f32 %v3087_v51, %v8012_v59 }
0x1f1c   :  { %v3163_v24 = vadd.f32 %v3161_v34, %v3089_v9 }
0x1f1e   :  { %v5425_v55 = vmul.f32 -1.442695, %v3163_v24 }
0x1f20   :  { %6862 = vpow2.f32 %v5425_v55 }
0x1f2a   :  { %v6863_v44 = vpop.eup %6862 }
0x1f2b   :  { %v3167_v28 = vadd.f32 1.0, %v6863_v44 }
0x1f2d   :  { %6864 = vrcp.f32 %v3167_v28 }
0x1f37   :  { %v6865_v0 = vpop.eup %6864 }
0x1f38   :  { %v3173_v8 = vmul.f32 %v6865_v0, %v3171_v17  ;;  %v3180_v62 = vsub.f32 1.0, %v6865_v0  ;;  %v3188_v5 = vmul.f32 %v6865_v0, %v3186_v52 }
0x1f3a   :  { %3175 = vrot.lane.b32.xlu1 %v3173_v8, %s7016_s2 }
0x1fac   :  { %v3176_v22 = vpop.permute.xlu1 %3175 }
0x1fad   :  { %v3178_v41 = vadd.f32 %v3176_v22, %v3089_v9 }
0x1faf   :  { %6866 = vtanh.f32 %v3178_v41 }
0x1fb9   :  { %v6867_v57 = vpop.eup %6866 }
0x1fba   :  { %3182 = vrot.lane.b32.xlu0 %v6867_v57, %s7017_s27 }
0x202c   :  { %v3183_v58 = vpop.permute.xlu0 %3182 }
0x202d   :  { %v3185_v53 = vmul.f32 %v3183_v58, %v3180_v62 }
0x202f   :  { %v8076_v31 = vadd.f32 %v3188_v5, %v3185_v53 }
0x2031   :  { %v3191_v34 = vrot.slane %v8076_v31, 2 }
0x2033   :  { %3192 = vrot.lane.b32.xlu1 %v3191_v34, %s7017_s27 }
0x20a5   :  { %v3193_v26 = vpop.permute.xlu1 %3192 }
0x20a6   :  { %6075 = vmatmul.mubr.msk.f32.vlgmr.msra.gmra.mrb[26].mxu1 %vm155_vm0, %v3193_v26 }
0x20a7   :  { %6563 = vmatpush3.bf16.msra.mxu1 %v7876_v54  ;;  %6104 = vmatprep.mubr.msk.f32.mxu1 %vm7014_vm1, %v7015_v13 }
0x20a8   :  { %6564 = vmatprep.subr.bf16.mxu1 %v7013_v4 }
0x20ab   :  { %6566 = vmatpush3.bf16.msra.mxu1 %v7891_v61 }
0x20ac   :  { %6567 = vmatprep.subr.bf16.mxu1 %v7013_v4 }
0x20ae   :  { %6105 = vmatmul.mubr.msk.f32.vlgmr.msra.gmra.mrb[28].mxu1 %vm155_vm0, %v3193_v26 }
0x20af   :  { %6569 = vmatpush3.bf16.msra.mxu1 %v7854_v43  ;;  %6115 = vmatprep.mubr.msk.f32.mxu1 %vm7014_vm1, %v7015_v13 }
0x20b0   :  { %6570 = vmatprep.subr.bf16.mxu1 %v7013_v4 }
0x20b3   :  { %6572 = vmatpush3.bf16.msra.mxu1 %v7860_v16 }
0x20b4   :  { %6585 = vmatprep.subr.bf16.mxu1 %v7013_v4 }
0x2179   :  { %v3262_v45 = vpop.f32.mrb[26].mxu1 }
0x217a   :  { %v3269_v15 = vrot.slane %v3262_v45, %v7906_v6  ;;  %v3312_v23 = vrot.slane %v3262_v45, %v7908_v7  ;;  %v6076_v39 = vpop.f32.mrb[27].mxu1 }
0x217c   :  { %v3270_v63 = vadd.f32 %v3269_v15, %v7878_v18  ;;  %v3313_v40 = vadd.f32 %v7874_v60, %v3312_v23 }
0x217e   :  { %6868 = vtanh.f32 %v3270_v63 }
0x217f   :  { %6870 = vtanh.f32 %v3313_v40 }
0x2181   :  { %v3496_v10 = vpop.f32.mrb[28].mxu1 }
0x2182   :  { %v6106_v29 = vpop.f32.mrb[29].mxu1 }
0x2188   :  { %v6869_v3 = vpop.eup %6868 }
0x2189   :  { %v6871_v56 = vpop.eup %6870  ;;  %v3272_v11 = vmul.f32 %v6869_v3, %v7919_v1 }
0x218a   :  { %v3315_v46 = vmul.f32 %v6871_v56, %v7919_v1 }
0x218b   :  { %v3273_v36 = vsel %vm155_vm0, %v3272_v11, 0.0 }
0x218c   :  { %v3316_v37 = vsel %vm155_vm0, %v3315_v46, 0.0  ;;  %3274 = vadd.xlane.f32.xlu0 %v3273_v36 }
0x218d   :  { %3317 = vadd.xlane.f32.xlu1 %v3316_v37 }
0x2219   :  { %v3275_v49 = vpop.xlane.xlu0 %3274 }
0x221a   :  { %v3318_v12 = vpop.xlane.xlu1 %3317  ;;  %v3276_v30 = vadd.f32 %v3275_v49, %v7928_v19 }
0x221b   :  { %v3319_v27 = vadd.f32 %v3318_v12, %v7933_v2 }
0x221c   :  { %v3277_v51 = vsel %vm2601_vm10, %v3276_v30, -inf }
0x221d   :  { %v3320_v35 = vsel %vm2601_vm10, %v3319_v27, -inf  ;;  %v3278_v9 = vrot.slane %v3277_v51, 4 }
0x221e   :  { %v3321_v24 = vrot.slane %v3320_v35, 4 }
0x221f   :  { %v3279_v55 = vmax.f32 %v3277_v51, %v3278_v9 }
0x2220   :  { %v3322_v44 = vmax.f32 %v3320_v35, %v3321_v24 }
0x2221   :  { %v3280_v28 = vrot.slane %v3279_v55, 2 }
0x2222   :  { %v3323_v0 = vrot.slane %v3322_v44, 2 }
0x2223   :  { %v3281_v17 = vmax.f32 %v3279_v55, %v3280_v28 }
0x2224   :  { %v3324_v8 = vmax.f32 %v3322_v44, %v3323_v0 }
0x2225   :  { %v3282_v22 = vrot.slane %v3281_v17, 1 }
0x2226   :  { %v3325_v41 = vrot.slane %v3324_v8, 1 }
0x2227   :  { %v3283_v57 = vmax.f32 %v3281_v17, %v3282_v22 }
0x2228   :  { %v3326_v62 = vmax.f32 %v3324_v8, %v3325_v41 }
0x2229   :  { %v3284_v52 = vsub.f32 %v3276_v30, %v3283_v57 }
0x222a   :  { %v3327_v58 = vsub.f32 %v3319_v27, %v3326_v62  ;;  %v3497_v27 = vadd.f32 %v3496_v10, %v7950_v14 }
0x222b   :  { %v3285_v53 = vmul.f32 1.442695, %v3284_v52 }
0x222c   :  { %v3328_v5 = vmul.f32 1.442695, %v3327_v58  ;;  %v3501_v9 = vrot.slane %v3497_v27, 4 }
0x222d   :  { %6872 = vpow2.f32 %v3285_v53 }
0x222e   :  { %6874 = vpow2.f32 %v3328_v5 }
0x2237   :  { %v6873_v34 = vpop.eup %6872 }
0x2238   :  { %v6875_v26 = vpop.eup %6874  ;;  %v3287_v45 = vsel %vm2601_vm10, %v6873_v34, 0.0 }
0x2239   :  { %v3330_v15 = vsel %vm2601_vm10, %v6875_v26, 0.0  ;;  %v3288_v23 = vrot.slane %v3287_v45, 4 }
0x223a   :  { %v3331_v39 = vrot.slane %v3330_v15, 4 }
0x223b   :  { %v3289_v63 = vadd.f32 %v3288_v23, %v3287_v45 }
0x223c   :  { %v3332_v40 = vadd.f32 %v3331_v39, %v3330_v15 }
0x223d   :  { %v3290_v29 = vrot.slane %v3289_v63, 2 }
0x223e   :  { %v3333_v3 = vrot.slane %v3332_v40, 2 }
0x223f   :  { %v3291_v56 = vadd.f32 %v3290_v29, %v3289_v63 }
0x2240   :  { %v3334_v11 = vadd.f32 %v3333_v3, %v3332_v40 }
0x2241   :  { %v3292_v46 = vrot.slane %v3291_v56, 1 }
0x2242   :  { %v3335_v36 = vrot.slane %v3334_v11, 1 }
0x2243   :  { %v3293_v37 = vadd.f32 %v3292_v46, %v3291_v56 }
0x2244   :  { %v3336_v49 = vadd.f32 %v3335_v36, %v3334_v11  ;;  %v3526_v36 = vrot.slane %v8076_v31, 6 }
0x2245   :  { %6876 = vrcp.f32 %v3293_v37 }
0x2246   :  { %6878 = vrcp.f32 %v3336_v49 }
0x224f   :  { %v6877_v12 = vpop.eup %6876 }
0x2250   :  { %v6879_v30 = vpop.eup %6878  ;;  %v3295_v51 = vmul.f32 %v6877_v12, %v6873_v34 }
0x2251   :  { %v3338_v35 = vmul.f32 %v6879_v30, %v6875_v26  ;;  %v5229_v26 = vrot.slane %v8058_v33, 6 }
0x2252   :  { %3298 = vperm.xlu0 %6727, %v3295_v51  }
0x2253   :  { %3341 = vperm.xlu1 %6728, %v3338_v35   ;;  %v5241_v39 = vsel %vm2335_vm3, %v7994_v42, %v5229_v26 }
0x2256   :  { %3510 = vrot.lane.b32.xlu0 %v3501_v9, %s7016_s2 }
0x22d1   :  { %v3299_v24 = vpop.permute.xlu0 %3298 }
0x22d2   :  { %v3342_v55 = vpop.permute.xlu1 %3341  ;;  %v3301_v44 = vmul.f32 %v3299_v24, %v7834_v32 }
0x22d3   :  { %v3344_v28 = vmul.f32 %v3342_v55, %v7839_v47 }
0x22d4   :  { %v3302_v0 = vsel %vm2237_vm9, %v3301_v44, 0.0 }
0x22d5   :  { %v3345_v17 = vsel %vm2237_vm9, %v3344_v28, 0.0  ;;  %v3303_v8 = vrot.slane %v3302_v0, 4  ;;  %v3511_v49 = vpop.permute.xlu0 %3510  ;;  %v5223_v28 = vsel %vm2335_vm3, %v8019_v38, %v8076_v31 }
0x22d6   :  { %v3346_v22 = vrot.slane %v3345_v17, 4 }
0x22d7   :  { %v3304_v10 = vadd.f32 %v3303_v8, %v3302_v0 }
0x22d8   :  { %v3347_v41 = vadd.f32 %v3346_v22, %v3345_v17 }
0x22d9   :  { %v3305_v57 = vrot.slane %v3304_v10, 2 }
0x22da   :  { %v3348_v62 = vrot.slane %v3347_v41, 2 }
0x22db   :  { %v3306_v52 = vadd.f32 %v3305_v57, %v3304_v10 }
0x22dc   :  { %v3349_v58 = vadd.f32 %v3348_v62, %v3347_v41 }
0x22dd   :  { %v3307_v53 = vrot.slane %v3306_v52, 1 }
0x22de   :  { %v3350_v5 = vrot.slane %v3349_v58, 1 }
0x22df   :  { %v3308_v34 = vadd.f32 %v3307_v53, %v3306_v52 }
0x22e0   :  { %v3351_v45 = vadd.f32 %v3350_v5, %v3349_v58 }
0x22e2   :  { %v3352_v15 = vsel %vm2333_vm2, %v3308_v34, %v3351_v45 }
0x22e3   :  { %6094 = vmatmul.mubr.msk.f32.vlgmr.msra.gmra.mrb[28].mxu0 %vm2237_vm9, %v3352_v15  ;;  %v5231_v23 = vrot.slane %v3352_v15, 4 }
0x22e4   :  { %6575 = vmatpush3.bf16.msra.mxu0 %v7952_v20  ;;  %6134 = vmatprep.mubr.msk.f32.mxu0 %vm7014_vm1, %v7015_v13 }
0x22e5   :  { %6576 = vmatprep.subr.bf16.mxu0 %v7013_v4  ;;  %v8124_v63 = vsel %vm2339_vm5, %v5241_v39, %v5231_v23 }
0x22e8   :  { %6578 = vmatpush3.bf16.msra.mxu0 %v7964_v21 }
0x22e9   :  { %6579 = vmatprep.subr.bf16.mxu0 %v7013_v4 }
0x22ec   :  { %6581 = vmatpush3.bf16.msra.mxu0 %v7975_v50 }
0x22ed   :  { %6582 = vmatprep.subr.bf16.mxu0 %v7013_v4 }
0x22f0   :  { %6584 = vmatpush3.bf16.msra.mxu0 %v7985_v25 }
0x22f1   :  { %6597 = vmatprep.subr.bf16.mxu0 %v7013_v4 }
0x23b6   :  { %v3422_v42 = vpop.f32.mrb[28].mxu0 }
0x23b7   :  { %v3427_v33 = vrot.slane %v3422_v42, 4  ;;  %v6095_v40 = vpop.f32.mrb[29].mxu0 }
0x23b9   :  { %v3429_v29 = vadd.f32 %v3427_v33, %v8012_v59 }
0x23bb   :  { %v3503_v3 = vadd.f32 %v3501_v9, %v3429_v29 }
0x23bd   :  { %v5429_v56 = vmul.f32 -1.442695, %v3503_v3 }
0x23bf   :  { %6880 = vpow2.f32 %v5429_v56 }
0x23c9   :  { %v6881_v11 = vpop.eup %6880 }
0x23ca   :  { %v3507_v46 = vadd.f32 1.0, %v6881_v11 }
0x23cc   :  { %6882 = vrcp.f32 %v3507_v46 }
0x23d6   :  { %v6883_v37 = vpop.eup %6882 }
0x23d7   :  { %v3513_v12 = vmul.f32 %v6883_v37, %v3511_v49  ;;  %v3528_v30 = vmul.f32 %v6883_v37, %v3526_v36  ;;  %v3520_v9 = vsub.f32 1.0, %v6883_v37 }
0x23d9   :  { %3515 = vrot.lane.b32.xlu1 %v3513_v12, %s7016_s2 }
0x244b   :  { %v3516_v27 = vpop.permute.xlu1 %3515 }
0x244c   :  { %v3518_v51 = vadd.f32 %v3516_v27, %v3429_v29 }
0x244e   :  { %6884 = vtanh.f32 %v3518_v51 }
0x2458   :  { %v6885_v35 = vpop.eup %6884 }
0x2459   :  { %3522 = vrot.lane.b32.xlu0 %v6885_v35, %s7017_s27 }
0x24cb   :  { %v3523_v24 = vpop.permute.xlu0 %3522 }
0x24cc   :  { %v3525_v55 = vmul.f32 %v3523_v24, %v3520_v9 }
0x24ce   :  { %v8136_v44 = vadd.f32 %v3528_v30, %v3525_v55 }
0x24d0   :  { %v3531_v0 = vrot.slane %v8136_v44, 4  ;;  %v8144_v17 = vsel %vm2339_vm5, %v5223_v28, %v8136_v44 }
0x24d2   :  { %3532 = vrot.lane.b32.xlu1 %v3531_v0, %s7017_s27 }
0x2544   :  { %v3533_v8 = vpop.permute.xlu1 %3532 }
0x2545   :  { %6116 = vmatmul.mubr.msk.f32.vlgmr.msra.gmra.mrb[30].mxu1 %vm155_vm0, %v3533_v8 }
0x2546   :  { %6587 = vmatpush3.bf16.msra.mxu1 %v7876_v54  ;;  %6145 = vmatprep.mubr.msk.f32.mxu1 %vm7014_vm1, %v7015_v13 }
0x2547   :  { %6588 = vmatprep.subr.bf16.mxu1 %v7013_v4 }
0x254a   :  { %6590 = vmatpush3.bf16.msra.mxu1 %v7891_v61 }
0x254b   :  { %6591 = vmatprep.subr.bf16.mxu1 %v7013_v4 }
0x254d   :  { %6146 = vmatmul.mubr.msk.f32.vlgmr.msra.gmra.mrb[32].mxu1 %vm155_vm0, %v3533_v8 }
0x254e   :  { %6593 = vmatpush3.bf16.msra.mxu1 %v7854_v43  ;;  %6156 = vmatprep.mubr.msk.f32.mxu1 %vm7014_vm1, %v7015_v13 }
0x254f   :  { %6594 = vmatprep.subr.bf16.mxu1 %v7013_v4 }
0x2552   :  { %6596 = vmatpush3.bf16.msra.mxu1 %v7860_v16 }
0x2553   :  { %6609 = vmatprep.subr.bf16.mxu1 %v7013_v4 }
0x2618   :  { %v3602_v38 = vpop.f32.mrb[30].mxu1 }
0x2619   :  { %v3609_v31 = vrot.slane %v3602_v38, %v7906_v6  ;;  %v3652_v22 = vrot.slane %v3602_v38, %v7908_v7  ;;  %v6117_v10 = vpop.f32.mrb[31].mxu1 }
0x261b   :  { %v3610_v41 = vadd.f32 %v3609_v31, %v7878_v18  ;;  %v3653_v57 = vadd.f32 %v7874_v60, %v3652_v22 }
0x261d   :  { %6886 = vtanh.f32 %v3610_v41 }
0x261e   :  { %6888 = vtanh.f32 %v3653_v57 }
0x2620   :  { %v3836_v62 = vpop.f32.mrb[32].mxu1 }
0x2621   :  { %v6147_v52 = vpop.f32.mrb[33].mxu1 }
0x2627   :  { %v6887_v58 = vpop.eup %6886 }
0x2628   :  { %v6889_v53 = vpop.eup %6888  ;;  %v3612_v5 = vmul.f32 %v6887_v58, %v7919_v1 }
0x2629   :  { %v3655_v34 = vmul.f32 %v6889_v53, %v7919_v1 }
0x262a   :  { %v3613_v26 = vsel %vm155_vm0, %v3612_v5, 0.0 }
0x262b   :  { %v3656_v45 = vsel %vm155_vm0, %v3655_v34, 0.0  ;;  %3614 = vadd.xlane.f32.xlu0 %v3613_v26 }
0x262c   :  { %3657 = vadd.xlane.f32.xlu1 %v3656_v45  ;;  %v3837_v45 = vadd.f32 %v3836_v62, %v7950_v14 }
0x26b8   :  { %v3615_v15 = vpop.xlane.xlu0 %3614 }
0x26b9   :  { %v3658_v23 = vpop.xlane.xlu1 %3657  ;;  %v3616_v39 = vadd.f32 %v3615_v15, %v7928_v19 }
0x26ba   :  { %v3659_v42 = vadd.f32 %v3658_v23, %v7933_v2 }
0x26bb   :  { %v3617_v33 = vsel %vm2601_vm10, %v3616_v39, -inf }
0x26bc   :  { %v3660_v40 = vsel %vm2601_vm10, %v3659_v42, -inf  ;;  %v3618_v29 = vrot.slane %v3617_v33, 4 }
0x26bd   :  { %v3661_v3 = vrot.slane %v3660_v40, 4 }
0x26be   :  { %v3619_v56 = vmax.f32 %v3617_v33, %v3618_v29 }
0x26bf   :  { %v3662_v1 = vmax.f32 %v3660_v40, %v3661_v3 }
0x26c0   :  { %v3620_v11 = vrot.slane %v3619_v56, 2 }
0x26c1   :  { %v3663_v46 = vrot.slane %v3662_v1, 2 }
0x26c2   :  { %v3621_v36 = vmax.f32 %v3619_v56, %v3620_v11 }
0x26c3   :  { %v3664_v37 = vmax.f32 %v3662_v1, %v3663_v46 }
0x26c4   :  { %v3622_v49 = vrot.slane %v3621_v36, 1 }
0x26c5   :  { %v3665_v12 = vrot.slane %v3664_v37, 1 }
0x26c6   :  { %v3623_v30 = vmax.f32 %v3621_v36, %v3622_v49 }
0x26c7   :  { %v3666_v27 = vmax.f32 %v3664_v37, %v3665_v12 }
0x26c8   :  { %v3624_v51 = vsub.f32 %v3616_v39, %v3623_v30  ;;  %v3841_v39 = vrot.slane %v3837_v45, 2 }
0x26c9   :  { %v3667_v19 = vsub.f32 %v3659_v42, %v3666_v27 }
0x26ca   :  { %v3625_v35 = vmul.f32 1.442695, %v3624_v51 }
0x26cb   :  { %v3668_v2 = vmul.f32 1.442695, %v3667_v19 }
0x26cc   :  { %6890 = vpow2.f32 %v3625_v35 }
0x26cd   :  { %6892 = vpow2.f32 %v3668_v2 }
0x26d6   :  { %v6891_v9 = vpop.eup %6890 }
0x26d7   :  { %v6893_v24 = vpop.eup %6892  ;;  %v3627_v55 = vsel %vm2601_vm10, %v6891_v9, 0.0 }
0x26d8   :  { %v3670_v28 = vsel %vm2601_vm10, %v6893_v24, 0.0  ;;  %v3628_v0 = vrot.slane %v3627_v55, 4 }
0x26d9   :  { %v3671_v8 = vrot.slane %v3670_v28, 4 }
0x26da   :  { %v3629_v38 = vadd.f32 %v3628_v0, %v3627_v55 }
0x26db   :  { %v3672_v31 = vadd.f32 %v3671_v8, %v3670_v28 }
0x26dc   :  { %v3630_v22 = vrot.slane %v3629_v38, 2 }
0x26dd   :  { %v3673_v10 = vrot.slane %v3672_v31, 2 }
0x26de   :  { %v3631_v41 = vadd.f32 %v3630_v22, %v3629_v38 }
0x26df   :  { %v3674_v57 = vadd.f32 %v3673_v10, %v3672_v31  ;;  %v3866_v31 = vrot.slane %v8136_v44, 6 }
0x26e0   :  { %v3632_v52 = vrot.slane %v3631_v41, 1 }
0x26e1   :  { %v3675_v58 = vrot.slane %v3674_v57, 1 }
0x26e2   :  { %v3633_v53 = vadd.f32 %v3632_v52, %v3631_v41 }
0x26e3   :  { %v3676_v5 = vadd.f32 %v3675_v58, %v3674_v57 }
0x26e4   :  { %6894 = vrcp.f32 %v3633_v53 }
0x26e5   :  { %6896 = vrcp.f32 %v3676_v5 }
0x26ee   :  { %v6895_v34 = vpop.eup %6894 }
0x26ef   :  { %v6897_v26 = vpop.eup %6896  ;;  %v3635_v15 = vmul.f32 %v6895_v34, %v6891_v9 }
0x26f0   :  { %v3678_v23 = vmul.f32 %v6897_v26, %v6893_v24 }
0x26f1   :  { %3638 = vperm.xlu0 %6727, %v3635_v15  }
0x26f2   :  { %3681 = vperm.xlu1 %6728, %v3678_v23  }
0x26f5   :  { %3850 = vrot.lane.b32.xlu0 %v3841_v39, %s7016_s2 }
0x2770   :  { %v3639_v42 = vpop.permute.xlu0 %3638 }
0x2771   :  { %v3682_v33 = vpop.permute.xlu1 %3681  ;;  %v3641_v40 = vmul.f32 %v3639_v42, %v7834_v32 }
0x2772   :  { %v3684_v29 = vmul.f32 %v3682_v33, %v7839_v47 }
0x2773   :  { %v3642_v3 = vsel %vm2237_vm9, %v3641_v40, 0.0 }
0x2774   :  { %v3685_v56 = vsel %vm2237_vm9, %v3684_v29, 0.0  ;;  %v3643_v1 = vrot.slane %v3642_v3, 4  ;;  %v3851_v10 = vpop.permute.xlu0 %3850 }
0x2775   :  { %v3686_v11 = vrot.slane %v3685_v56, 4 }
0x2776   :  { %v3644_v14 = vadd.f32 %v3643_v1, %v3642_v3 }
0x2777   :  { %v3687_v62 = vadd.f32 %v3686_v11, %v3685_v56  ;;  %v8233_v11 = vld [vmem:[%s8559_s16] ss:$0 sm:$0xff] }
0x2778   :  { %v3645_v46 = vrot.slane %v3644_v14, 2 }
0x2779   :  { %v3688_v36 = vrot.slane %v3687_v62, 2 }
0x277a   :  { %v3646_v37 = vadd.f32 %v3645_v46, %v3644_v14 }
0x277b   :  { %v3689_v49 = vadd.f32 %v3688_v36, %v3687_v62 }
0x277c   :  { %v3647_v12 = vrot.slane %v3646_v37, 1 }
0x277d   :  { %v3690_v30 = vrot.slane %v3689_v49, 1 }
0x277e   :  { %v3648_v27 = vadd.f32 %v3647_v12, %v3646_v37  ;;  %v8242_v12 = vld [vmem:[%s8593_s11] sm:$0xff] }
0x277f   :  { %v3691_v51 = vadd.f32 %v3690_v30, %v3689_v49 }
0x2781   :  { %v3692_v19 = vsel %vm2333_vm2, %v3648_v27, %v3691_v51  ;;  %v8248_v27 = vld [vmem:[%s8593_s11 + $0x8] sm:$0xff] }
0x2782   :  { %6135 = vmatmul.mubr.msk.f32.vlgmr.msra.gmra.mrb[30].mxu0 %vm2237_vm9, %v3692_v19  ;;  %v5233_v35 = vrot.slane %v3692_v19, 2 }
0x2783   :  { %6599 = vmatpush3.bf16.msra.mxu0 %v7952_v20  ;;  %6175 = vmatprep.mubr.msk.f32.mxu0 %vm7014_vm1, %v7015_v13 }
0x2784   :  { %6600 = vmatprep.subr.bf16.mxu0 %v7013_v4  ;;  %v8189_v2 = vsel %vm2343_vm7, %v8124_v63, %v5233_v35 }
0x2787   :  { %6602 = vmatpush3.bf16.msra.mxu0 %v7964_v21 }
0x2788   :  { %6603 = vmatprep.subr.bf16.mxu0 %v7013_v4 }
0x278b   :  { %6605 = vmatpush3.bf16.msra.mxu0 %v7975_v50 }
0x278c   :  { %6606 = vmatprep.subr.bf16.mxu0 %v7013_v4 }
0x278f   :  { %6608 = vmatpush3.bf16.msra.mxu0 %v7985_v25 }
0x2790   :  { %6621 = vmatprep.subr.bf16.mxu0 %v7013_v4 }
0x2855   :  { %v3762_v9 = vpop.f32.mrb[30].mxu0 }
0x2856   :  { %v3767_v24 = vrot.slane %v3762_v9, 2  ;;  %v6136_v55 = vpop.f32.mrb[31].mxu0 }
0x2858   :  { %v3769_v28 = vadd.f32 %v3767_v24, %v8012_v59 }
0x285a   :  { %v3843_v0 = vadd.f32 %v3841_v39, %v3769_v28 }
0x285c   :  { %v5433_v63 = vmul.f32 -1.442695, %v3843_v0 }
0x285e   :  { %6898 = vpow2.f32 %v5433_v63 }
0x2868   :  { %v6899_v8 = vpop.eup %6898 }
0x2869   :  { %v3847_v38 = vadd.f32 1.0, %v6899_v8 }
0x286b   :  { %6900 = vrcp.f32 %v3847_v38 }
0x2875   :  { %v6901_v22 = vpop.eup %6900 }
0x2876   :  { %v3853_v41 = vmul.f32 %v6901_v22, %v3851_v10  ;;  %v3868_v57 = vmul.f32 %v6901_v22, %v3866_v31  ;;  %v3860_v59 = vsub.f32 1.0, %v6901_v22 }
0x2878   :  { %3855 = vrot.lane.b32.xlu1 %v3853_v41, %s7016_s2 }
0x28ea   :  { %v3856_v52 = vpop.permute.xlu1 %3855 }
0x28eb   :  { %v3858_v58 = vadd.f32 %v3856_v52, %v3769_v28 }
0x28ed   :  { %6902 = vtanh.f32 %v3858_v58 }
0x28f7   :  { %v6903_v53 = vpop.eup %6902 }
0x28f8   :  { %3862 = vrot.lane.b32.xlu0 %v6903_v53, %s7017_s27 }
0x296a   :  { %v3863_v5 = vpop.permute.xlu0 %3862 }
0x296b   :  { %v3865_v34 = vmul.f32 %v3863_v5, %v3860_v59 }
0x296d   :  { %v8201_v26 = vadd.f32 %v3868_v57, %v3865_v34 }
0x296f   :  { %v3871_v45 = vrot.slane %v8201_v26, 6  ;;  %v8207_v44 = vsel %vm2343_vm7, %v8144_v17, %v8201_v26 }
0x2971   :  { %3872 = vrot.lane.b32.xlu1 %v3871_v45, %s7017_s27 }
0x29e3   :  { %v3873_v15 = vpop.permute.xlu1 %3872 }
0x29e4   :  { %6157 = vmatmul.mubr.msk.f32.vlgmr.msra.gmra.mrb[34].mxu1 %vm155_vm0, %v3873_v15 }
0x29e5   :  { %6611 = vmatpush3.bf16.msra.mxu1 %v7876_v54  ;;  %6186 = vmatprep.mubr.msk.f32.mxu1 %vm7014_vm1, %v7015_v13 }
0x29e6   :  { %6612 = vmatprep.subr.bf16.mxu1 %v7013_v4 }
0x29e9   :  { %6614 = vmatpush3.bf16.msra.mxu1 %v7891_v61 }
0x29ea   :  { %6615 = vmatprep.subr.bf16.mxu1 %v7013_v4 }
0x29ec   :  { %6187 = vmatmul.mubr.msk.f32.vlgmr.msra.gmra.mrb[36].mxu1 %vm155_vm0, %v3873_v15 }
0x29ed   :  { %6617 = vmatpush3.bf16.msra.mxu1 %v7854_v43  ;;  %6197 = vmatprep.mubr.msk.f32.mxu1 %vm7014_vm1, %v7015_v13 }
0x29ee   :  { %6618 = vmatprep.subr.bf16.mxu1 %v7013_v4 }
0x29f1   :  { %6620 = vmatpush3.bf16.msra.mxu1 %v7860_v16 }
0x29f2   :  { %6633 = vmatprep.subr.bf16.mxu1 %v7013_v4 }
0x2ab7   :  { %v3942_v17 = vpop.f32.mrb[34].mxu1 }
0x2ab8   :  { %v3949_v23 = vrot.slane %v3942_v17, %v7906_v6  ;;  %v3992_v39 = vrot.slane %v3942_v17, %v7908_v7  ;;  %v6158_v42 = vpop.f32.mrb[35].mxu1 }
0x2aba   :  { %v3950_v33 = vadd.f32 %v3949_v23, %v7878_v18  ;;  %v3993_v40 = vadd.f32 %v7874_v60, %v3992_v39 }
0x2abc   :  { %6904 = vtanh.f32 %v3950_v33 }
0x2abd   :  { %6906 = vtanh.f32 %v3993_v40 }
0x2abf   :  { %v4173_v29 = vpop.f32.mrb[36].mxu1 }
0x2ac0   :  { %v6188_v3 = vpop.f32.mrb[37].mxu1 }
0x2ac6   :  { %v6905_v56 = vpop.eup %6904 }
0x2ac7   :  { %v6907_v1 = vpop.eup %6906  ;;  %v3952_v14 = vmul.f32 %v8233_v11, %v6905_v56 }
0x2ac8   :  { %v3995_v62 = vmul.f32 %v8233_v11, %v6907_v1 }
0x2ac9   :  { %v3953_v46 = vsel %vm155_vm0, %v3952_v14, 0.0 }
0x2aca   :  { %v3996_v36 = vsel %vm155_vm0, %v3995_v62, 0.0  ;;  %3954 = vadd.xlane.f32.xlu0 %v3953_v46 }
0x2acb   :  { %3997 = vadd.xlane.f32.xlu1 %v3996_v36 }
0x2b57   :  { %v3955_v37 = vpop.xlane.xlu0 %3954 }
0x2b58   :  { %v3998_v49 = vpop.xlane.xlu1 %3997  ;;  %v3956_v30 = vadd.f32 %v8242_v12, %v3955_v37 }
0x2b59   :  { %v3999_v51 = vadd.f32 %v8248_v27, %v3998_v49 }
0x2b5a   :  { %v3957_v19 = vsel %vm2601_vm10, %v3956_v30, -inf }
0x2b5b   :  { %v4000_v35 = vsel %vm2601_vm10, %v3999_v51, -inf  ;;  %v3958_v9 = vrot.slane %v3957_v19, 4 }
0x2b5c   :  { %v4001_v24 = vrot.slane %v4000_v35, 4 }
0x2b5d   :  { %v3959_v55 = vmax.f32 %v3957_v19, %v3958_v9 }
0x2b5e   :  { %v4002_v28 = vmax.f32 %v4000_v35, %v4001_v24 }
0x2b5f   :  { %v3960_v0 = vrot.slane %v3959_v55, 2 }
0x2b60   :  { %v4003_v63 = vrot.slane %v4002_v28, 2 }
0x2b61   :  { %v3961_v8 = vmax.f32 %v3959_v55, %v3960_v0 }
0x2b62   :  { %v4004_v38 = vmax.f32 %v4002_v28, %v4003_v63 }
0x2b63   :  { %v3962_v31 = vrot.slane %v3961_v8, 1 }
0x2b64   :  { %v4005_v22 = vrot.slane %v4004_v38, 1 }
0x2b65   :  { %v3963_v10 = vmax.f32 %v3961_v8, %v3962_v31 }
0x2b66   :  { %v4006_v41 = vmax.f32 %v4004_v38, %v4005_v22 }
0x2b67   :  { %v3964_v57 = vsub.f32 %v3956_v30, %v3963_v10 }
0x2b68   :  { %v4007_v52 = vsub.f32 %v3999_v51, %v4006_v41  ;;  %v8258_v51 = vld [vmem:[%s8563_s20] sm:$0x3] }
0x2b69   :  { %v3965_v58 = vmul.f32 1.442695, %v3964_v57  ;;  %v4174_v19 = vadd.f32 %v8258_v51, %v4173_v29 }
0x2b6a   :  { %v4008_v53 = vmul.f32 1.442695, %v4007_v52 }
0x2b6b   :  { %6908 = vpow2.f32 %v3965_v58 }
0x2b6c   :  { %6910 = vpow2.f32 %v4008_v53 }
0x2b75   :  { %v6909_v59 = vpop.eup %6908 }
0x2b76   :  { %v6911_v5 = vpop.eup %6910  ;;  %v3967_v34 = vsel %vm2601_vm10, %v6909_v59, 0.0 }
0x2b77   :  { %v4010_v15 = vsel %vm2601_vm10, %v6911_v5, 0.0  ;;  %v3968_v17 = vrot.slane %v3967_v34, 4 }
0x2b78   :  { %v4011_v23 = vrot.slane %v4010_v15, 4 }
0x2b79   :  { %v3969_v39 = vadd.f32 %v3968_v17, %v3967_v34 }
0x2b7a   :  { %v4012_v42 = vadd.f32 %v4011_v23, %v4010_v15 }
0x2b7b   :  { %v3970_v33 = vrot.slane %v3969_v39, 2 }
0x2b7c   :  { %v4013_v40 = vrot.slane %v4012_v42, 2 }
0x2b7d   :  { %v3971_v3 = vadd.f32 %v3970_v33, %v3969_v39 }
0x2b7e   :  { %v4014_v56 = vadd.f32 %v4013_v40, %v4012_v42 }
0x2b7f   :  { %v3972_v1 = vrot.slane %v3971_v3, 1 }
0x2b80   :  { %v4015_v14 = vrot.slane %v4014_v56, 1 }
0x2b81   :  { %v3973_v62 = vadd.f32 %v3972_v1, %v3971_v3 }
0x2b82   :  { %v4016_v46 = vadd.f32 %v4015_v14, %v4014_v56 }
0x2b83   :  { %6912 = vrcp.f32 %v3973_v62 }
0x2b84   :  { %6914 = vrcp.f32 %v4016_v46 }
0x2b8d   :  { %v6913_v36 = vpop.eup %6912 }
0x2b8e   :  { %v6915_v37 = vpop.eup %6914  ;;  %v3975_v49 = vmul.f32 %v6913_v36, %v6909_v59 }
0x2b8f   :  { %v4018_v30 = vmul.f32 %v6915_v37, %v6911_v5 }
0x2b90   :  { %3978 = vperm.xlu0 %6727, %v3975_v49  }
0x2b91   :  { %4021 = vperm.xlu1 %6728, %v4018_v30  }
0x2b94   :  { %4185 = vrot.lane.b32.xlu0 %v4174_v19, %s7016_s2 }
0x2c0f   :  { %v3979_v35 = vpop.permute.xlu0 %3978 }
0x2c10   :  { %v4022_v9 = vpop.permute.xlu1 %4021  ;;  %v3981_v24 = vmul.f32 %v3979_v35, %v7834_v32 }
0x2c11   :  { %v4024_v55 = vmul.f32 %v4022_v9, %v7839_v47 }
0x2c12   :  { %v3982_v28 = vsel %vm2237_vm9, %v3981_v24, 0.0 }
0x2c13   :  { %v4025_v0 = vsel %vm2237_vm9, %v4024_v55, 0.0  ;;  %v3983_v63 = vrot.slane %v3982_v28, 4  ;;  %v4186_v40 = vpop.permute.xlu0 %4185 }
0x2c14   :  { %v4026_v8 = vrot.slane %v4025_v0, 4 }
0x2c15   :  { %v3984_v38 = vadd.f32 %v3983_v63, %v3982_v28 }
0x2c16   :  { %v4027_v31 = vadd.f32 %v4026_v8, %v4025_v0 }
0x2c17   :  { %v3985_v22 = vrot.slane %v3984_v38, 2 }
0x2c18   :  { %v4028_v10 = vrot.slane %v4027_v31, 2 }
0x2c19   :  { %v3986_v41 = vadd.f32 %v3985_v22, %v3984_v38 }
0x2c1a   :  { %v4029_v29 = vadd.f32 %v4028_v10, %v4027_v31 }
0x2c1b   :  { %v3987_v57 = vrot.slane %v3986_v41, 1 }
0x2c1c   :  { %v4030_v52 = vrot.slane %v4029_v29, 1 }
0x2c1d   :  { %v3988_v58 = vadd.f32 %v3987_v57, %v3986_v41 }
0x2c1e   :  { %v4031_v53 = vadd.f32 %v4030_v52, %v4029_v29 }
0x2c20   :  { %v8267_v59 = vsel %vm2333_vm2, %v3988_v58, %v4031_v53 }
0x2c21   :  { %6176 = vmatmul.mubr.msk.f32.vlgmr.msra.gmra.mrb[32].mxu0 %vm2237_vm9, %v8267_v59 }
0x2c22   :  { %6623 = vmatpush3.bf16.msra.mxu0 %v7952_v20  ;;  %6216 = vmatprep.mubr.msk.f32.mxu0 %vm7014_vm1, %v7015_v13 }
0x2c23   :  { %6624 = vmatprep.subr.bf16.mxu0 %v7013_v4 }
0x2c26   :  { %6626 = vmatpush3.bf16.msra.mxu0 %v7964_v21 }
0x2c27   :  { %6627 = vmatprep.subr.bf16.mxu0 %v7013_v4 }
0x2c2a   :  { %6629 = vmatpush3.bf16.msra.mxu0 %v7975_v50 }
0x2c2b   :  { %6630 = vmatprep.subr.bf16.mxu0 %v7013_v4 }
0x2c2e   :  { %6632 = vmatpush3.bf16.msra.mxu0 %v7985_v25 }
0x2c2f   :  { %6645 = vmatprep.subr.bf16.mxu0 %v7013_v4 }
0x2cf4   :  { %v4102_v5 = vpop.f32.mrb[32].mxu0 }
0x2cf5   :  { %v4106_v34 = vadd.f32 %v4102_v5, %v7273_v48  ;;  %v6177_v15 = vpop.f32.mrb[33].mxu0 }
0x2cf7   :  { %v4177_v17 = vadd.f32 %v4174_v19, %v4106_v34 }
0x2cf9   :  { %v5437_v23 = vmul.f32 -1.442695, %v4177_v17 }
0x2cfb   :  { %6916 = vpow2.f32 %v5437_v23 }
0x2d05   :  { %v6917_v39 = vpop.eup %6916 }
0x2d06   :  { %v4181_v42 = vadd.f32 1.0, %v6917_v39 }
0x2d08   :  { %6918 = vrcp.f32 %v4181_v42 }
0x2d12   :  { %v6919_v33 = vpop.eup %6918 }
0x2d13   :  { %v4188_v3 = vmul.f32 %v6919_v33, %v4186_v40  ;;  %v4195_v62 = vsub.f32 1.0, %v6919_v33  ;;  %v4202_v36 = vmul.f32 %v6919_v33, %v3871_v45 }
0x2d15   :  { %4190 = vrot.lane.b32.xlu1 %v4188_v3, %s7016_s2 }
0x2d87   :  { %v4191_v56 = vpop.permute.xlu1 %4190 }
0x2d88   :  { %v4193_v1 = vadd.f32 %v4191_v56, %v4106_v34 }
0x2d8a   :  { %6920 = vtanh.f32 %v4193_v1 }
0x2d94   :  { %v6921_v14 = vpop.eup %6920 }
0x2d95   :  { %4197 = vrot.lane.b32.xlu0 %v6921_v14, %s7017_s27 }
0x2e07   :  { %v4198_v46 = vpop.permute.xlu0 %4197 }
0x2e08   :  { %v4200_v37 = vmul.f32 %v4198_v46, %v4195_v62 }
0x2e0a   :  { %v8286_v49 = vadd.f32 %v4202_v36, %v4200_v37 }
0x2e0c   :  { %4205 = vrot.lane.b32.xlu1 %v8286_v49, %s7017_s27 }
0x2e7e   :  { %v4206_v30 = vpop.permute.xlu1 %4205 }
0x2e7f   :  { %6198 = vmatmul.mubr.msk.f32.vlgmr.msra.gmra.mrb[38].mxu1 %vm155_vm0, %v4206_v30 }
0x2e80   :  { %6635 = vmatpush3.bf16.msra.mxu1 %v7876_v54  ;;  %6227 = vmatprep.mubr.msk.f32.mxu1 %vm7014_vm1, %v7015_v13 }
0x2e81   :  { %6636 = vmatprep.subr.bf16.mxu1 %v7013_v4 }
0x2e84   :  { %6638 = vmatpush3.bf16.msra.mxu1 %v7891_v61 }
0x2e85   :  { %6639 = vmatprep.subr.bf16.mxu1 %v7013_v4 }
0x2e87   :  { %6228 = vmatmul.mubr.msk.f32.vlgmr.msra.gmra.mrb[40].mxu1 %vm155_vm0, %v4206_v30 }
0x2e88   :  { %6641 = vmatpush3.bf16.msra.mxu1 %v7854_v43  ;;  %6238 = vmatprep.mubr.msk.f32.mxu1 %vm7014_vm1, %v7015_v13 }
0x2e89   :  { %6642 = vmatprep.subr.bf16.mxu1 %v7013_v4 }
0x2e8c   :  { %6644 = vmatpush3.bf16.msra.mxu1 %v7860_v16 }
0x2e8d   :  { %6657 = vmatprep.subr.bf16.mxu1 %v7013_v4 }
0x2f52   :  { %v4275_v26 = vpop.f32.mrb[38].mxu1 }
0x2f53   :  { %v4282_v45 = vrot.slane %v4275_v26, %v7906_v6  ;;  %v4325_v19 = vrot.slane %v4275_v26, %v7908_v7  ;;  %v6199_v35 = vpop.f32.mrb[39].mxu1 }
0x2f55   :  { %v4283_v9 = vadd.f32 %v4282_v45, %v7878_v18  ;;  %v4326_v24 = vadd.f32 %v7874_v60, %v4325_v19 }
0x2f57   :  { %6922 = vtanh.f32 %v4283_v9 }
0x2f58   :  { %6924 = vtanh.f32 %v4326_v24 }
0x2f5a   :  { %v4509_v55 = vpop.f32.mrb[40].mxu1 }
0x2f5b   :  { %v6229_v28 = vpop.f32.mrb[41].mxu1 }
0x2f61   :  { %v6923_v0 = vpop.eup %6922 }
0x2f62   :  { %v6925_v63 = vpop.eup %6924  ;;  %v4285_v8 = vmul.f32 %v8233_v11, %v6923_v0 }
0x2f63   :  { %v4328_v38 = vmul.f32 %v8233_v11, %v6925_v63 }
0x2f64   :  { %v4286_v31 = vsel %vm155_vm0, %v4285_v8, 0.0 }
0x2f65   :  { %v4329_v22 = vsel %vm155_vm0, %v4328_v38, 0.0  ;;  %4287 = vadd.xlane.f32.xlu0 %v4286_v31 }
0x2f66   :  { %4330 = vadd.xlane.f32.xlu1 %v4329_v22 }
0x2ff2   :  { %v4288_v10 = vpop.xlane.xlu0 %4287 }
0x2ff3   :  { %v4331_v41 = vpop.xlane.xlu1 %4330  ;;  %v4289_v29 = vadd.f32 %v8242_v12, %v4288_v10 }
0x2ff4   :  { %v4332_v57 = vadd.f32 %v8248_v27, %v4331_v41 }
0x2ff5   :  { %v4290_v52 = vsel %vm2601_vm10, %v4289_v29, -inf }
0x2ff6   :  { %v4333_v58 = vsel %vm2601_vm10, %v4332_v57, -inf  ;;  %v4291_v53 = vrot.slane %v4290_v52, 4 }
0x2ff7   :  { %v4334_v5 = vrot.slane %v4333_v58, 4 }
0x2ff8   :  { %v4292_v34 = vmax.f32 %v4290_v52, %v4291_v53 }
0x2ff9   :  { %v4335_v15 = vmax.f32 %v4333_v58, %v4334_v5 }
0x2ffa   :  { %v4293_v17 = vrot.slane %v4292_v34, 2 }
0x2ffb   :  { %v4336_v23 = vrot.slane %v4335_v15, 2 }
0x2ffc   :  { %v4294_v39 = vmax.f32 %v4292_v34, %v4293_v17 }
0x2ffd   :  { %v4337_v42 = vmax.f32 %v4335_v15, %v4336_v23 }
0x2ffe   :  { %v4295_v33 = vrot.slane %v4294_v39, 1 }
0x2fff   :  { %v4338_v40 = vrot.slane %v4337_v42, 1 }
0x3000   :  { %v4296_v3 = vmax.f32 %v4294_v39, %v4295_v33 }
0x3001   :  { %v4339_v56 = vmax.f32 %v4337_v42, %v4338_v40 }
0x3002   :  { %v4297_v1 = vsub.f32 %v4289_v29, %v4296_v3  ;;  %v4510_v29 = vadd.f32 %v8258_v51, %v4509_v55 }
0x3003   :  { %v4340_v14 = vsub.f32 %v4332_v57, %v4339_v56 }
0x3004   :  { %v4298_v62 = vmul.f32 1.442695, %v4297_v1  ;;  %v4514_v58 = vrot.slane %v4510_v29, 6 }
0x3005   :  { %v4341_v46 = vmul.f32 1.442695, %v4340_v14 }
0x3006   :  { %6926 = vpow2.f32 %v4298_v62 }
0x3007   :  { %6928 = vpow2.f32 %v4341_v46 }
0x3010   :  { %v6927_v36 = vpop.eup %6926 }
0x3011   :  { %v6929_v37 = vpop.eup %6928  ;;  %v4300_v30 = vsel %vm2601_vm10, %v6927_v36, 0.0 }
0x3012   :  { %v4343_v26 = vsel %vm2601_vm10, %v6929_v37, 0.0  ;;  %v4301_v45 = vrot.slane %v4300_v30, 4 }
0x3013   :  { %v4344_v19 = vrot.slane %v4343_v26, 4 }
0x3014   :  { %v4302_v35 = vadd.f32 %v4301_v45, %v4300_v30 }
0x3015   :  { %v4345_v9 = vadd.f32 %v4344_v19, %v4343_v26 }
0x3016   :  { %v4303_v24 = vrot.slane %v4302_v35, 2 }
0x3017   :  { %v4346_v28 = vrot.slane %v4345_v9, 2 }
0x3018   :  { %v4304_v0 = vadd.f32 %v4303_v24, %v4302_v35 }
0x3019   :  { %v4347_v63 = vadd.f32 %v4346_v28, %v4345_v9 }
0x301a   :  { %v4305_v8 = vrot.slane %v4304_v0, 1 }
0x301b   :  { %v4348_v38 = vrot.slane %v4347_v63, 1 }
0x301c   :  { %v4306_v31 = vadd.f32 %v4305_v8, %v4304_v0 }
0x301d   :  { %v4349_v22 = vadd.f32 %v4348_v38, %v4347_v63 }
0x301e   :  { %6930 = vrcp.f32 %v4306_v31 }
0x301f   :  { %6932 = vrcp.f32 %v4349_v22 }
0x3028   :  { %v6931_v10 = vpop.eup %6930 }
0x3029   :  { %v6933_v41 = vpop.eup %6932  ;;  %v4308_v57 = vmul.f32 %v6931_v10, %v6927_v36 }
0x302a   :  { %v4351_v52 = vmul.f32 %v6933_v41, %v6929_v37  ;;  %v4539_v41 = vrot.slane %v8286_v49, 6 }
0x302b   :  { %4311 = vperm.xlu0 %6727, %v4308_v57  }
0x302c   :  { %4354 = vperm.xlu1 %6728, %v4351_v52  }
0x302f   :  { %4523 = vrot.lane.b32.xlu0 %v4514_v58, %s7016_s2 }
0x30aa   :  { %v4312_v53 = vpop.permute.xlu0 %4311 }
0x30ab   :  { %v4355_v5 = vpop.permute.xlu1 %4354  ;;  %v4314_v34 = vmul.f32 %v4312_v53, %v7834_v32 }
0x30ac   :  { %v4357_v15 = vmul.f32 %v4355_v5, %v7839_v47 }
0x30ad   :  { %v4315_v17 = vsel %vm2237_vm9, %v4314_v34, 0.0 }
0x30ae   :  { %v4358_v23 = vsel %vm2237_vm9, %v4357_v15, 0.0  ;;  %v4316_v39 = vrot.slane %v4315_v17, 4  ;;  %v4524_v63 = vpop.permute.xlu0 %4523 }
0x30af   :  { %v4359_v42 = vrot.slane %v4358_v23, 4 }
0x30b0   :  { %v4317_v55 = vadd.f32 %v4316_v39, %v4315_v17 }
0x30b1   :  { %v4360_v33 = vadd.f32 %v4359_v42, %v4358_v23 }
0x30b2   :  { %v4318_v40 = vrot.slane %v4317_v55, 2 }
0x30b3   :  { %v4361_v3 = vrot.slane %v4360_v33, 2 }
0x30b4   :  { %v4319_v56 = vadd.f32 %v4318_v40, %v4317_v55 }
0x30b5   :  { %v4362_v1 = vadd.f32 %v4361_v3, %v4360_v33 }
0x30b6   :  { %v4320_v14 = vrot.slane %v4319_v56, 1 }
0x30b7   :  { %v4363_v62 = vrot.slane %v4362_v1, 1 }
0x30b8   :  { %v4321_v46 = vadd.f32 %v4320_v14, %v4319_v56 }
0x30b9   :  { %v4364_v36 = vadd.f32 %v4363_v62, %v4362_v1 }
0x30bb   :  { %v8325_v37 = vsel %vm2333_vm2, %v4321_v46, %v4364_v36 }
0x30bc   :  { %6217 = vmatmul.mubr.msk.f32.vlgmr.msra.gmra.mrb[34].mxu0 %vm2237_vm9, %v8325_v37 }
0x30bd   :  { %6647 = vmatpush3.bf16.msra.mxu0 %v7952_v20  ;;  %6257 = vmatprep.mubr.msk.f32.mxu0 %vm7014_vm1, %v7015_v13 }
0x30be   :  { %6648 = vmatprep.subr.bf16.mxu0 %v7013_v4 }
0x30c1   :  { %6650 = vmatpush3.bf16.msra.mxu0 %v7964_v21 }
0x30c2   :  { %6651 = vmatprep.subr.bf16.mxu0 %v7013_v4 }
0x30c5   :  { %6653 = vmatpush3.bf16.msra.mxu0 %v7975_v50 }
0x30c6   :  { %6654 = vmatprep.subr.bf16.mxu0 %v7013_v4 }
0x30c9   :  { %6656 = vmatpush3.bf16.msra.mxu0 %v7985_v25 }
0x30ca   :  { %6669 = vmatprep.subr.bf16.mxu0 %v7013_v4 }
0x318f   :  { %v4435_v30 = vpop.f32.mrb[34].mxu0 }
0x3190   :  { %v4440_v26 = vrot.slane %v4435_v30, 6  ;;  %v6218_v45 = vpop.f32.mrb[35].mxu0 }
0x3192   :  { %v4442_v19 = vadd.f32 %v4440_v26, %v7273_v48 }
0x3194   :  { %v4516_v35 = vadd.f32 %v4514_v58, %v4442_v19 }
0x3196   :  { %v5441_v9 = vmul.f32 -1.442695, %v4516_v35 }
0x3198   :  { %6934 = vpow2.f32 %v5441_v9 }
0x31a2   :  { %v6935_v24 = vpop.eup %6934 }
0x31a3   :  { %v4520_v28 = vadd.f32 1.0, %v6935_v24 }
0x31a5   :  { %6936 = vrcp.f32 %v4520_v28 }
0x31af   :  { %v6937_v0 = vpop.eup %6936 }
0x31b0   :  { %v4526_v8 = vmul.f32 %v6937_v0, %v4524_v63  ;;  %v4533_v10 = vsub.f32 1.0, %v6937_v0  ;;  %v4541_v57 = vmul.f32 %v6937_v0, %v4539_v41 }
0x31b2   :  { %4528 = vrot.lane.b32.xlu1 %v4526_v8, %s7016_s2 }
0x3224   :  { %v4529_v38 = vpop.permute.xlu1 %4528 }
0x3225   :  { %v4531_v31 = vadd.f32 %v4529_v38, %v4442_v19 }
0x3227   :  { %6938 = vtanh.f32 %v4531_v31 }
0x3231   :  { %v6939_v22 = vpop.eup %6938 }
0x3232   :  { %4535 = vrot.lane.b32.xlu0 %v6939_v22, %s7017_s27 }
0x32a4   :  { %v4536_v29 = vpop.permute.xlu0 %4535 }
0x32a5   :  { %v4538_v52 = vmul.f32 %v4536_v29, %v4533_v10 }
0x32a7   :  { %v8343_v58 = vadd.f32 %v4541_v57, %v4538_v52 }
0x32a9   :  { %v4544_v53 = vrot.slane %v8343_v58, 2 }
0x32ab   :  { %4545 = vrot.lane.b32.xlu1 %v4544_v53, %s7017_s27 }
0x331d   :  { %v4546_v5 = vpop.permute.xlu1 %4545 }
0x331e   :  { %6239 = vmatmul.mubr.msk.f32.vlgmr.msra.gmra.mrb[42].mxu1 %vm155_vm0, %v4546_v5 }
0x331f   :  { %6659 = vmatpush3.bf16.msra.mxu1 %v7876_v54  ;;  %6268 = vmatprep.mubr.msk.f32.mxu1 %vm7014_vm1, %v7015_v13 }
0x3320   :  { %6660 = vmatprep.subr.bf16.mxu1 %v7013_v4 }
0x3323   :  { %6662 = vmatpush3.bf16.msra.mxu1 %v7891_v61 }
0x3324   :  { %6663 = vmatprep.subr.bf16.mxu1 %v7013_v4 }
0x3326   :  { %6269 = vmatmul.mubr.msk.f32.vlgmr.msra.gmra.mrb[44].mxu1 %vm155_vm0, %v4546_v5 }
0x3327   :  { %6665 = vmatpush3.bf16.msra.mxu1 %v7854_v43  ;;  %6279 = vmatprep.mubr.msk.f32.mxu1 %vm7014_vm1, %v7015_v13 }
0x3328   :  { %6666 = vmatprep.subr.bf16.mxu1 %v7013_v4 }
0x332b   :  { %6668 = vmatpush3.bf16.msra.mxu1 %v7860_v16 }
0x332c   :  { %6681 = vmatprep.subr.bf16.mxu1 %v7013_v4 }
0x33f1   :  { %v4615_v34 = vpop.f32.mrb[42].mxu1 }
0x33f2   :  { %v4622_v15 = vrot.slane %v4615_v34, %v7906_v6  ;;  %v4665_v17 = vrot.slane %v4615_v34, %v7908_v7  ;;  %v6240_v23 = vpop.f32.mrb[43].mxu1 }
0x33f4   :  { %v4623_v39 = vadd.f32 %v4622_v15, %v7878_v18  ;;  %v4666_v42 = vadd.f32 %v7874_v60, %v4665_v17 }
0x33f6   :  { %6940 = vtanh.f32 %v4623_v39 }
0x33f7   :  { %6942 = vtanh.f32 %v4666_v42 }
0x33f9   :  { %v4849_v43 = vpop.f32.mrb[44].mxu1 }
0x33fa   :  { %v6270_v55 = vpop.f32.mrb[45].mxu1 }
0x3400   :  { %v6941_v33 = vpop.eup %6940 }
0x3401   :  { %v6943_v40 = vpop.eup %6942  ;;  %v4625_v16 = vmul.f32 %v8233_v11, %v6941_v33 }
0x3402   :  { %v4668_v3 = vmul.f32 %v8233_v11, %v6943_v40 }
0x3403   :  { %v4626_v56 = vsel %vm155_vm0, %v4625_v16, 0.0 }
0x3404   :  { %v4669_v1 = vsel %vm155_vm0, %v4668_v3, 0.0  ;;  %4627 = vadd.xlane.f32.xlu0 %v4626_v56 }
0x3405   :  { %4670 = vadd.xlane.f32.xlu1 %v4669_v1 }
0x3491   :  { %v4628_v14 = vpop.xlane.xlu0 %4627 }
0x3492   :  { %v4671_v62 = vpop.xlane.xlu1 %4670  ;;  %v4629_v46 = vadd.f32 %v8242_v12, %v4628_v14 }
0x3493   :  { %v4672_v36 = vadd.f32 %v8248_v27, %v4671_v62 }
0x3494   :  { %v4630_v30 = vsel %vm2601_vm10, %v4629_v46, -inf }
0x3495   :  { %v4673_v26 = vsel %vm2601_vm10, %v4672_v36, -inf  ;;  %v4631_v45 = vrot.slane %v4630_v30, 4 }
0x3496   :  { %v4674_v19 = vrot.slane %v4673_v26, 4 }
0x3497   :  { %v4632_v35 = vmax.f32 %v4630_v30, %v4631_v45 }
0x3498   :  { %v4675_v9 = vmax.f32 %v4673_v26, %v4674_v19 }
0x3499   :  { %v4633_v24 = vrot.slane %v4632_v35, 2 }
0x349a   :  { %v4676_v28 = vrot.slane %v4675_v9, 2 }
0x349b   :  { %v4634_v0 = vmax.f32 %v4632_v35, %v4633_v24 }
0x349c   :  { %v4677_v63 = vmax.f32 %v4675_v9, %v4676_v28 }
0x349d   :  { %v4635_v8 = vrot.slane %v4634_v0, 1 }
0x349e   :  { %v4678_v38 = vrot.slane %v4677_v63, 1 }
0x349f   :  { %v4636_v31 = vmax.f32 %v4634_v0, %v4635_v8 }
0x34a0   :  { %v4679_v22 = vmax.f32 %v4677_v63, %v4678_v38 }
0x34a1   :  { %v4637_v10 = vsub.f32 %v4629_v46, %v4636_v31  ;;  %v4850_v46 = vadd.f32 %v8258_v51, %v4849_v43 }
0x34a2   :  { %v4680_v41 = vsub.f32 %v4672_v36, %v4679_v22 }
0x34a3   :  { %v4638_v29 = vmul.f32 1.442695, %v4637_v10  ;;  %v4854_v26 = vrot.slane %v4850_v46, 4 }
0x34a4   :  { %v4681_v57 = vmul.f32 1.442695, %v4680_v41 }
0x34a5   :  { %6944 = vpow2.f32 %v4638_v29 }
0x34a6   :  { %6946 = vpow2.f32 %v4681_v57 }
0x34af   :  { %v6945_v52 = vpop.eup %6944 }
0x34b0   :  { %v6947_v53 = vpop.eup %6946  ;;  %v4640_v5 = vsel %vm2601_vm10, %v6945_v52, 0.0 }
0x34b1   :  { %v4683_v34 = vsel %vm2601_vm10, %v6947_v53, 0.0  ;;  %v4641_v15 = vrot.slane %v4640_v5, 4 }
0x34b2   :  { %v4684_v17 = vrot.slane %v4683_v34, 4 }
0x34b3   :  { %v4642_v23 = vadd.f32 %v4641_v15, %v4640_v5 }
0x34b4   :  { %v4685_v39 = vadd.f32 %v4684_v17, %v4683_v34 }
0x34b5   :  { %v4643_v42 = vrot.slane %v4642_v23, 2 }
0x34b6   :  { %v4686_v55 = vrot.slane %v4685_v39, 2 }
0x34b7   :  { %v4644_v33 = vadd.f32 %v4643_v42, %v4642_v23 }
0x34b8   :  { %v4687_v40 = vadd.f32 %v4686_v55, %v4685_v39 }
0x34b9   :  { %v4645_v16 = vrot.slane %v4644_v33, 1 }
0x34ba   :  { %v4688_v3 = vrot.slane %v4687_v40, 1 }
0x34bb   :  { %v4646_v56 = vadd.f32 %v4645_v16, %v4644_v33 }
0x34bc   :  { %v4689_v1 = vadd.f32 %v4688_v3, %v4687_v40 }
0x34bd   :  { %6948 = vrcp.f32 %v4646_v56 }
0x34be   :  { %6950 = vrcp.f32 %v4689_v1 }
0x34c7   :  { %v6949_v14 = vpop.eup %6948 }
0x34c8   :  { %v6951_v62 = vpop.eup %6950  ;;  %v4648_v36 = vmul.f32 %v6949_v14, %v6945_v52  ;;  %v5235_v52 = vrot.slane %v8325_v37, 6 }
0x34c9   :  { %v4691_v30 = vmul.f32 %v6951_v62, %v6947_v53 }
0x34ca   :  { %4651 = vperm.xlu0 %6727, %v4648_v36   ;;  %v5244_v15 = vsel %vm2335_vm3, %v8267_v59, %v5235_v52 }
0x34cb   :  { %4694 = vperm.xlu1 %6728, %v4691_v30   ;;  %v5226_v30 = vsel %vm2335_vm3, %v8286_v49, %v8343_v58 }
0x34ce   :  { %4863 = vrot.lane.b32.xlu0 %v4854_v26, %s7016_s2 }
0x3549   :  { %v4652_v45 = vpop.permute.xlu0 %4651 }
0x354a   :  { %v4695_v19 = vpop.permute.xlu1 %4694  ;;  %v4654_v35 = vmul.f32 %v4652_v45, %v7834_v32 }
0x354b   :  { %v4697_v9 = vmul.f32 %v4695_v19, %v7839_v47 }
0x354c   :  { %v4655_v24 = vsel %vm2237_vm9, %v4654_v35, 0.0 }
0x354d   :  { %v4698_v28 = vsel %vm2237_vm9, %v4697_v9, 0.0  ;;  %v4656_v0 = vrot.slane %v4655_v24, 4  ;;  %v4864_v16 = vpop.permute.xlu0 %4863 }
0x354e   :  { %v4699_v63 = vrot.slane %v4698_v28, 4 }
0x354f   :  { %v4657_v43 = vadd.f32 %v4656_v0, %v4655_v24 }
0x3550   :  { %v4700_v8 = vadd.f32 %v4699_v63, %v4698_v28 }
0x3551   :  { %v4658_v38 = vrot.slane %v4657_v43, 2 }
0x3552   :  { %v4701_v31 = vrot.slane %v4700_v8, 2 }
0x3553   :  { %v4659_v22 = vadd.f32 %v4658_v38, %v4657_v43 }
0x3554   :  { %v4702_v10 = vadd.f32 %v4701_v31, %v4700_v8 }
0x3555   :  { %v4660_v41 = vrot.slane %v4659_v22, 1 }
0x3556   :  { %v4703_v29 = vrot.slane %v4702_v10, 1 }
0x3557   :  { %v4661_v57 = vadd.f32 %v4660_v41, %v4659_v22 }
0x3558   :  { %v4704_v53 = vadd.f32 %v4703_v29, %v4702_v10 }
0x355a   :  { %v4705_v5 = vsel %vm2333_vm2, %v4661_v57, %v4704_v53 }
0x355b   :  { %6258 = vmatmul.mubr.msk.f32.vlgmr.msra.gmra.mrb[36].mxu0 %vm2237_vm9, %v4705_v5  ;;  %v5237_v34 = vrot.slane %v4705_v5, 4 }
0x355c   :  { %6671 = vmatpush3.bf16.msra.mxu0 %v7952_v20  ;;  %6298 = vmatprep.mubr.msk.f32.mxu0 %vm7014_vm1, %v7015_v13 }
0x355d   :  { %6672 = vmatprep.subr.bf16.mxu0 %v7013_v4  ;;  %v8391_v17 = vsel %vm2339_vm5, %v5244_v15, %v5237_v34 }
0x3560   :  { %6674 = vmatpush3.bf16.msra.mxu0 %v7964_v21  ;;  %v4879_v21 = vrot.slane %v8343_v58, 6 }
0x3561   :  { %6675 = vmatprep.subr.bf16.mxu0 %v7013_v4 }
0x3564   :  { %6677 = vmatpush3.bf16.msra.mxu0 %v7975_v50 }
0x3565   :  { %6678 = vmatprep.subr.bf16.mxu0 %v7013_v4 }
0x3568   :  { %6680 = vmatpush3.bf16.msra.mxu0 %v7985_v25 }
0x362e   :  { %v4775_v59 = vpop.f32.mrb[36].mxu0 }
0x362f   :  { %v4780_v20 = vrot.slane %v4775_v59, 4  ;;  %v6259_v37 = vpop.f32.mrb[37].mxu0 }
0x3631   :  { %v4782_v23 = vadd.f32 %v4780_v20, %v7273_v48 }
0x3633   :  { %v4856_v39 = vadd.f32 %v4854_v26, %v4782_v23 }
0x3635   :  { %v5445_v42 = vmul.f32 -1.442695, %v4856_v39 }
0x3637   :  { %6952 = vpow2.f32 %v5445_v42 }
0x3641   :  { %v6953_v55 = vpop.eup %6952 }
0x3642   :  { %v4860_v33 = vadd.f32 1.0, %v6953_v55 }
0x3644   :  { %6954 = vrcp.f32 %v4860_v33 }
0x364e   :  { %v6955_v40 = vpop.eup %6954 }
0x364f   :  { %v4866_v50 = vmul.f32 %v6955_v40, %v4864_v16  ;;  %v4881_v3 = vmul.f32 %v6955_v40, %v4879_v21  ;;  %v4873_v14 = vsub.f32 1.0, %v6955_v40 }
0x3651   :  { %4868 = vrot.lane.b32.xlu1 %v4866_v50, %s7016_s2 }
0x36c3   :  { %v4869_v25 = vpop.permute.xlu1 %4868 }
0x36c4   :  { %v4871_v56 = vadd.f32 %v4869_v25, %v4782_v23 }
0x36c6   :  { %6956 = vtanh.f32 %v4871_v56 }
0x36d0   :  { %v6957_v1 = vpop.eup %6956 }
0x36d1   :  { %4875 = vrot.lane.b32.xlu0 %v6957_v1, %s7017_s27 }
0x3743   :  { %v4876_v62 = vpop.permute.xlu0 %4875 }
0x3744   :  { %v4878_v46 = vmul.f32 %v4876_v62, %v4873_v14 }
0x3746   :  { %v8402_v36 = vadd.f32 %v4881_v3, %v4878_v46 }
0x3748   :  { %v4884_v26 = vrot.slane %v8402_v36, 4  ;;  %v8410_v45 = vsel %vm2339_vm5, %v5226_v30, %v8402_v36 }
0x374a   :  { %4885 = vrot.lane.b32.xlu1 %v4884_v26, %s7017_s27 }
0x37bc   :  { %v4886_v19 = vpop.permute.xlu1 %4885 }
0x37bd   :  { %6280 = vmatmul.mubr.msk.f32.vlgmr.msra.gmra.mrb[46].mxu1 %vm155_vm0, %v4886_v19 }
0x37be   :  { %6683 = vmatpush3.bf16.msra.mxu1 %v7876_v54  ;;  %6309 = vmatprep.mubr.msk.f32.mxu1 %vm7014_vm1, %v7015_v13 }
0x37bf   :  { %6684 = vmatprep.subr.bf16.mxu1 %v7013_v4 }
0x37c2   :  { %6686 = vmatpush3.bf16.msra.mxu1 %v7891_v61 }
0x37c5   :  { %6310 = vmatmul.mubr.msk.f32.vlgmr.msra.gmra.mrb[48].mxu1 %vm155_vm0, %v4886_v19 }
0x3890   :  { %v4955_v49 = vpop.f32.mrb[46].mxu1 }
0x3891   :  { %v4962_v58 = vrot.slane %v4955_v49, %v7906_v6  ;;  %v5005_v35 = vrot.slane %v4955_v49, %v7908_v7  ;;  %v6281_v9 = vpop.f32.mrb[47].mxu1 }
0x3893   :  { %v4963_v24 = vadd.f32 %v4962_v58, %v7878_v18  ;;  %v5006_v28 = vadd.f32 %v7874_v60, %v5005_v35 }
0x3895   :  { %6958 = vtanh.f32 %v4963_v24 }
0x3896   :  { %6960 = vtanh.f32 %v5006_v28 }
0x3898   :  { %v5189_v54 = vpop.f32.mrb[48].mxu1 }
0x3899   :  { %v6311_v13 = vpop.f32.mrb[49].mxu1  ;;  %v5190_v19 = vadd.f32 %v8258_v51, %v5189_v54 }
0x389b   :  { %v5194_v35 = vrot.slane %v5190_v19, 2  ;;  %v142_v19 = vld [vmem:[%s8564_s21 + $0x70] sm:$0xff] }
0x389f   :  { %v6959_v0 = vpop.eup %6958 }
0x38a0   :  { %v6961_v4 = vpop.eup %6960  ;;  %v4965_v61 = vmul.f32 %v8233_v11, %v6959_v0 }
0x38a1   :  { %v5008_v63 = vmul.f32 %v8233_v11, %v6961_v4 }
0x38a2   :  { %v4966_v43 = vsel %vm155_vm0, %v4965_v61, 0.0 }
0x38a3   :  { %v5009_v6 = vsel %vm155_vm0, %v5008_v63, 0.0  ;;  %4967 = vadd.xlane.f32.xlu0 %v4966_v43 }
0x38a4   :  { %5010 = vadd.xlane.f32.xlu1 %v5009_v6 }
0x3930   :  { %v4968_v7 = vpop.xlane.xlu0 %4967 }
0x3931   :  { %v5011_v18 = vpop.xlane.xlu1 %5010  ;;  %v4969_v60 = vadd.f32 %v8242_v12, %v4968_v7 }
0x3932   :  { %v5012_v8 = vadd.f32 %v8248_v27, %v5011_v18 }
0x3933   :  { %v4970_v38 = vsel %vm2601_vm10, %v4969_v60, -inf }
0x3934   :  { %v5013_v31 = vsel %vm2601_vm10, %v5012_v8, -inf  ;;  %v4971_v22 = vrot.slane %v4970_v38, 4 }
0x3935   :  { %v5014_v10 = vrot.slane %v5013_v31, 4 }
0x3936   :  { %v4972_v41 = vmax.f32 %v4970_v38, %v4971_v22 }
0x3937   :  { %v5015_v11 = vmax.f32 %v5013_v31, %v5014_v10 }
0x3938   :  { %v4973_v29 = vrot.slane %v4972_v41, 2 }
0x3939   :  { %v5016_v57 = vrot.slane %v5015_v11, 2 }
0x393a   :  { %v4974_v52 = vmax.f32 %v4972_v41, %v4973_v29 }
0x393b   :  { %v5017_v53 = vmax.f32 %v5015_v11, %v5016_v57 }
0x393c   :  { %v4975_v5 = vrot.slane %v4974_v52, 1 }
0x393d   :  { %v5018_v34 = vrot.slane %v5017_v53, 1 }
0x393e   :  { %v4976_v15 = vmax.f32 %v4974_v52, %v4975_v5 }
0x393f   :  { %v5019_v59 = vmax.f32 %v5017_v53, %v5018_v34 }
0x3940   :  { %v4977_v20 = vsub.f32 %v4969_v60, %v4976_v15  ;;  %v5219_v15 = vrot.slane %v8402_v36, 6 }
0x3941   :  { %v5020_v12 = vsub.f32 %v5012_v8, %v5019_v59 }
0x3942   :  { %v4978_v37 = vmul.f32 1.442695, %v4977_v20 }
0x3943   :  { %v5021_v27 = vmul.f32 1.442695, %v5020_v12 }
0x3944   :  { %6962 = vpow2.f32 %v4978_v37 }
0x3945   :  { %6964 = vpow2.f32 %v5021_v27  ;;  %v131_v27 = vld [vmem:[%s8564_s21 + $0x18] sm:$0xff] }
0x394e   :  { %v6963_v23 = vpop.eup %6962 }
0x394f   :  { %v6965_v39 = vpop.eup %6964  ;;  %v4980_v42 = vsel %vm2601_vm10, %v6963_v23, 0.0 }
0x3950   :  { %v5023_v55 = vsel %vm2601_vm10, %v6965_v39, 0.0  ;;  %v4981_v33 = vrot.slane %v4980_v42, 4 }
0x3951   :  { %v5024_v21 = vrot.slane %v5023_v55, 4 }
0x3952   :  { %v4982_v40 = vadd.f32 %v4981_v33, %v4980_v42  ;;  %v133_v42 = vld [vmem:[%s8564_s21 + $0x28] sm:$0xff]  ;;  %v134_v33 = vld [vmem:[%s8564_s21 + $0x30] sm:$0xff] }
0x3953   :  { %v5025_v16 = vadd.f32 %v5024_v21, %v5023_v55  ;;  %v135_v21 = vld [vmem:[%s8564_s21 + $0x38] sm:$0xff] }
0x3954   :  { %v4983_v50 = vrot.slane %v4982_v40, 2 }
0x3955   :  { %v5026_v3 = vrot.slane %v5025_v16, 2 }
0x3956   :  { %v4984_v25 = vadd.f32 %v4983_v50, %v4982_v40  ;;  %v6699_v40 = vpack.c.bf16 %v135_v21, %v134_v33  ;;  %v137_v50 = vld [vmem:[%s8564_s21 + $0x48] sm:$0xff] }
0x3957   :  { %v5027_v56 = vadd.f32 %v5026_v3, %v5025_v16  ;;  %v136_v16 = vld [vmem:[%s8564_s21 + $0x40] sm:$0xff] }
0x3958   :  { %v4985_v1 = vrot.slane %v4984_v25, 1  ;;  %v6703_v3 = vpack.c.bf16 %v137_v50, %v136_v16 }
0x3959   :  { %v5028_v14 = vrot.slane %v5027_v56, 1 }
0x395a   :  { %v4986_v62 = vadd.f32 %v4985_v1, %v4984_v25  ;;  %v138_v25 = vld [vmem:[%s8564_s21 + $0x50] sm:$0xff] }
0x395b   :  { %v5029_v46 = vadd.f32 %v5028_v14, %v5027_v56  ;;  %v139_v56 = vld [vmem:[%s8564_s21 + $0x58] sm:$0xff]  ;;  %v140_v14 = vld [vmem:[%s8564_s21 + $0x60] sm:$0xff] }
0x395c   :  { %6966 = vrcp.f32 %v4986_v62  ;;  %v6707_v1 = vpack.c.bf16 %v139_v56, %v138_v25  ;;  %v141_v62 = vld [vmem:[%s8564_s21 + $0x68] sm:$0xff] }
0x395d   :  { %6968 = vrcp.f32 %v5029_v46  ;;  %v6711_v46 = vpack.c.bf16 %v141_v62, %v140_v14 }
0x3966   :  { %v6967_v30 = vpop.eup %6966 }
0x3967   :  { %v6969_v26 = vpop.eup %6968  ;;  %v4988_v49 = vmul.f32 %v6967_v30, %v6963_v23 }
0x3968   :  { %v5031_v58 = vmul.f32 %v6969_v26, %v6965_v39  ;;  %v132_v39 = vld [vmem:[%s8564_s21 + $0x20] sm:$0xff] }
0x3969   :  { %4991 = vperm.xlu0 %6727, %v4988_v49   ;;  %v6695_v55 = vpack.c.bf16 %v133_v42, %v132_v39  ;;  %v143_v49 = vld [vmem:[%s8564_s21 + $0x78] sm:$0xff] }
0x396a   :  { %5034 = vperm.xlu1 %6728, %v5031_v58   ;;  %v6715_v58 = vpack.c.bf16 %v143_v49, %v142_v19 }
0x396d   :  { %5203 = vrot.lane.b32.xlu0 %v5194_v35, %s7016_s2 }
0x39e8   :  { %v4992_v9 = vpop.permute.xlu0 %4991 }
0x39e9   :  { %v5035_v24 = vpop.permute.xlu1 %5034  ;;  %v4994_v28 = vmul.f32 %v4992_v9, %v7834_v32 }
0x39ea   :  { %v5037_v13 = vmul.f32 %v5035_v24, %v7839_v47  ;;  %v6987_v24 = vld [vmem:[%s8589_s8] sm:$0xff] }
0x39eb   :  { %v4995_v0 = vsel %vm2237_vm9, %v4994_v28, 0.0  ;;  %v5271_v28 = vsel %vm155_vm0, %v6987_v24, %v8207_v44 }
0x39ec   :  { %v5038_v4 = vsel %vm2237_vm9, %v5037_v13, 0.0  ;;  %v4996_v61 = vrot.slane %v4995_v0, 4  ;;  %v5204_v20 = vpop.permute.xlu0 %5203 }
0x39ed   :  { %v5039_v63 = vrot.slane %v5038_v4, 4 }
0x39ee   :  { %v4997_v51 = vadd.f32 %v4996_v61, %v4995_v0 }
0x39ef   :  { %v5040_v54 = vadd.f32 %v5039_v63, %v5038_v4 }
0x39f0   :  { %v4998_v43 = vrot.slane %v4997_v51, 2 }
0x39f1   :  { %v5041_v6 = vrot.slane %v5040_v54, 2 }
0x39f2   :  { %v4999_v7 = vadd.f32 %v4998_v43, %v4997_v51 }
0x39f3   :  { %v5042_v18 = vadd.f32 %v5041_v6, %v5040_v54 }
0x39f4   :  { %v5000_v60 = vrot.slane %v4999_v7, 1 }
0x39f5   :  { %v5043_v8 = vrot.slane %v5042_v18, 1 }
0x39f6   :  { %v5001_v38 = vadd.f32 %v5000_v60, %v4999_v7 }
0x39f7   :  { %v5044_v31 = vadd.f32 %v5043_v8, %v5042_v18 }
0x39f9   :  { %v5045_v32 = vsel %vm2333_vm2, %v5001_v38, %v5044_v31 }
0x39fa   :  { %6299 = vmatmul.mubr.msk.f32.vlgmr.msra.gmra.mrb[38].mxu0 %vm2237_vm9, %v5045_v32  ;;  %v5239_v47 = vrot.slane %v5045_v32, 2 }
0x39fc   :  { %v5246_v22 = vsel %vm2343_vm7, %v8391_v17, %v5239_v47  ;;  %v130_v17 = vld [vmem:[%s8564_s21 + $0x10] sm:$0xff] }
0x39fd   :  { %v6729_v10 = vpack.i.bf16 %v5246_v22, %v8189_v2  ;;  %v129_v2 = vld [vmem:[%s8564_s21 + $0x8] sm:$0xff]  ;;  %v6691_v23 = vpack.c.bf16 %v131_v27, %v130_v17 }
0x3acd   :  { %v5115_v41 = vpop.f32.mrb[38].mxu0 }
0x3ace   :  { %v5120_v11 = vrot.slane %v5115_v41, 2  ;;  %v6300_v29 = vpop.f32.mrb[39].mxu0 }
0x3ad0   :  { %v5122_v57 = vadd.f32 %v5120_v11, %v7273_v48  ;;  %v128_v48 = vld [vmem:[%s8564_s21] sm:$0xff] }
0x3ad1   :  { %v6687_v36 = vpack.c.bf16 %v129_v2, %v128_v48 }
0x3ad2   :  { %v5196_v52 = vadd.f32 %v5194_v35, %v5122_v57 }
0x3ad3   :  { %6688 = vmatprep.subr.bf16.mxu1 %v6687_v36 }
0x3ad4   :  { %v5449_v53 = vmul.f32 -1.442695, %v5196_v52  ;;  %6690 = vmatpush3.bf16.msra.mxu1 %v6687_v36 }
0x3ad5   :  { %6692 = vmatprep.subr.bf16.mxu1 %v6691_v23 }
0x3ad6   :  { %6970 = vpow2.f32 %v5449_v53 }
0x3ad8   :  { %6694 = vmatpush3.bf16.msra.mxu1 %v6691_v23 }
0x3ad9   :  { %6696 = vmatprep.subr.bf16.mxu1 %v6695_v55 }
0x3adc   :  { %6698 = vmatpush3.bf16.msra.mxu1 %v6695_v55 }
0x3add   :  { %6700 = vmatprep.subr.bf16.mxu1 %v6699_v40 }
0x3ae0   :  { %v6971_v5 = vpop.eup %6970  ;;  %6702 = vmatpush3.bf16.msra.mxu1 %v6699_v40 }
0x3ae1   :  { %v5200_v34 = vadd.f32 1.0, %v6971_v5  ;;  %6704 = vmatprep.subr.bf16.mxu1 %v6703_v3 }
0x3ae3   :  { %6972 = vrcp.f32 %v5200_v34 }
0x3ae4   :  { %6706 = vmatpush3.bf16.msra.mxu1 %v6703_v3 }
0x3ae5   :  { %6708 = vmatprep.subr.bf16.mxu1 %v6707_v1 }
0x3ae8   :  { %6710 = vmatpush3.bf16.msra.mxu1 %v6707_v1 }
0x3ae9   :  { %6712 = vmatprep.subr.bf16.mxu1 %v6711_v46 }
0x3aec   :  { %6714 = vmatpush3.bf16.msra.mxu1 %v6711_v46 }
0x3aed   :  { %v6973_v59 = vpop.eup %6972  ;;  %6716 = vmatprep.subr.bf16.mxu1 %v6715_v58 }
0x3aee   :  { %v5206_v12 = vmul.f32 %v6973_v59, %v5204_v20  ;;  %v5221_v37 = vmul.f32 %v6973_v59, %v5219_v15  ;;  %v5213_v4 = vsub.f32 1.0, %v6973_v59 }
0x3af0   :  { %5208 = vrot.lane.b32.xlu1 %v5206_v12, %s7016_s2  ;;  %6718 = vmatpush3.bf16.msra.mxu1 %v6715_v58 }
0x3af4   :  { %6730 = vrot.lane.b32.xlu1 %v6729_v10, %s7016_s2 }
0x3b62   :  { %v5209_v30 = vpop.permute.xlu1 %5208 }
0x3b63   :  { %v5211_v26 = vadd.f32 %v5209_v30, %v5122_v57 }
0x3b65   :  { %6974 = vtanh.f32 %v5211_v26 }
0x3b66   :  { %v6731_v35 = vpop.permute.xlu1 %6730 }
0x3b67   :  { %v6732_v9 = vunpack.i.l.bf16 %v6731_v35  ;;  %v6733_v43 = vunpack.i.h.bf16 %v6731_v35 }
0x3b69   :  { %v5273_v13 = vsel %vm2237_vm9, %v5271_v28, %v6732_v9 }
0x3b6a   :  { %6344 = vmatprep.mubr.f32.mxu1 %v5273_v13 }
0x3b6f   :  { %v6975_v0 = vpop.eup %6974 }
0x3b70   :  { %5215 = vrot.lane.b32.xlu0 %v6975_v0, %s7017_s27 }
0x3b74   :  { %5249 = vrot.lane.b32.xlu0 %v8207_v44, %s7017_s27  ;;  %v6988_v44 = vld [vmem:[%s8589_s8 + $0x8] sm:$0xff] }
0x3be2   :  { %v5216_v61 = vpop.permute.xlu0 %5215 }
0x3be3   :  { %v5218_v63 = vmul.f32 %v5216_v61, %v5213_v4 }
0x3be5   :  { %v5222_v51 = vadd.f32 %v5221_v37, %v5218_v63 }
0x3be6   :  { %v5250_v54 = vpop.permute.xlu0 %5249 }
0x3be7   :  { %5255 = vst.msk [vmem:[%s8565_s22] sm:$0xff] %vm155_vm0, %v5250_v54  ;;  %5258 = vrot.lane.b32.xlu0 %v5222_v51, %s7017_s27  ;;  %v5228_v6 = vsel %vm2343_vm7, %v8410_v45, %v5222_v51 }
0x3be8   :  { %5251 = vrot.lane.b32.xlu1 %v5228_v6, %s7017_s27  ;;  %v5272_v7 = vsel %vm155_vm0, %v6988_v44, %v5228_v6  ;;  %s6989_s27 = scalar_lea.vmem %s5361_s6, 32 }
0x3be9   :  { %v5274_v18 = vsel %vm2237_vm9, %v5272_v7, %v6733_v43  ;;  %p6990_p0 = scmp.ne.s32.totalorder %s5361_s6, %s6989_s27  ;;  %p6995_p2 = scmp.lt.s32.totalorder %s6989_s27, %s6989_s27 }
0x3bea   :  { %6345 = vmatmul.mubr.f32.vlgmr.msra.gmra.mrb[50].mxu1 %v5274_v18 }
0x3beb   :  { %p6996_p3 = por %p6995_p2, %p6994_p1 }
0x3bed   :  { %p6997_p4 = pnand %p6996_p3, %p6990_p0 }
0x3c59   :  { %v5259_v60 = vpop.permute.xlu0 %5258 }
0x3c5a   :  { %5262 = vst.msk [vmem:[#allocation2 - $0x6] sm:$0xc0] %vm5261_vm11, %v5259_v60  ;;  %v5252_v8 = vpop.permute.xlu1 %5251 }
0x3c5b   :  { %5256 = vst.msk [vmem:[%s8565_s22 + $0x8] sm:$0xff] %vm155_vm0, %v5252_v8 }
0x3c5c   :  { %7000 = shalt.err (!%p6997_p4)
}
0x3c5d   :  { %s7001_s19 = scalar_lea.hbm %s8566_s23, 32 }
0x3c5e   :  { %p7002_p5 = scmp.ne.s32.totalorder %s8566_s23, %s7001_s19  ;;  %p7005_p6 = scmp.lt.u32.totalorder %s7001_s19, %s8566_s23 }
0x3c60   :  { %p7007_p7 = pnand %p7005_p6, %p7002_p5 }
0x3c62   :  { %7010 = shalt.err (!%p7007_p7)
}
0x3c63   :  { %5363 = dma.vmem_to_hbm [thread:$0]  %s5361_s6, 32, %s8566_s23, [#allocation3]  }
0x3cbd   :  { %v6346_v45 = vpop.f32.mrb[50].mxu1 }
0x3cbe   :  { %5351 = vst.msk [vmem:[%s8567_s24 + $0x8] sm:$0xff] %vm155_vm0, %v6346_v45  ;;  %v5341_v38 = vpop.f32.mrb[51].mxu1 }
0x3cbf   :  { %5350 = vst.msk [vmem:[%s8567_s24] sm:$0xff] %vm155_vm0, %v5341_v38 }
0x3cc0   :  { %7011 = dma.done.wait [#allocation3], 32  }
0x3cc1   :  { %7012 = vsyncadd [#allocation3], 4294967264 }
0x3cc2   :  { %5373 = vsyncpa [#allocation3], 1 }

</bundles_post_ra>
